<compile_context>
chip_gen: v7x
topology: tpu7x:2x2x1
jax: 0.10.0
libtpu: 0.0.40
codegen_flags: <defaults>
</compile_context>

<pallas_src>
import functools
import math

import jax
import jax.numpy as jnp
from jax.experimental import pallas as pl
from jax.experimental.pallas import tpu as pltpu

_MXU_DTYPE = jnp.bfloat16          # MXU operand dtype (bf16-native on v5e/v6e/v7x)
_VMEM_LIMIT = 32 * 1024 * 1024     # explicit scoped-VMEM cap (v7x-safe)


def _gelu(x):
    # TODO(synk): PyTorch nn.GELU defaults to the exact erf GELU; the tanh
    # approximation is used here (guaranteed EUP lowering), ~1e-3 rel difference.
    c = math.sqrt(2.0 / math.pi)
    return 0.5 * x * (1.0 + jnp.tanh(c * (x + 0.044715 * x * x * x)))


# --------------------------------------------------------------------------
# Flat (S, S) spatial operators (cheap XLA glue, built once per forward call).
# For X (H, W) flattened row-major into a row vector x of length S = H*W:
#     vec(L @ X @ R) = x @ kron(L^T, R)
# --------------------------------------------------------------------------
def _row_op(l_mat, r_mat):
    return jnp.kron(l_mat.T, r_mat)


def _patch_linear_op(w_lin, b_lin, h, w, p):
    """nn.Linear over flattened p*p patches as a block-diagonal (S,S) row-operator."""
    hp, wp, s = h // p, w // p, h * w
    w4 = w_lin.reshape(p, p, p, p)                        # [oi, oj, ii, jj]
    t8 = jnp.einsum('hq,wv,ouij->hiwjqovu',
                    jnp.eye(hp, dtype=w_lin.dtype),
                    jnp.eye(wp, dtype=w_lin.dtype), w4)
    t_p = t8.reshape(s, s)                                # [s_in, s_out]
    b_s = jnp.broadcast_to(b_lin.reshape(1, p, 1, p), (hp, p, wp, p)).reshape(s)
    return t_p, b_s


def _dw_shift_ops(h, w):
    """9 zero-padded 3x3-conv tap shifts as (S,S) row-operators (shared across channels)."""
    ops = []
    for dy in (-1, 0, 1):
        for dx in (-1, 0, 1):
            ops.append(_row_op(jnp.eye(h, k=dy, dtype=jnp.float32),
                               jnp.eye(w, k=-dx, dtype=jnp.float32)))
    return jnp.stack(ops)                                 # (9, S, S), idx = (dy+1)*3+(dx+1)


# ------------------------------- kernel ------------------------------------

def _ms_mlp_tail_kernel(x_ref, ng_ref, nb_ref, wfc1_ref, tpre_ref, tmid_ref,
                        tpost_ref, bs_ref, wfc2_ref, fg_ref, fb_ref, wffn1_ref,
                        d_ref, wdw_ref, wffn2_ref, o_ref, *, c, eps):
    f32 = jnp.float32

    def layer_norm_c(x, g_ref, b_ref):
        # per-pixel LayerNorm over the channel (sublane) axis of a (C, S) tile
        mu = jnp.mean(x, axis=0, keepdims=True)
        xc = x - mu
        var = jnp.mean(xc * xc, axis=0, keepdims=True)
        y = xc * jax.lax.rsqrt(var + eps)
        return y * g_ref[...].astype(f32) + b_ref[...].astype(f32)

    def mm(a, b):
        # MXU matmul: bf16 operands, f32 accumulation
        return jnp.dot(a.astype(_MXU_DTYPE), b.astype(_MXU_DTYPE),
                       preferred_element_type=f32)

    x0 = x_ref[0].astype(f32)                                      # (C, S)

    # 1) LayerNorm2d + fc1 (1x1 conv, C -> 3C, no bias)
    x2 = mm(wfc1_ref[...], layer_norm_c(x0, ng_ref, nb_ref))       # (3C, S)

    # 2) three spatial-mixing branches + gating; fc2 accumulated per branch
    #    (mathematically identical to fc2 @ concat(g1,g2,g3), no concat needed)
    wfc2 = wfc2_ref[...]
    x_sp = jnp.zeros_like(x0)
    for br in range(3):
        xb = x2[br * c:(br + 1) * c]                               # (C, S)
        t = mm(xb, tpre_ref[br])                                   # pre-sandwich
        t = mm(t, tmid_ref[br]) + bs_ref[br].astype(f32)           # patch Linear + bias
        t = mm(t, tpost_ref[br])                                   # post-sandwich
        x_sp = x_sp + mm(wfc2[:, br * c:(br + 1) * c], xb * t)     # gate + fc2 slice
    x_out1 = x_sp + x0                                             # (C, S)

    # 3) FFN: LayerNorm2d + 1x1 conv (C -> 4C) + GELU
    h1 = _gelu(mm(wffn1_ref[...], layer_norm_c(x_out1, fg_ref, fb_ref)))   # (4C, S)

    # 4) depthwise 3x3 conv (pad=1, groups=4C) via 9 shared shift-operator matmuls
    #    weighted per channel (MXU work, no padded tap tensors in HBM), then GELU
    wdw = wdw_ref[...].astype(f32)                                 # (4C, 9)
    acc = jnp.zeros_like(h1)
    for k in range(9):
        acc = acc + mm(h1, d_ref[k]) * wdw[:, k:k + 1]
    h2 = _gelu(acc)

    # 5) 1x1 conv (4C -> C) + residual
    o_ref[0] = (mm(wffn2_ref[...], h2) + x_out1).astype(o_ref.dtype)


# ------------------------------- wrapper ------------------------------------

def ms_mlp_tail_forward(x0, m1, n1, m2, n2, k1, k2, prm, patch=4, eps=1e-6):
    b, c, h, w = x0.shape
    assert h % patch == 0 and w % patch == 0
    s = h * w

    # Build the flat spatial operators (tiny: kron / einsum on (S,S) matrices).
    eye_h = jnp.eye(h, dtype=jnp.float32)
    eye_w = jnp.eye(w, dtype=jnp.float32)
    t_pre = jnp.stack([_row_op(eye_h, eye_w), _row_op(k1, k2), _row_op(m1, n1)])
    t_post = jnp.stack([_row_op(eye_h, eye_w), _row_op(k1, k2), _row_op(m2, n2)])
    tp1, bs1 = _patch_linear_op(prm['lin1_w'], prm['lin1_b'], h, w, patch)
    tp2, bs2 = _patch_linear_op(prm['lin2_w'], prm['lin2_b'], h, w, patch)
    tp3, bs3 = _patch_linear_op(prm['lin3_w'], prm['lin3_b'], h, w, patch)
    t_mid = jnp.stack([tp1, tp2, tp3])
    bias_s = jnp.stack([bs1, bs2, bs3]).reshape(3, 1, s)
    d_stack = _dw_shift_ops(h, w)

    # Pre-cast the MXU operator stacks to bf16 (halves DMA + VMEM footprint).
    t_pre = t_pre.astype(_MXU_DTYPE)
    t_mid = t_mid.astype(_MXU_DTYPE)
    t_post = t_post.astype(_MXU_DTYPE)
    d_stack = d_stack.astype(_MXU_DTYPE)

    x0_s = x0.reshape(b, c, s)   # lane-dense NCHW view, lane dim = H*W
    # TODO(synk): single-block-per-image design assumes the (S,S) operator stacks fit
    # VMEM (fine up to S ~ 1k in bf16); larger images need an S-tiled / HBM variant.
    kern = functools.partial(_ms_mlp_tail_kernel, c=c, eps=eps)
    out = pl.pallas_call(
        kern,
        out_shape=jax.ShapeDtypeStruct((b, c, s), x0.dtype),
        grid=(b,),
        in_specs=[
            pl.BlockSpec((1, c, s), lambda i: (i, 0, 0)),       # x0
            pl.BlockSpec((c, 1), lambda i: (0, 0)),             # norm gamma
            pl.BlockSpec((c, 1), lambda i: (0, 0)),             # norm beta
            pl.BlockSpec((3 * c, c), lambda i: (0, 0)),         # fc1 weight
            pl.BlockSpec((3, s, s), lambda i: (0, 0, 0)),       # pre-sandwich ops
            pl.BlockSpec((3, s, s), lambda i: (0, 0, 0)),       # patch-linear ops
            pl.BlockSpec((3, s, s), lambda i: (0, 0, 0)),       # post-sandwich ops
            pl.BlockSpec((3, 1, s), lambda i: (0, 0, 0)),       # patch-linear biases
            pl.BlockSpec((c, 3 * c), lambda i: (0, 0)),         # fc2 weight
            pl.BlockSpec((c, 1), lambda i: (0, 0)),             # ffn gamma
            pl.BlockSpec((c, 1), lambda i: (0, 0)),             # ffn beta
            pl.BlockSpec((4 * c, c), lambda i: (0, 0)),         # ffn conv1 weight
            pl.BlockSpec((9, s, s), lambda i: (0, 0, 0)),       # dw-conv tap shifts
            pl.BlockSpec((4 * c, 9), lambda i: (0, 0)),         # dw-conv weights
            pl.BlockSpec((c, 4 * c), lambda i: (0, 0)),         # ffn conv2 weight
        ],
        out_specs=pl.BlockSpec((1, c, s), lambda i: (i, 0, 0)),
        compiler_params=pltpu.CompilerParams(
            dimension_semantics=("parallel",),
            vmem_limit_bytes=_VMEM_LIMIT),
    )(x0_s,
      prm['norm_gamma'].reshape(c, 1), prm['norm_beta'].reshape(c, 1), prm['w_fc1'],
      t_pre, t_mid, t_post, bias_s, prm['w_fc2'],
      prm['ffn_gamma'].reshape(c, 1), prm['ffn_beta'].reshape(c, 1), prm['w_ffn1'],
      d_stack, prm['w_dw'].reshape(4 * c, 9), prm['w_ffn2'])
    return out.reshape(b, c, h, w)


# --------------------- pure-jnp reference (mirrors PyTorch) -----------------

def _reference_forward(x0, m1, n1, m2, n2, k1, k2, prm, patch, eps):
    b, c, h, w = x0.shape
    p = patch

    def ln(x, g, bta):
        mu = jnp.mean(x, axis=1, keepdims=True)
        var = jnp.mean((x - mu) ** 2, axis=1, keepdims=True)
        y = (x - mu) / jnp.sqrt(var + eps)
        return g.reshape(1, -1, 1, 1) * y + bta.reshape(1, -1, 1, 1)

    def conv1x1(x, wt):
        return jnp.einsum('oi,bihw->bohw', wt, x)

    def sandwich(x, l_mat, r_mat):
        return jnp.einsum('ij,bcjk,kl->bcil', l_mat, x, r_mat)

    def patch_partition(x):
        bb, cc, hh, ww = x.shape
        x1 = x.reshape(bb, cc, hh // p, p, ww // p, p)
        return jnp.transpose(x1, (0, 1, 2, 4, 3, 5)).reshape(-1, cc, p, p)

    def patch_reverse(patches):
        bb = patches.shape[0] // ((h * w) // (p * p))
        x = patches.reshape(bb, -1, h // p, w // p, p, p)
        return jnp.transpose(x, (0, 1, 2, 4, 3, 5)).reshape(bb, -1, h, w)

    def patch_branch(x, lw, lb):
        patches = patch_partition(x)
        n_, c_ = patches.shape[0], patches.shape[1]
        v = patches.reshape(n_, c_, p * p) @ lw.T + lb
        return patch_reverse(v.reshape(n_, c_, p, p))

    x1 = ln(x0, prm['norm_gamma'], prm['norm_beta'])
    x2 = conv1x1(x1, prm['w_fc1'])
    x2_1, x2_2, x2_3 = x2[:, :c], x2[:, c:2 * c], x2[:, 2 * c:]
    g1 = x2_1 * patch_branch(x2_1, prm['lin1_w'], prm['lin1_b'])
    x6 = sandwich(patch_branch(sandwich(x2_2, k1, k2), prm['lin2_w'], prm['lin2_b']), k1, k2)
    g2 = x2_2 * x6
    x9 = sandwich(patch_branch(sandwich(x2_3, m1, n1), prm['lin3_w'], prm['lin3_b']), m2, n2)
    g3 = x2_3 * x9
    x_out1 = conv1x1(jnp.concatenate([g1, g2, g3], axis=1), prm['w_fc2']) + x0

    y = _gelu(conv1x1(ln(x_out1, prm['ffn_gamma'], prm['ffn_beta']), prm['w_ffn1']))
    yp = jnp.pad(y, ((0, 0), (0, 0), (1, 1), (1, 1)))
    acc = jnp.zeros_like(y)
    for u in range(3):
        for v in range(3):
            acc = acc + yp[:, :, u:u + h, v:v + w] * prm['w_dw'][:, u, v].reshape(1, -1, 1, 1)
    y = _gelu(acc)
    return conv1x1(y, prm['w_ffn2']) + x_out1


# ------------------------------- parameters ---------------------------------

def init_params(key, dim, patch):
    sp = patch * patch
    ks = jax.random.split(key, 11)
    s = 0.1
    return dict(
        norm_gamma=jnp.ones((dim,), jnp.float32),
        norm_beta=jnp.zeros((dim,), jnp.float32),
        w_fc1=s * jax.random.normal(ks[0], (3 * dim, dim), jnp.float32),    # (out, in)
        w_fc2=s * jax.random.normal(ks[1], (dim, 3 * dim), jnp.float32),    # (out, in)
        lin1_w=s * jax.random.normal(ks[2], (sp, sp), jnp.float32),         # (out, in)
        lin1_b=s * jax.random.normal(ks[3], (sp,), jnp.float32),
        lin2_w=s * jax.random.normal(ks[4], (sp, sp), jnp.float32),
        lin2_b=s * jax.random.normal(ks[5], (sp,), jnp.float32),
        lin3_w=s * jax.random.normal(ks[6], (sp, sp), jnp.float32),
        lin3_b=s * jax.random.normal(ks[7], (sp,), jnp.float32),
        ffn_gamma=jnp.ones((dim,), jnp.float32),
        ffn_beta=jnp.zeros((dim,), jnp.float32),
        w_ffn1=s * jax.random.normal(ks[8], (4 * dim, dim), jnp.float32),   # (out, in)
        w_dw=s * jax.random.normal(ks[9], (4 * dim, 3, 3), jnp.float32),
        w_ffn2=s * jax.random.normal(ks[10], (dim, 4 * dim), jnp.float32),  # (out, in)
    )


# --------------------------------- main --------------------------------------

if __name__ == "__main__":
    B, C, H, W, P = 2, 4, 16, 16, 4
    key = jax.random.PRNGKey(0)
    kx, km1, kn1, km2, kn2, kk1, kk2, kp = jax.random.split(key, 8)

    x0 = jax.random.normal(kx, (B, C, H, W), jnp.float32)
    m1 = 0.1 * jax.random.normal(km1, (H, H), jnp.float32)
    n1 = 0.1 * jax.random.normal(kn1, (W, W), jnp.float32)
    m2 = 0.1 * jax.random.normal(km2, (H, H), jnp.float32)
    n2 = 0.1 * jax.random.normal(kn2, (W, W), jnp.float32)
    k1 = 0.1 * jax.random.normal(kk1, (H, H), jnp.float32)
    k2 = 0.1 * jax.random.normal(kk2, (W, W), jnp.float32)

    params = init_params(kp, C, P)

    fwd = jax.jit(functools.partial(ms_mlp_tail_forward, patch=P))
    out = jax.block_until_ready(fwd(x0, m1, n1, m2, n2, k1, k2, params))

    ref_fn = jax.jit(functools.partial(_reference_forward, patch=P, eps=1e-6))
    ref = jax.block_until_ready(ref_fn(x0, m1, n1, m2, n2, k1, k2, params))

    assert out.shape == (B, C, H, W)
    assert bool(jnp.all(jnp.isfinite(out)))
    max_err = float(jnp.max(jnp.abs(out - ref)))
    assert max_err < 3e-2, f"kernel/reference mismatch: max abs err = {max_err}"
    print("KERNEL_OK")
</pallas_src>

<mosaic_0001>
module attributes {stable_mosaic.version = 11 : i64} {
  func.func @_ms_mlp_tail_kernel(%arg0: i32, %arg1: memref<1x4x256xf32, #tpu.memory_space<vmem>>, %arg2: memref<4x1xf32, #tpu.memory_space<vmem>>, %arg3: memref<4x1xf32, #tpu.memory_space<vmem>>, %arg4: memref<12x4xf32, #tpu.memory_space<vmem>>, %arg5: memref<3x256x256xbf16, #tpu.memory_space<vmem>>, %arg6: memref<3x256x256xbf16, #tpu.memory_space<vmem>>, %arg7: memref<3x256x256xbf16, #tpu.memory_space<vmem>>, %arg8: memref<3x1x256xf32, #tpu.memory_space<vmem>>, %arg9: memref<4x12xf32, #tpu.memory_space<vmem>>, %arg10: memref<4x1xf32, #tpu.memory_space<vmem>>, %arg11: memref<4x1xf32, #tpu.memory_space<vmem>>, %arg12: memref<16x4xf32, #tpu.memory_space<vmem>>, %arg13: memref<9x256x256xbf16, #tpu.memory_space<vmem>>, %arg14: memref<16x9xf32, #tpu.memory_space<vmem>>, %arg15: memref<4x16xf32, #tpu.memory_space<vmem>>, %arg16: memref<1x4x256xf32, #tpu.memory_space<vmem>>) attributes {dimension_semantics = [#tpu.dimension_semantics<parallel>], iteration_bounds = array<i64: 2>, scalar_prefetch = 0 : i64, scratch_operands = 0 : i64, tpu.core_type = #tpu.core_type<tc>, window_params = [{transform_indices = @transform_0, window_bounds = array<i64: 1, 4, 256>}, {pipeline_mode = #tpu.pipeline_mode<synchronous>, transform_indices = @transform_1, window_bounds = array<i64: 4, 1>}, {pipeline_mode = #tpu.pipeline_mode<synchronous>, transform_indices = @transform_2, window_bounds = array<i64: 4, 1>}, {pipeline_mode = #tpu.pipeline_mode<synchronous>, transform_indices = @transform_3, window_bounds = array<i64: 12, 4>}, {pipeline_mode = #tpu.pipeline_mode<synchronous>, transform_indices = @transform_4, window_bounds = array<i64: 3, 256, 256>}, {pipeline_mode = #tpu.pipeline_mode<synchronous>, transform_indices = @transform_5, window_bounds = array<i64: 3, 256, 256>}, {pipeline_mode = #tpu.pipeline_mode<synchronous>, transform_indices = @transform_6, window_bounds = array<i64: 3, 256, 256>}, {pipeline_mode = #tpu.pipeline_mode<synchronous>, transform_indices = @transform_7, window_bounds = array<i64: 3, 1, 256>}, {pipeline_mode = #tpu.pipeline_mode<synchronous>, transform_indices = @transform_8, window_bounds = array<i64: 4, 12>}, {pipeline_mode = #tpu.pipeline_mode<synchronous>, transform_indices = @transform_9, window_bounds = array<i64: 4, 1>}, {pipeline_mode = #tpu.pipeline_mode<synchronous>, transform_indices = @transform_10, window_bounds = array<i64: 4, 1>}, {pipeline_mode = #tpu.pipeline_mode<synchronous>, transform_indices = @transform_11, window_bounds = array<i64: 16, 4>}, {pipeline_mode = #tpu.pipeline_mode<synchronous>, transform_indices = @transform_12, window_bounds = array<i64: 9, 256, 256>}, {pipeline_mode = #tpu.pipeline_mode<synchronous>, transform_indices = @transform_13, window_bounds = array<i64: 16, 9>}, {pipeline_mode = #tpu.pipeline_mode<synchronous>, transform_indices = @transform_14, window_bounds = array<i64: 4, 16>}, {transform_indices = @transform_15, window_bounds = array<i64: 1, 4, 256>}]} {
    %c0 = arith.constant 0 : index
    %c0_0 = arith.constant 0 : index
    %c0_1 = arith.constant 0 : index
    %0 = vector.load %arg1[%c0, %c0_0, %c0_1] : memref<1x4x256xf32, #tpu.memory_space<vmem>>, vector<1x4x256xf32>
    %1 = vector.shape_cast %0 : vector<1x4x256xf32> to vector<4x256xf32>
    %c0_2 = arith.constant 0 : index
    %c0_3 = arith.constant 0 : index
    %2 = vector.load %arg4[%c0_2, %c0_3] : memref<12x4xf32, #tpu.memory_space<vmem>>, vector<12x4xf32>
    %cst = arith.constant dense<0.000000e+00> : vector<256xf32>
    %3 = vector.multi_reduction <add>, %1, %cst [0] : vector<4x256xf32> to vector<256xf32>
    %4 = vector.shape_cast %3 : vector<256xf32> to vector<1x256xf32>
    %cst_4 = arith.constant 4.000000e+00 : f32
    %5 = vector.broadcast %cst_4 : f32 to vector<1x256xf32>
    %6 = arith.divf %4, %5 : vector<1x256xf32>
    %7 = vector.broadcast %6 : vector<1x256xf32> to vector<4x256xf32>
    %8 = arith.subf %1, %7 : vector<4x256xf32>
    %9 = arith.mulf %8, %8 : vector<4x256xf32>
    %cst_5 = arith.constant dense<0.000000e+00> : vector<256xf32>
    %10 = vector.multi_reduction <add>, %9, %cst_5 [0] : vector<4x256xf32> to vector<256xf32>
    %11 = vector.shape_cast %10 : vector<256xf32> to vector<1x256xf32>
    %cst_6 = arith.constant 4.000000e+00 : f32
    %12 = vector.broadcast %cst_6 : f32 to vector<1x256xf32>
    %13 = arith.divf %11, %12 : vector<1x256xf32>
    %cst_7 = arith.constant 9.99999997E-7 : f32
    %14 = vector.broadcast %cst_7 : f32 to vector<1x256xf32>
    %15 = arith.addf %13, %14 : vector<1x256xf32>
    %16 = math.rsqrt %15 : vector<1x256xf32>
    %17 = vector.broadcast %16 : vector<1x256xf32> to vector<4x256xf32>
    %18 = arith.mulf %8, %17 : vector<4x256xf32>
    %c0_8 = arith.constant 0 : index
    %c0_9 = arith.constant 0 : index
    %19 = vector.load %arg2[%c0_8, %c0_9] : memref<4x1xf32, #tpu.memory_space<vmem>>, vector<4x1xf32>
    %20 = vector.broadcast %19 : vector<4x1xf32> to vector<4x256xf32>
    %21 = arith.mulf %18, %20 : vector<4x256xf32>
    %c0_10 = arith.constant 0 : index
    %c0_11 = arith.constant 0 : index
    %22 = vector.load %arg3[%c0_10, %c0_11] : memref<4x1xf32, #tpu.memory_space<vmem>>, vector<4x1xf32>
    %23 = vector.broadcast %22 : vector<4x1xf32> to vector<4x256xf32>
    %24 = arith.addf %21, %23 : vector<4x256xf32>
    %25 = arith.truncf %2 : vector<12x4xf32> to vector<12x4xbf16>
    %26 = arith.truncf %24 : vector<4x256xf32> to vector<4x256xbf16>
    %cst_12 = arith.constant dense<0.000000e+00> : vector<12x256xf32>
    %27 = tpu.matmul %25, %26, %cst_12 {dimension_numbers = #tpu.dot_dimension_numbers<[1], [0], [0], [1], [0, 0, 1, 1], [], []>} : vector<12x4xbf16>, vector<4x256xbf16>, vector<12x256xf32> -> vector<12x256xf32>
    %c0_13 = arith.constant 0 : index
    %c0_14 = arith.constant 0 : index
    %28 = vector.load %arg9[%c0_13, %c0_14] : memref<4x12xf32, #tpu.memory_space<vmem>>, vector<4x12xf32>
    %cst_15 = arith.constant 0.000000e+00 : f32
    %29 = vector.broadcast %cst_15 : f32 to vector<4x256xf32>
    %30 = vector.extract_strided_slice %27 {offsets = [0, 0], sizes = [4, 256], strides = [1, 1]} : vector<12x256xf32> to vector<4x256xf32>
    %c0_16 = arith.constant 0 : index
    %c0_17 = arith.constant 0 : index
    %c0_18 = arith.constant 0 : index
    %31 = vector.load %arg5[%c0_16, %c0_17, %c0_18] : memref<3x256x256xbf16, #tpu.memory_space<vmem>>, vector<1x256x256xbf16>
    %32 = vector.shape_cast %31 : vector<1x256x256xbf16> to vector<256x256xbf16>
    %33 = arith.truncf %30 : vector<4x256xf32> to vector<4x256xbf16>
    %cst_19 = arith.constant dense<0.000000e+00> : vector<4x256xf32>
    %34 = tpu.matmul %33, %32, %cst_19 {dimension_numbers = #tpu.dot_dimension_numbers<[1], [0], [0], [1], [0, 0, 1, 1], [], []>} : vector<4x256xbf16>, vector<256x256xbf16>, vector<4x256xf32> -> vector<4x256xf32>
    %c0_20 = arith.constant 0 : index
    %c0_21 = arith.constant 0 : index
    %c0_22 = arith.constant 0 : index
    %35 = vector.load %arg6[%c0_20, %c0_21, %c0_22] : memref<3x256x256xbf16, #tpu.memory_space<vmem>>, vector<1x256x256xbf16>
    %36 = vector.shape_cast %35 : vector<1x256x256xbf16> to vector<256x256xbf16>
    %37 = arith.truncf %34 : vector<4x256xf32> to vector<4x256xbf16>
    %cst_23 = arith.constant dense<0.000000e+00> : vector<4x256xf32>
    %38 = tpu.matmul %37, %36, %cst_23 {dimension_numbers = #tpu.dot_dimension_numbers<[1], [0], [0], [1], [0, 0, 1, 1], [], []>} : vector<4x256xbf16>, vector<256x256xbf16>, vector<4x256xf32> -> vector<4x256xf32>
    %c0_24 = arith.constant 0 : index
    %c0_25 = arith.constant 0 : index
    %c0_26 = arith.constant 0 : index
    %39 = vector.load %arg8[%c0_24, %c0_25, %c0_26] : memref<3x1x256xf32, #tpu.memory_space<vmem>>, vector<1x1x256xf32>
    %40 = vector.shape_cast %39 : vector<1x1x256xf32> to vector<1x256xf32>
    %41 = vector.broadcast %40 : vector<1x256xf32> to vector<4x256xf32>
    %42 = arith.addf %38, %41 : vector<4x256xf32>
    %c0_27 = arith.constant 0 : index
    %c0_28 = arith.constant 0 : index
    %c0_29 = arith.constant 0 : index
    %43 = vector.load %arg7[%c0_27, %c0_28, %c0_29] : memref<3x256x256xbf16, #tpu.memory_space<vmem>>, vector<1x256x256xbf16>
    %44 = vector.shape_cast %43 : vector<1x256x256xbf16> to vector<256x256xbf16>
    %45 = arith.truncf %42 : vector<4x256xf32> to vector<4x256xbf16>
    %cst_30 = arith.constant dense<0.000000e+00> : vector<4x256xf32>
    %46 = tpu.matmul %45, %44, %cst_30 {dimension_numbers = #tpu.dot_dimension_numbers<[1], [0], [0], [1], [0, 0, 1, 1], [], []>} : vector<4x256xbf16>, vector<256x256xbf16>, vector<4x256xf32> -> vector<4x256xf32>
    %47 = vector.extract_strided_slice %28 {offsets = [0, 0], sizes = [4, 4], strides = [1, 1]} : vector<4x12xf32> to vector<4x4xf32>
    %48 = arith.mulf %30, %46 : vector<4x256xf32>
    %49 = arith.truncf %47 : vector<4x4xf32> to vector<4x4xbf16>
    %50 = arith.truncf %48 : vector<4x256xf32> to vector<4x256xbf16>
    %cst_31 = arith.constant dense<0.000000e+00> : vector<4x256xf32>
    %51 = tpu.matmul %49, %50, %cst_31 {dimension_numbers = #tpu.dot_dimension_numbers<[1], [0], [0], [1], [0, 0, 1, 1], [], []>} : vector<4x4xbf16>, vector<4x256xbf16>, vector<4x256xf32> -> vector<4x256xf32>
    %52 = arith.addf %29, %51 : vector<4x256xf32>
    %53 = vector.extract_strided_slice %27 {offsets = [4, 0], sizes = [4, 256], strides = [1, 1]} : vector<12x256xf32> to vector<4x256xf32>
    %c1 = arith.constant 1 : index
    %c0_32 = arith.constant 0 : index
    %c0_33 = arith.constant 0 : index
    %54 = vector.load %arg5[%c1, %c0_32, %c0_33] : memref<3x256x256xbf16, #tpu.memory_space<vmem>>, vector<1x256x256xbf16>
    %55 = vector.shape_cast %54 : vector<1x256x256xbf16> to vector<256x256xbf16>
    %56 = arith.truncf %53 : vector<4x256xf32> to vector<4x256xbf16>
    %cst_34 = arith.constant dense<0.000000e+00> : vector<4x256xf32>
    %57 = tpu.matmul %56, %55, %cst_34 {dimension_numbers = #tpu.dot_dimension_numbers<[1], [0], [0], [1], [0, 0, 1, 1], [], []>} : vector<4x256xbf16>, vector<256x256xbf16>, vector<4x256xf32> -> vector<4x256xf32>
    %c1_35 = arith.constant 1 : index
    %c0_36 = arith.constant 0 : index
    %c0_37 = arith.constant 0 : index
    %58 = vector.load %arg6[%c1_35, %c0_36, %c0_37] : memref<3x256x256xbf16, #tpu.memory_space<vmem>>, vector<1x256x256xbf16>
    %59 = vector.shape_cast %58 : vector<1x256x256xbf16> to vector<256x256xbf16>
    %60 = arith.truncf %57 : vector<4x256xf32> to vector<4x256xbf16>
    %cst_38 = arith.constant dense<0.000000e+00> : vector<4x256xf32>
    %61 = tpu.matmul %60, %59, %cst_38 {dimension_numbers = #tpu.dot_dimension_numbers<[1], [0], [0], [1], [0, 0, 1, 1], [], []>} : vector<4x256xbf16>, vector<256x256xbf16>, vector<4x256xf32> -> vector<4x256xf32>
    %c1_39 = arith.constant 1 : index
    %c0_40 = arith.constant 0 : index
    %c0_41 = arith.constant 0 : index
    %62 = vector.load %arg8[%c1_39, %c0_40, %c0_41] : memref<3x1x256xf32, #tpu.memory_space<vmem>>, vector<1x1x256xf32>
    %63 = vector.shape_cast %62 : vector<1x1x256xf32> to vector<1x256xf32>
    %64 = vector.broadcast %63 : vector<1x256xf32> to vector<4x256xf32>
    %65 = arith.addf %61, %64 : vector<4x256xf32>
    %c1_42 = arith.constant 1 : index
    %c0_43 = arith.constant 0 : index
    %c0_44 = arith.constant 0 : index
    %66 = vector.load %arg7[%c1_42, %c0_43, %c0_44] : memref<3x256x256xbf16, #tpu.memory_space<vmem>>, vector<1x256x256xbf16>
    %67 = vector.shape_cast %66 : vector<1x256x256xbf16> to vector<256x256xbf16>
    %68 = arith.truncf %65 : vector<4x256xf32> to vector<4x256xbf16>
    %cst_45 = arith.constant dense<0.000000e+00> : vector<4x256xf32>
    %69 = tpu.matmul %68, %67, %cst_45 {dimension_numbers = #tpu.dot_dimension_numbers<[1], [0], [0], [1], [0, 0, 1, 1], [], []>} : vector<4x256xbf16>, vector<256x256xbf16>, vector<4x256xf32> -> vector<4x256xf32>
    %70 = vector.extract_strided_slice %28 {offsets = [0, 4], sizes = [4, 4], strides = [1, 1]} : vector<4x12xf32> to vector<4x4xf32>
    %71 = arith.mulf %53, %69 : vector<4x256xf32>
    %72 = arith.truncf %70 : vector<4x4xf32> to vector<4x4xbf16>
    %73 = arith.truncf %71 : vector<4x256xf32> to vector<4x256xbf16>
    %cst_46 = arith.constant dense<0.000000e+00> : vector<4x256xf32>
    %74 = tpu.matmul %72, %73, %cst_46 {dimension_numbers = #tpu.dot_dimension_numbers<[1], [0], [0], [1], [0, 0, 1, 1], [], []>} : vector<4x4xbf16>, vector<4x256xbf16>, vector<4x256xf32> -> vector<4x256xf32>
    %75 = arith.addf %52, %74 : vector<4x256xf32>
    %76 = vector.extract_strided_slice %27 {offsets = [8, 0], sizes = [4, 256], strides = [1, 1]} : vector<12x256xf32> to vector<4x256xf32>
    %c2 = arith.constant 2 : index
    %c0_47 = arith.constant 0 : index
    %c0_48 = arith.constant 0 : index
    %77 = vector.load %arg5[%c2, %c0_47, %c0_48] : memref<3x256x256xbf16, #tpu.memory_space<vmem>>, vector<1x256x256xbf16>
    %78 = vector.shape_cast %77 : vector<1x256x256xbf16> to vector<256x256xbf16>
    %79 = arith.truncf %76 : vector<4x256xf32> to vector<4x256xbf16>
    %cst_49 = arith.constant dense<0.000000e+00> : vector<4x256xf32>
    %80 = tpu.matmul %79, %78, %cst_49 {dimension_numbers = #tpu.dot_dimension_numbers<[1], [0], [0], [1], [0, 0, 1, 1], [], []>} : vector<4x256xbf16>, vector<256x256xbf16>, vector<4x256xf32> -> vector<4x256xf32>
    %c2_50 = arith.constant 2 : index
    %c0_51 = arith.constant 0 : index
    %c0_52 = arith.constant 0 : index
    %81 = vector.load %arg6[%c2_50, %c0_51, %c0_52] : memref<3x256x256xbf16, #tpu.memory_space<vmem>>, vector<1x256x256xbf16>
    %82 = vector.shape_cast %81 : vector<1x256x256xbf16> to vector<256x256xbf16>
    %83 = arith.truncf %80 : vector<4x256xf32> to vector<4x256xbf16>
    %cst_53 = arith.constant dense<0.000000e+00> : vector<4x256xf32>
    %84 = tpu.matmul %83, %82, %cst_53 {dimension_numbers = #tpu.dot_dimension_numbers<[1], [0], [0], [1], [0, 0, 1, 1], [], []>} : vector<4x256xbf16>, vector<256x256xbf16>, vector<4x256xf32> -> vector<4x256xf32>
    %c2_54 = arith.constant 2 : index
    %c0_55 = arith.constant 0 : index
    %c0_56 = arith.constant 0 : index
    %85 = vector.load %arg8[%c2_54, %c0_55, %c0_56] : memref<3x1x256xf32, #tpu.memory_space<vmem>>, vector<1x1x256xf32>
    %86 = vector.shape_cast %85 : vector<1x1x256xf32> to vector<1x256xf32>
    %87 = vector.broadcast %86 : vector<1x256xf32> to vector<4x256xf32>
    %88 = arith.addf %84, %87 : vector<4x256xf32>
    %c2_57 = arith.constant 2 : index
    %c0_58 = arith.constant 0 : index
    %c0_59 = arith.constant 0 : index
    %89 = vector.load %arg7[%c2_57, %c0_58, %c0_59] : memref<3x256x256xbf16, #tpu.memory_space<vmem>>, vector<1x256x256xbf16>
    %90 = vector.shape_cast %89 : vector<1x256x256xbf16> to vector<256x256xbf16>
    %91 = arith.truncf %88 : vector<4x256xf32> to vector<4x256xbf16>
    %cst_60 = arith.constant dense<0.000000e+00> : vector<4x256xf32>
    %92 = tpu.matmul %91, %90, %cst_60 {dimension_numbers = #tpu.dot_dimension_numbers<[1], [0], [0], [1], [0, 0, 1, 1], [], []>} : vector<4x256xbf16>, vector<256x256xbf16>, vector<4x256xf32> -> vector<4x256xf32>
    %93 = vector.extract_strided_slice %28 {offsets = [0, 8], sizes = [4, 4], strides = [1, 1]} : vector<4x12xf32> to vector<4x4xf32>
    %94 = arith.mulf %76, %92 : vector<4x256xf32>
    %95 = arith.truncf %93 : vector<4x4xf32> to vector<4x4xbf16>
    %96 = arith.truncf %94 : vector<4x256xf32> to vector<4x256xbf16>
    %cst_61 = arith.constant dense<0.000000e+00> : vector<4x256xf32>
    %97 = tpu.matmul %95, %96, %cst_61 {dimension_numbers = #tpu.dot_dimension_numbers<[1], [0], [0], [1], [0, 0, 1, 1], [], []>} : vector<4x4xbf16>, vector<4x256xbf16>, vector<4x256xf32> -> vector<4x256xf32>
    %98 = arith.addf %75, %97 : vector<4x256xf32>
    %99 = arith.addf %98, %1 : vector<4x256xf32>
    %c0_62 = arith.constant 0 : index
    %c0_63 = arith.constant 0 : index
    %100 = vector.load %arg12[%c0_62, %c0_63] : memref<16x4xf32, #tpu.memory_space<vmem>>, vector<16x4xf32>
    %cst_64 = arith.constant dense<0.000000e+00> : vector<256xf32>
    %101 = vector.multi_reduction <add>, %99, %cst_64 [0] : vector<4x256xf32> to vector<256xf32>
    %102 = vector.shape_cast %101 : vector<256xf32> to vector<1x256xf32>
    %cst_65 = arith.constant 4.000000e+00 : f32
    %103 = vector.broadcast %cst_65 : f32 to vector<1x256xf32>
    %104 = arith.divf %102, %103 : vector<1x256xf32>
    %105 = vector.broadcast %104 : vector<1x256xf32> to vector<4x256xf32>
    %106 = arith.subf %99, %105 : vector<4x256xf32>
    %107 = arith.mulf %106, %106 : vector<4x256xf32>
    %cst_66 = arith.constant dense<0.000000e+00> : vector<256xf32>
    %108 = vector.multi_reduction <add>, %107, %cst_66 [0] : vector<4x256xf32> to vector<256xf32>
    %109 = vector.shape_cast %108 : vector<256xf32> to vector<1x256xf32>
    %cst_67 = arith.constant 4.000000e+00 : f32
    %110 = vector.broadcast %cst_67 : f32 to vector<1x256xf32>
    %111 = arith.divf %109, %110 : vector<1x256xf32>
    %cst_68 = arith.constant 9.99999997E-7 : f32
    %112 = vector.broadcast %cst_68 : f32 to vector<1x256xf32>
    %113 = arith.addf %111, %112 : vector<1x256xf32>
    %114 = math.rsqrt %113 : vector<1x256xf32>
    %115 = vector.broadcast %114 : vector<1x256xf32> to vector<4x256xf32>
    %116 = arith.mulf %106, %115 : vector<4x256xf32>
    %c0_69 = arith.constant 0 : index
    %c0_70 = arith.constant 0 : index
    %117 = vector.load %arg10[%c0_69, %c0_70] : memref<4x1xf32, #tpu.memory_space<vmem>>, vector<4x1xf32>
    %118 = vector.broadcast %117 : vector<4x1xf32> to vector<4x256xf32>
    %119 = arith.mulf %116, %118 : vector<4x256xf32>
    %c0_71 = arith.constant 0 : index
    %c0_72 = arith.constant 0 : index
    %120 = vector.load %arg11[%c0_71, %c0_72] : memref<4x1xf32, #tpu.memory_space<vmem>>, vector<4x1xf32>
    %121 = vector.broadcast %120 : vector<4x1xf32> to vector<4x256xf32>
    %122 = arith.addf %119, %121 : vector<4x256xf32>
    %123 = arith.truncf %100 : vector<16x4xf32> to vector<16x4xbf16>
    %124 = arith.truncf %122 : vector<4x256xf32> to vector<4x256xbf16>
    %cst_73 = arith.constant dense<0.000000e+00> : vector<16x256xf32>
    %125 = tpu.matmul %123, %124, %cst_73 {dimension_numbers = #tpu.dot_dimension_numbers<[1], [0], [0], [1], [0, 0, 1, 1], [], []>} : vector<16x4xbf16>, vector<4x256xbf16>, vector<16x256xf32> -> vector<16x256xf32>
    %cst_74 = arith.constant 5.000000e-01 : f32
    %126 = vector.broadcast %cst_74 : f32 to vector<16x256xf32>
    %127 = arith.mulf %126, %125 : vector<16x256xf32>
    %cst_75 = arith.constant 4.471500e-02 : f32
    %128 = vector.broadcast %cst_75 : f32 to vector<16x256xf32>
    %129 = arith.mulf %128, %125 : vector<16x256xf32>
    %130 = arith.mulf %129, %125 : vector<16x256xf32>
    %131 = arith.mulf %130, %125 : vector<16x256xf32>
    %132 = arith.addf %125, %131 : vector<16x256xf32>
    %cst_76 = arith.constant 0.797884583 : f32
    %133 = vector.broadcast %cst_76 : f32 to vector<16x256xf32>
    %134 = arith.mulf %133, %132 : vector<16x256xf32>
    %135 = math.tanh %134 : vector<16x256xf32>
    %cst_77 = arith.constant 1.000000e+00 : f32
    %136 = vector.broadcast %cst_77 : f32 to vector<16x256xf32>
    %137 = arith.addf %136, %135 : vector<16x256xf32>
    %138 = arith.mulf %127, %137 : vector<16x256xf32>
    %c0_78 = arith.constant 0 : index
    %c0_79 = arith.constant 0 : index
    %139 = vector.load %arg14[%c0_78, %c0_79] : memref<16x9xf32, #tpu.memory_space<vmem>>, vector<16x9xf32>
    %cst_80 = arith.constant 0.000000e+00 : f32
    %140 = vector.broadcast %cst_80 : f32 to vector<16x256xf32>
    %c0_81 = arith.constant 0 : index
    %c0_82 = arith.constant 0 : index
    %c0_83 = arith.constant 0 : index
    %141 = vector.load %arg13[%c0_81, %c0_82, %c0_83] : memref<9x256x256xbf16, #tpu.memory_space<vmem>>, vector<1x256x256xbf16>
    %142 = vector.shape_cast %141 : vector<1x256x256xbf16> to vector<256x256xbf16>
    %143 = arith.truncf %138 : vector<16x256xf32> to vector<16x256xbf16>
    %cst_84 = arith.constant dense<0.000000e+00> : vector<16x256xf32>
    %144 = tpu.matmul %143, %142, %cst_84 {dimension_numbers = #tpu.dot_dimension_numbers<[1], [0], [0], [1], [0, 0, 1, 1], [], []>} : vector<16x256xbf16>, vector<256x256xbf16>, vector<16x256xf32> -> vector<16x256xf32>
    %145 = vector.extract_strided_slice %139 {offsets = [0, 0], sizes = [16, 1], strides = [1, 1]} : vector<16x9xf32> to vector<16x1xf32>
    %146 = vector.broadcast %145 : vector<16x1xf32> to vector<16x256xf32>
    %147 = arith.mulf %144, %146 : vector<16x256xf32>
    %148 = arith.addf %140, %147 : vector<16x256xf32>
    %c1_85 = arith.constant 1 : index
    %c0_86 = arith.constant 0 : index
    %c0_87 = arith.constant 0 : index
    %149 = vector.load %arg13[%c1_85, %c0_86, %c0_87] : memref<9x256x256xbf16, #tpu.memory_space<vmem>>, vector<1x256x256xbf16>
    %150 = vector.shape_cast %149 : vector<1x256x256xbf16> to vector<256x256xbf16>
    %151 = arith.truncf %138 : vector<16x256xf32> to vector<16x256xbf16>
    %cst_88 = arith.constant dense<0.000000e+00> : vector<16x256xf32>
    %152 = tpu.matmul %151, %150, %cst_88 {dimension_numbers = #tpu.dot_dimension_numbers<[1], [0], [0], [1], [0, 0, 1, 1], [], []>} : vector<16x256xbf16>, vector<256x256xbf16>, vector<16x256xf32> -> vector<16x256xf32>
    %153 = vector.extract_strided_slice %139 {offsets = [0, 1], sizes = [16, 1], strides = [1, 1]} : vector<16x9xf32> to vector<16x1xf32>
    %154 = vector.broadcast %153 : vector<16x1xf32> to vector<16x256xf32>
    %155 = arith.mulf %152, %154 : vector<16x256xf32>
    %156 = arith.addf %148, %155 : vector<16x256xf32>
    %c2_89 = arith.constant 2 : index
    %c0_90 = arith.constant 0 : index
    %c0_91 = arith.constant 0 : index
    %157 = vector.load %arg13[%c2_89, %c0_90, %c0_91] : memref<9x256x256xbf16, #tpu.memory_space<vmem>>, vector<1x256x256xbf16>
    %158 = vector.shape_cast %157 : vector<1x256x256xbf16> to vector<256x256xbf16>
    %159 = arith.truncf %138 : vector<16x256xf32> to vector<16x256xbf16>
    %cst_92 = arith.constant dense<0.000000e+00> : vector<16x256xf32>
    %160 = tpu.matmul %159, %158, %cst_92 {dimension_numbers = #tpu.dot_dimension_numbers<[1], [0], [0], [1], [0, 0, 1, 1], [], []>} : vector<16x256xbf16>, vector<256x256xbf16>, vector<16x256xf32> -> vector<16x256xf32>
    %161 = vector.extract_strided_slice %139 {offsets = [0, 2], sizes = [16, 1], strides = [1, 1]} : vector<16x9xf32> to vector<16x1xf32>
    %162 = vector.broadcast %161 : vector<16x1xf32> to vector<16x256xf32>
    %163 = arith.mulf %160, %162 : vector<16x256xf32>
    %164 = arith.addf %156, %163 : vector<16x256xf32>
    %c3 = arith.constant 3 : index
    %c0_93 = arith.constant 0 : index
    %c0_94 = arith.constant 0 : index
    %165 = vector.load %arg13[%c3, %c0_93, %c0_94] : memref<9x256x256xbf16, #tpu.memory_space<vmem>>, vector<1x256x256xbf16>
    %166 = vector.shape_cast %165 : vector<1x256x256xbf16> to vector<256x256xbf16>
    %167 = arith.truncf %138 : vector<16x256xf32> to vector<16x256xbf16>
    %cst_95 = arith.constant dense<0.000000e+00> : vector<16x256xf32>
    %168 = tpu.matmul %167, %166, %cst_95 {dimension_numbers = #tpu.dot_dimension_numbers<[1], [0], [0], [1], [0, 0, 1, 1], [], []>} : vector<16x256xbf16>, vector<256x256xbf16>, vector<16x256xf32> -> vector<16x256xf32>
    %169 = vector.extract_strided_slice %139 {offsets = [0, 3], sizes = [16, 1], strides = [1, 1]} : vector<16x9xf32> to vector<16x1xf32>
    %170 = vector.broadcast %169 : vector<16x1xf32> to vector<16x256xf32>
    %171 = arith.mulf %168, %170 : vector<16x256xf32>
    %172 = arith.addf %164, %171 : vector<16x256xf32>
    %c4 = arith.constant 4 : index
    %c0_96 = arith.constant 0 : index
    %c0_97 = arith.constant 0 : index
    %173 = vector.load %arg13[%c4, %c0_96, %c0_97] : memref<9x256x256xbf16, #tpu.memory_space<vmem>>, vector<1x256x256xbf16>
    %174 = vector.shape_cast %173 : vector<1x256x256xbf16> to vector<256x256xbf16>
    %175 = arith.truncf %138 : vector<16x256xf32> to vector<16x256xbf16>
    %cst_98 = arith.constant dense<0.000000e+00> : vector<16x256xf32>
    %176 = tpu.matmul %175, %174, %cst_98 {dimension_numbers = #tpu.dot_dimension_numbers<[1], [0], [0], [1], [0, 0, 1, 1], [], []>} : vector<16x256xbf16>, vector<256x256xbf16>, vector<16x256xf32> -> vector<16x256xf32>
    %177 = vector.extract_strided_slice %139 {offsets = [0, 4], sizes = [16, 1], strides = [1, 1]} : vector<16x9xf32> to vector<16x1xf32>
    %178 = vector.broadcast %177 : vector<16x1xf32> to vector<16x256xf32>
    %179 = arith.mulf %176, %178 : vector<16x256xf32>
    %180 = arith.addf %172, %179 : vector<16x256xf32>
    %c5 = arith.constant 5 : index
    %c0_99 = arith.constant 0 : index
    %c0_100 = arith.constant 0 : index
    %181 = vector.load %arg13[%c5, %c0_99, %c0_100] : memref<9x256x256xbf16, #tpu.memory_space<vmem>>, vector<1x256x256xbf16>
    %182 = vector.shape_cast %181 : vector<1x256x256xbf16> to vector<256x256xbf16>
    %183 = arith.truncf %138 : vector<16x256xf32> to vector<16x256xbf16>
    %cst_101 = arith.constant dense<0.000000e+00> : vector<16x256xf32>
    %184 = tpu.matmul %183, %182, %cst_101 {dimension_numbers = #tpu.dot_dimension_numbers<[1], [0], [0], [1], [0, 0, 1, 1], [], []>} : vector<16x256xbf16>, vector<256x256xbf16>, vector<16x256xf32> -> vector<16x256xf32>
    %185 = vector.extract_strided_slice %139 {offsets = [0, 5], sizes = [16, 1], strides = [1, 1]} : vector<16x9xf32> to vector<16x1xf32>
    %186 = vector.broadcast %185 : vector<16x1xf32> to vector<16x256xf32>
    %187 = arith.mulf %184, %186 : vector<16x256xf32>
    %188 = arith.addf %180, %187 : vector<16x256xf32>
    %c6 = arith.constant 6 : index
    %c0_102 = arith.constant 0 : index
    %c0_103 = arith.constant 0 : index
    %189 = vector.load %arg13[%c6, %c0_102, %c0_103] : memref<9x256x256xbf16, #tpu.memory_space<vmem>>, vector<1x256x256xbf16>
    %190 = vector.shape_cast %189 : vector<1x256x256xbf16> to vector<256x256xbf16>
    %191 = arith.truncf %138 : vector<16x256xf32> to vector<16x256xbf16>
    %cst_104 = arith.constant dense<0.000000e+00> : vector<16x256xf32>
    %192 = tpu.matmul %191, %190, %cst_104 {dimension_numbers = #tpu.dot_dimension_numbers<[1], [0], [0], [1], [0, 0, 1, 1], [], []>} : vector<16x256xbf16>, vector<256x256xbf16>, vector<16x256xf32> -> vector<16x256xf32>
    %193 = vector.extract_strided_slice %139 {offsets = [0, 6], sizes = [16, 1], strides = [1, 1]} : vector<16x9xf32> to vector<16x1xf32>
    %194 = vector.broadcast %193 : vector<16x1xf32> to vector<16x256xf32>
    %195 = arith.mulf %192, %194 : vector<16x256xf32>
    %196 = arith.addf %188, %195 : vector<16x256xf32>
    %c7 = arith.constant 7 : index
    %c0_105 = arith.constant 0 : index
    %c0_106 = arith.constant 0 : index
    %197 = vector.load %arg13[%c7, %c0_105, %c0_106] : memref<9x256x256xbf16, #tpu.memory_space<vmem>>, vector<1x256x256xbf16>
    %198 = vector.shape_cast %197 : vector<1x256x256xbf16> to vector<256x256xbf16>
    %199 = arith.truncf %138 : vector<16x256xf32> to vector<16x256xbf16>
    %cst_107 = arith.constant dense<0.000000e+00> : vector<16x256xf32>
    %200 = tpu.matmul %199, %198, %cst_107 {dimension_numbers = #tpu.dot_dimension_numbers<[1], [0], [0], [1], [0, 0, 1, 1], [], []>} : vector<16x256xbf16>, vector<256x256xbf16>, vector<16x256xf32> -> vector<16x256xf32>
    %201 = vector.extract_strided_slice %139 {offsets = [0, 7], sizes = [16, 1], strides = [1, 1]} : vector<16x9xf32> to vector<16x1xf32>
    %202 = vector.broadcast %201 : vector<16x1xf32> to vector<16x256xf32>
    %203 = arith.mulf %200, %202 : vector<16x256xf32>
    %204 = arith.addf %196, %203 : vector<16x256xf32>
    %c8 = arith.constant 8 : index
    %c0_108 = arith.constant 0 : index
    %c0_109 = arith.constant 0 : index
    %205 = vector.load %arg13[%c8, %c0_108, %c0_109] : memref<9x256x256xbf16, #tpu.memory_space<vmem>>, vector<1x256x256xbf16>
    %206 = vector.shape_cast %205 : vector<1x256x256xbf16> to vector<256x256xbf16>
    %207 = arith.truncf %138 : vector<16x256xf32> to vector<16x256xbf16>
    %cst_110 = arith.constant dense<0.000000e+00> : vector<16x256xf32>
    %208 = tpu.matmul %207, %206, %cst_110 {dimension_numbers = #tpu.dot_dimension_numbers<[1], [0], [0], [1], [0, 0, 1, 1], [], []>} : vector<16x256xbf16>, vector<256x256xbf16>, vector<16x256xf32> -> vector<16x256xf32>
    %209 = vector.extract_strided_slice %139 {offsets = [0, 8], sizes = [16, 1], strides = [1, 1]} : vector<16x9xf32> to vector<16x1xf32>
    %210 = vector.broadcast %209 : vector<16x1xf32> to vector<16x256xf32>
    %211 = arith.mulf %208, %210 : vector<16x256xf32>
    %212 = arith.addf %204, %211 : vector<16x256xf32>
    %cst_111 = arith.constant 5.000000e-01 : f32
    %213 = vector.broadcast %cst_111 : f32 to vector<16x256xf32>
    %214 = arith.mulf %213, %212 : vector<16x256xf32>
    %cst_112 = arith.constant 4.471500e-02 : f32
    %215 = vector.broadcast %cst_112 : f32 to vector<16x256xf32>
    %216 = arith.mulf %215, %212 : vector<16x256xf32>
    %217 = arith.mulf %216, %212 : vector<16x256xf32>
    %218 = arith.mulf %217, %212 : vector<16x256xf32>
    %219 = arith.addf %212, %218 : vector<16x256xf32>
    %cst_113 = arith.constant 0.797884583 : f32
    %220 = vector.broadcast %cst_113 : f32 to vector<16x256xf32>
    %221 = arith.mulf %220, %219 : vector<16x256xf32>
    %222 = math.tanh %221 : vector<16x256xf32>
    %cst_114 = arith.constant 1.000000e+00 : f32
    %223 = vector.broadcast %cst_114 : f32 to vector<16x256xf32>
    %224 = arith.addf %223, %222 : vector<16x256xf32>
    %225 = arith.mulf %214, %224 : vector<16x256xf32>
    %c0_115 = arith.constant 0 : index
    %c0_116 = arith.constant 0 : index
    %226 = vector.load %arg15[%c0_115, %c0_116] : memref<4x16xf32, #tpu.memory_space<vmem>>, vector<4x16xf32>
    %227 = arith.truncf %226 : vector<4x16xf32> to vector<4x16xbf16>
    %228 = arith.truncf %225 : vector<16x256xf32> to vector<16x256xbf16>
    %cst_117 = arith.constant dense<0.000000e+00> : vector<4x256xf32>
    %229 = tpu.matmul %227, %228, %cst_117 {dimension_numbers = #tpu.dot_dimension_numbers<[1], [0], [0], [1], [0, 0, 1, 1], [], []>} : vector<4x16xbf16>, vector<16x256xbf16>, vector<4x256xf32> -> vector<4x256xf32>
    %230 = arith.addf %229, %99 : vector<4x256xf32>
    %c0_118 = arith.constant 0 : index
    %c0_119 = arith.constant 0 : index
    %c0_120 = arith.constant 0 : index
    %231 = vector.load %arg16[%c0_118, %c0_119, %c0_120] : memref<1x4x256xf32, #tpu.memory_space<vmem>>, vector<1x4x256xf32>
    %232 = vector.shape_cast %231 : vector<1x4x256xf32> to vector<4x256xf32>
    %233 = vector.shape_cast %230 : vector<4x256xf32> to vector<1x4x256xf32>
    tpu.vector_store %arg16[%c0_118, %c0_119, %c0_120], %233 {strides = array<i32>} : memref<1x4x256xf32, #tpu.memory_space<vmem>>, vector<1x4x256xf32>,
    return
  }
  func.func @transform_0(%arg0: i32) -> (i32, i32, i32) {
    %c0_i32 = arith.constant 0 : i32
    %c0_i32_0 = arith.constant 0 : i32
    %c0_i32_1 = arith.constant 0 : i32
    return %arg0, %c0_i32, %c0_i32_0 : i32, i32, i32
  }
  func.func @transform_1(%arg0: i32) -> (i32, i32) {
    %c0_i32 = arith.constant 0 : i32
    %c0_i32_0 = arith.constant 0 : i32
    %c0_i32_1 = arith.constant 0 : i32
    return %c0_i32, %c0_i32_0 : i32, i32
  }
  func.func @transform_2(%arg0: i32) -> (i32, i32) {
    %c0_i32 = arith.constant 0 : i32
    %c0_i32_0 = arith.constant 0 : i32
    %c0_i32_1 = arith.constant 0 : i32
    return %c0_i32, %c0_i32_0 : i32, i32
  }
  func.func @transform_3(%arg0: i32) -> (i32, i32) {
    %c0_i32 = arith.constant 0 : i32
    %c0_i32_0 = arith.constant 0 : i32
    %c0_i32_1 = arith.constant 0 : i32
    return %c0_i32, %c0_i32_0 : i32, i32
  }
  func.func @transform_4(%arg0: i32) -> (i32, i32, i32) {
    %c0_i32 = arith.constant 0 : i32
    %c0_i32_0 = arith.constant 0 : i32
    %c0_i32_1 = arith.constant 0 : i32
    %c0_i32_2 = arith.constant 0 : i32
    return %c0_i32, %c0_i32_0, %c0_i32_1 : i32, i32, i32
  }
  func.func @transform_5(%arg0: i32) -> (i32, i32, i32) {
    %c0_i32 = arith.constant 0 : i32
    %c0_i32_0 = arith.constant 0 : i32
    %c0_i32_1 = arith.constant 0 : i32
    %c0_i32_2 = arith.constant 0 : i32
    return %c0_i32, %c0_i32_0, %c0_i32_1 : i32, i32, i32
  }
  func.func @transform_6(%arg0: i32) -> (i32, i32, i32) {
    %c0_i32 = arith.constant 0 : i32
    %c0_i32_0 = arith.constant 0 : i32
    %c0_i32_1 = arith.constant 0 : i32
    %c0_i32_2 = arith.constant 0 : i32
    return %c0_i32, %c0_i32_0, %c0_i32_1 : i32, i32, i32
  }
  func.func @transform_7(%arg0: i32) -> (i32, i32, i32) {
    %c0_i32 = arith.constant 0 : i32
    %c0_i32_0 = arith.constant 0 : i32
    %c0_i32_1 = arith.constant 0 : i32
    %c0_i32_2 = arith.constant 0 : i32
    return %c0_i32, %c0_i32_0, %c0_i32_1 : i32, i32, i32
  }
  func.func @transform_8(%arg0: i32) -> (i32, i32) {
    %c0_i32 = arith.constant 0 : i32
    %c0_i32_0 = arith.constant 0 : i32
    %c0_i32_1 = arith.constant 0 : i32
    return %c0_i32, %c0_i32_0 : i32, i32
  }
  func.func @transform_9(%arg0: i32) -> (i32, i32) {
    %c0_i32 = arith.constant 0 : i32
    %c0_i32_0 = arith.constant 0 : i32
    %c0_i32_1 = arith.constant 0 : i32
    return %c0_i32, %c0_i32_0 : i32, i32
  }
  func.func @transform_10(%arg0: i32) -> (i32, i32) {
    %c0_i32 = arith.constant 0 : i32
    %c0_i32_0 = arith.constant 0 : i32
    %c0_i32_1 = arith.constant 0 : i32
    return %c0_i32, %c0_i32_0 : i32, i32
  }
  func.func @transform_11(%arg0: i32) -> (i32, i32) {
    %c0_i32 = arith.constant 0 : i32
    %c0_i32_0 = arith.constant 0 : i32
    %c0_i32_1 = arith.constant 0 : i32
    return %c0_i32, %c0_i32_0 : i32, i32
  }
  func.func @transform_12(%arg0: i32) -> (i32, i32, i32) {
    %c0_i32 = arith.constant 0 : i32
    %c0_i32_0 = arith.constant 0 : i32
    %c0_i32_1 = arith.constant 0 : i32
    %c0_i32_2 = arith.constant 0 : i32
    return %c0_i32, %c0_i32_0, %c0_i32_1 : i32, i32, i32
  }
  func.func @transform_13(%arg0: i32) -> (i32, i32) {
    %c0_i32 = arith.constant 0 : i32
    %c0_i32_0 = arith.constant 0 : i32
    %c0_i32_1 = arith.constant 0 : i32
    return %c0_i32, %c0_i32_0 : i32, i32
  }
  func.func @transform_14(%arg0: i32) -> (i32, i32) {
    %c0_i32 = arith.constant 0 : i32
    %c0_i32_0 = arith.constant 0 : i32
    %c0_i32_1 = arith.constant 0 : i32
    return %c0_i32, %c0_i32_0 : i32, i32
  }
  func.func @transform_15(%arg0: i32) -> (i32, i32, i32) {
    %c0_i32 = arith.constant 0 : i32
    %c0_i32_0 = arith.constant 0 : i32
    %c0_i32_1 = arith.constant 0 : i32
    return %arg0, %c0_i32, %c0_i32_0 : i32, i32, i32
  }
}

</mosaic_0001>

<bundles_post_ra>
// kernel: ms_mlp_tail_forward.1
= control target key start
LH: loop header
LB: loop body
LE: loop exit
PB: predicated region body
PF: predicated region fallthrough
CT: control target
= control target key end

     0   :  { %s7635_s18 = smov 0   ;;  %s9589_s0 = inlined_call_operand.vmem [shape: f32[2,4,256], index: 0, kind: input, shape index: {}]   ;;  %s9590_s1 = inlined_call_operand.vmem [shape: f32[4,1], index: 1, kind: input, shape index: {}]   ;;  %s9591_s2 = inlined_call_operand.vmem [shape: f32[4,1], index: 2, kind: input, shape index: {}]   ;;  %s9592_s3 = inlined_call_operand.vmem [shape: f32[12,4], index: 3, kind: input, shape index: {}]   ;;  %s9593_s4 = inlined_call_operand.vmem [shape: bf16[3,256,256], index: 4, kind: input, shape index: {}]   ;;  %s9594_s5 = inlined_call_operand.vmem [shape: bf16[3,256,256], index: 5, kind: input, shape index: {}]   ;;  %s9595_s6 = inlined_call_operand.vmem [shape: bf16[3,256,256], index: 6, kind: input, shape index: {}]   ;;  %s9596_s7 = inlined_call_operand.vmem [shape: f32[3,1,256], index: 7, kind: input, shape index: {}]   ;;  %s9597_s8 = inlined_call_operand.vmem [shape: f32[4,12], index: 8, kind: input, shape index: {}]   ;;  %s9598_s9 = inlined_call_operand.vmem [shape: f32[4,1], index: 9, kind: input, shape index: {}]   ;;  %s9599_s10 = inlined_call_operand.vmem [shape: f32[4,1], index: 10, kind: input, shape index: {}]   ;;  %s9600_s11 = inlined_call_operand.vmem [shape: f32[16,4], index: 11, kind: input, shape index: {}]   ;;  %s9601_s12 = inlined_call_operand.vmem [shape: bf16[9,256,256], index: 12, kind: input, shape index: {}]   ;;  %s9602_s13 = inlined_call_operand.vmem [shape: f32[16,9], index: 13, kind: input, shape index: {}]   ;;  %s9603_s14 = inlined_call_operand.vmem [shape: f32[4,16], index: 14, kind: input, shape index: {}]   ;;  %s9604_s15 = inlined_call_operand.vmem [shape: f32[2,4,256], index: 15, kind: output, shape index: {}]  }
   0x1 LB: > { %s5557_s19 = sadd.s32 4294967295, %s7541_s18   ;;  %p5561_p0 = scmp.ge.s32.totalorder %s7541_s18, 1  ;;  %s7541_s18 = sphi %s7635_s18, %s25_s18  }
   0x2   : > { %p437_p1 = scmp.lt.s32.totalorder %s7541_s18, 3 }
   0x4   : > { %p438_p2 = pnand %p5561_p0, %p437_p1 }
   0x5   : > { %v554_v0 = vld [vmem:[%s9590_s1] sm:$0xf] (!%p438_p2)  ;;  %v7543_v1 = vmov (!%p438_p2), 0   ;;  %p485_p3 = scmp.lt.s32.totalorder (!%p438_p2), %s5557_s19, 1  ;;  %vm502_vm0 = vcmask (!%p438_p2), 1043456   ;;  %v562_v47 = vlaneseq (!%p438_p2)  ;;  %vm592_vm1 = vcmask (!%p438_p2), 1041408  }
   0x6   : > { %441 = sbr.rel (%p438_p2) target bundleno = 3270 (0xcc6), region = 80  ;;  %6627 = vset.pattern.permute.xlu0 (!%p438_p2), %v7543_v1  ;;  %v568_v2 = vld [vmem:[%s9591_s2] sm:$0xf] (!%p438_p2)  ;;  %631 = vmatprep.mubr.bf16.mxu1 (!%p438_p2), %v7543_v1  ;;  %v7544_v45 = vmov (!%p438_p2), 839922192   ;;  %vm588_vm2 = vcmask (!%p438_p2), 31744  }
   0x7   : > { %557 = vperm.xlu0 (!%p438_p2), %6627, %v554_v0   ;;  %6628 = vset.pattern.permute.xlu1 (!%p438_p2), %v7543_v1  ;;  %v3032_v3 = vld [vmem:[%s9598_s9] sm:$0xf] (!%p438_p2)  ;;  %v560_v46 = vunpack.c.l.s4 (!%p438_p2), %v7544_v45  ;;  %v7676_v50 = vshrl.u32 (!%p438_p2), %v562_v47, 7  ;;  %v498_v62 = vld [vmem:[%s9592_s3 + $0x8] sm:$0xf] (!%p438_p2)  ;;  %s7545_s26 = smov (!%p438_p2), 124  }
   0x8   : > { %v3139_v4 = vld [vmem:[%s9602_s13] sm:$0xff] (!%p438_p2)  ;;  %v6703_v45 = vld [vmem:[%s9594_s5 + $0x30] ss:$8 sps:$4 sm:$0xff] (!%p438_p2)   ;;  %s7546_s23 = smov (!%p438_p2), 120   ;;  %vm5452_vm3 = vcmask (!%p438_p2), 130048  }
   0x9   : > { %v561_v49 = vunpack.c.0.s8 (!%p438_p2), %v560_v46  ;;  %v497_v61 = vld [vmem:[%s9592_s3] sm:$0xff] (!%p438_p2) }
   0xa   : > { %v6704_v46 = vld [vmem:[%s9594_s5 + $0x44] ss:$8 sps:$4 sm:$0xff] (!%p438_p2)   ;;  %v6706_v47 = vld [vmem:[%s9594_s5 + $0x40] ss:$8 sps:$4 sm:$0xff] (!%p438_p2)  }
   0xb   : > { %571 = vperm.xlu0 (!%p438_p2), %6627, %v568_v2   ;;  %v564_v52 = vsub.s32 (!%p438_p2), %v561_v49, %v7676_v50  ;;  %v6646_v2 = vld [vmem:[%s9593_s4 + $0x4] ss:$8 sps:$4 sm:$0xff] (!%p438_p2)   ;;  %v6709_v49 = vld [vmem:[%s9594_s5 + $0x50] ss:$8 sps:$4 sm:$0xff] (!%p438_p2)  }
   0xd   : > { %s9606_s19 = smov (!%p485_p3, %s5557_s19), 1 }
   0xe   : > { %s6605_s28 = sshll.u32 %s9606_s19, 3 }
   0xf   : > { %3035 = vperm.xlu0 %6627, %v3032_v3   ;;  %s7666_s16 = scalar_lea.vmem %s9589_s0, %s6605_s28 }
  0x10   : > { %v496_v5 = vld [vmem:[%s7666_s16] sm:$0xff] }
  0x11   : > { %v7669_v6 = vcombine.high %v496_v5, %v496_v5  ;;  %v503_v7 = vsel %vm502_vm0, %v496_v5, 0.0 }
  0x12   : > { %v504_v9 = vrot.slane %v503_v7, 4 }
  0x13   : > { %3380 = vperm.xlu0 %6627, %v3139_v4   ;;  %v510_v8 = vsel %vm502_vm0, %v7669_v6, 0.0  ;;  %v6644_v4 = vld [vmem:[%s9593_s4] ss:$8 sps:$4 sm:$0xff]  }
  0x14   : > { %v511_v10 = vrot.slane %v510_v8, 4  ;;  %v505_v11 = vadd.f32 %v504_v9, %v503_v7  ;;  %v582_v7 = vpack.c.bf16 %v498_v62, %v497_v61  ;;  %v6647_v9 = vld [vmem:[%s9593_s4 + $0x10] ss:$8 sps:$4 sm:$0xff]   ;;  %v6725_v61 = vld [vmem:[%s9594_s5 + $0xb4] ss:$8 sps:$4 sm:$0xff]  }
  0x15   : > { %v6727_v62 = vld [vmem:[%s9594_s5 + $0xb0] ss:$8 sps:$4 sm:$0xff]  }
  0x16   : > { %v512_v12 = vadd.f32 %v511_v10, %v510_v8  ;;  %v506_v13 = vrot.slane %v505_v11, 2  ;;  %v6649_v8 = vld [vmem:[%s9593_s4 + $0x14] ss:$8 sps:$4 sm:$0xff]   ;;  %v6652_v10 = vld [vmem:[%s9593_s4 + $0x24] ss:$8 sps:$4 sm:$0xff]  }
  0x18   : > { %v513_v14 = vrot.slane %v512_v12, 2  ;;  %v507_v15 = vadd.f32 %v506_v13, %v505_v11  ;;  %v6650_v11 = vld [vmem:[%s9593_s4 + $0x20] ss:$8 sps:$4 sm:$0xff]   ;;  %v6653_v13 = vld [vmem:[%s9593_s4 + $0x30] ss:$8 sps:$4 sm:$0xff]  }
  0x1a   : > { %v514_v16 = vadd.f32 %v513_v14, %v512_v12  ;;  %v508_v17 = vrot.slane %v507_v15, 1  ;;  %v6655_v12 = vld [vmem:[%s9593_s4 + $0x34] ss:$8 sps:$4 sm:$0xff]   ;;  %v6658_v14 = vld [vmem:[%s9593_s4 + $0x44] ss:$8 sps:$4 sm:$0xff]  }
  0x1c   : > { %v515_v18 = vrot.slane %v514_v16, 1  ;;  %v509_v19 = vadd.f32 %v508_v17, %v507_v15  ;;  %v6656_v15 = vld [vmem:[%s9593_s4 + $0x40] ss:$8 sps:$4 sm:$0xff]   ;;  %v6659_v17 = vld [vmem:[%s9593_s4 + $0x50] ss:$8 sps:$4 sm:$0xff]  }
  0x1e   : > { %v516_v20 = vadd.f32 %v515_v18, %v514_v16  ;;  %v518_v21 = vmul.f32 0.25, %v509_v19  ;;  %v6661_v16 = vld [vmem:[%s9593_s4 + $0x54] ss:$8 sps:$4 sm:$0xff]   ;;  %v6664_v18 = vld [vmem:[%s9593_s4 + $0x64] ss:$8 sps:$4 sm:$0xff]  }
  0x1f   : > { %v6662_v19 = vld [vmem:[%s9593_s4 + $0x60] ss:$8 sps:$4 sm:$0xff]  }
  0x20   : > { %v519_v22 = vmul.f32 0.25, %v516_v20  ;;  %v6667_v20 = vld [vmem:[%s9593_s4 + $0x74] ss:$8 sps:$4 sm:$0xff]  }
  0x22   : > { %v522_v23 = vcombine.low %v518_v21, %v519_v22  ;;  %v6665_v21 = vld [vmem:[%s9593_s4 + $0x70] ss:$8 sps:$4 sm:$0xff]   ;;  %v6670_v22 = vld [vmem:[%s9593_s4 + $0x84] ss:$8 sps:$4 sm:$0xff]  }
  0x24   : > { %v524_v24 = vsub.f32 %v496_v5, %v522_v23  ;;  %v6668_v23 = vld [vmem:[%s9593_s4 + $0x80] ss:$8 sps:$4 sm:$0xff]  }
  0x26   : > { %v525_v25 = vmul.f32 %v524_v24, %v524_v24 }
  0x28   : > { %v527_v26 = vcombine.high %v525_v25, %v525_v25  ;;  %v529_v27 = vsel %vm502_vm0, %v525_v25, 0.0  ;;  %v6671_v25 = vld [vmem:[%s9593_s4 + $0x90] ss:$8 sps:$4 sm:$0xff]  }
  0x29   : > { %v530_v29 = vrot.slane %v529_v27, 4 }
  0x2a   : > { %v536_v28 = vsel %vm502_vm0, %v527_v26, 0.0  ;;  %v6676_v26 = vld [vmem:[%s9593_s4 + $0xa4] ss:$8 sps:$4 sm:$0xff]  }
  0x2b   : > { %v537_v30 = vrot.slane %v536_v28, 4  ;;  %v531_v31 = vadd.f32 %v530_v29, %v529_v27  ;;  %v6674_v27 = vld [vmem:[%s9593_s4 + $0xa0] ss:$8 sps:$4 sm:$0xff]   ;;  %v6677_v29 = vld [vmem:[%s9593_s4 + $0xb0] ss:$8 sps:$4 sm:$0xff]  }
  0x2d   : > { %v538_v32 = vadd.f32 %v537_v30, %v536_v28  ;;  %v532_v33 = vrot.slane %v531_v31, 2  ;;  %v6679_v28 = vld [vmem:[%s9593_s4 + $0xb4] ss:$8 sps:$4 sm:$0xff]   ;;  %v6682_v30 = vld [vmem:[%s9593_s4 + $0xc4] ss:$8 sps:$4 sm:$0xff]  }
  0x2f   : > { %v539_v34 = vrot.slane %v538_v32, 2  ;;  %v533_v35 = vadd.f32 %v532_v33, %v531_v31  ;;  %v6680_v31 = vld [vmem:[%s9593_s4 + $0xc0] ss:$8 sps:$4 sm:$0xff]   ;;  %v6683_v33 = vld [vmem:[%s9593_s4 + $0xd0] ss:$8 sps:$4 sm:$0xff]  }
  0x31   : > { %v540_v36 = vadd.f32 %v539_v34, %v538_v32  ;;  %v534_v37 = vrot.slane %v533_v35, 1  ;;  %v6685_v32 = vld [vmem:[%s9593_s4 + $0xd4] ss:$8 sps:$4 sm:$0xff]   ;;  %v6688_v34 = vld [vmem:[%s9593_s4 + $0xe4] ss:$8 sps:$4 sm:$0xff]  }
  0x33   : > { %v541_v38 = vrot.slane %v540_v36, 1  ;;  %v535_v39 = vadd.f32 %v534_v37, %v533_v35  ;;  %v6686_v35 = vld [vmem:[%s9593_s4 + $0xe0] ss:$8 sps:$4 sm:$0xff]   ;;  %v6689_v37 = vld [vmem:[%s9593_s4 + $0xf0] ss:$8 sps:$4 sm:$0xff]  }
  0x35   : > { %v542_v40 = vadd.f32 %v541_v38, %v540_v36  ;;  %v543_v41 = vmul.f32 0.25, %v535_v39  ;;  %v6691_v36 = vld [vmem:[%s9593_s4 + $0xf4] ss:$8 sps:$4 sm:$0xff]   ;;  %v6692_v38 = vld [vmem:[%s9594_s5 + $0x4] ss:$8 sps:$4 sm:$0xff]  }
  0x36   : > { %v6694_v39 = vld [vmem:[%s9594_s5] ss:$8 sps:$4 sm:$0xff]   ;;  %1084 = vmatprep.subr.bf16.mxu0 %v6692_v38  ;;  %v6823_v38 = vld [vmem:[%s9595_s6 + $0xb4] ss:$8 sps:$4 sm:$0xff]  }
  0x37   : > { %v544_v42 = vmul.f32 0.25, %v542_v40  ;;  %v545_v43 = vadd.f32 1e-06, %v543_v41  ;;  %v6695_v40 = vld [vmem:[%s9594_s5 + $0x14] ss:$8 sps:$4 sm:$0xff]   ;;  %1085 = vmatpush1.bf16.msra.mxu0 %v6694_v39 }
  0x38   : > { %v6697_v41 = vld [vmem:[%s9594_s5 + $0x10] ss:$8 sps:$4 sm:$0xff]   ;;  %1086 = vmatprep.subr.bf16.mxu0 %v6695_v40  ;;  %v6826_v40 = vld [vmem:[%s9595_s6 + $0xc4] ss:$8 sps:$4 sm:$0xff]  }
  0x39   : > { %v546_v44 = vadd.f32 1e-06, %v544_v42  ;;  %7508 = vrsqrt.f32 %v545_v43  ;;  %v6698_v42 = vld [vmem:[%s9594_s5 + $0x24] ss:$8 sps:$4 sm:$0xff]   ;;  %v6700_v43 = vld [vmem:[%s9594_s5 + $0x20] ss:$8 sps:$4 sm:$0xff]  }
  0x3a   : > { %v6821_v39 = vld [vmem:[%s9595_s6 + $0xb0] ss:$8 sps:$4 sm:$0xff]  }
  0x3b   : > { %7510 = vrsqrt.f32 %v546_v44  ;;  %1087 = vmatpush1.bf16.msra.mxu0 %v6697_v41  ;;  %v6701_v44 = vld [vmem:[%s9594_s5 + $0x34] ss:$8 sps:$4 sm:$0xff]   ;;  %v6824_v41 = vld [vmem:[%s9595_s6 + $0xc0] ss:$8 sps:$4 sm:$0xff]  }
  0x3c   : > { %1088 = vmatprep.subr.bf16.mxu0 %v6698_v42  ;;  %v6829_v42 = vld [vmem:[%s9595_s6 + $0xd4] ss:$8 sps:$4 sm:$0xff]  }
  0x3f   : > { %1089 = vmatpush1.bf16.msra.mxu0 %v6700_v43  ;;  %v6827_v43 = vld [vmem:[%s9595_s6 + $0xd0] ss:$8 sps:$4 sm:$0xff]  }
  0x40   : > { %1090 = vmatprep.subr.bf16.mxu0 %v6701_v44  ;;  %v6832_v44 = vld [vmem:[%s9595_s6 + $0xe4] ss:$8 sps:$4 sm:$0xff]  }
  0x43   : > { %v7509_v48 = vpop.eup %7508  ;;  %1091 = vmatpush1.bf16.msra.mxu0 %v6703_v45  ;;  %v6830_v45 = vld [vmem:[%s9595_s6 + $0xe0] ss:$8 sps:$4 sm:$0xff]  }
  0x44   : > { %1092 = vmatprep.subr.bf16.mxu0 %v6704_v46 }
  0x45   : > { %v7511_v51 = vpop.eup %7510 }
  0x46   : > { %v551_v53 = vcombine.low %v7509_v48, %v7511_v51  ;;  %v6707_v48 = vld [vmem:[%s9594_s5 + $0x54] ss:$8 sps:$4 sm:$0xff]   ;;  %v6710_v51 = vld [vmem:[%s9594_s5 + $0x64] ss:$8 sps:$4 sm:$0xff]  }
  0x47   : > { %1093 = vmatpush1.bf16.msra.mxu0 %v6706_v47 }
  0x48   : > { %v553_v55 = vmul.f32 %v551_v53, %v524_v24  ;;  %v6673_v24 = vld [vmem:[%s9593_s4 + $0x94] ss:$8 sps:$4 sm:$0xff]   ;;  %1094 = vmatprep.subr.bf16.mxu0 %v6707_v48 }
  0x49   : > { %v6713_v53 = vld [vmem:[%s9594_s5 + $0x74] ss:$8 sps:$4 sm:$0xff]  }
  0x4b   : > { %1095 = vmatpush1.bf16.msra.mxu0 %v6709_v49 }
  0x4c   : > { %1096 = vmatprep.subr.bf16.mxu0 %v6710_v51  ;;  %v6740_v51 = vld [vmem:[%s9593_s4 + $0x100] ss:$8 sps:$4 sm:$0xff]  }
  0x86   : > { %v558_v54 = vpop.permute.xlu0 %557 }
  0x87   : > { %v565_v56 = vrot.slane %v558_v54, %v564_v52  ;;  %v6715_v54 = vld [vmem:[%s9594_s5 + $0x70] ss:$8 sps:$4 sm:$0xff]  }
  0x89   : > { %v567_v58 = vmul.f32 %v565_v56, %v553_v55  ;;  %v6716_v55 = vld [vmem:[%s9594_s5 + $0x84] ss:$8 sps:$4 sm:$0xff]   ;;  %v6718_v56 = vld [vmem:[%s9594_s5 + $0x80] ss:$8 sps:$4 sm:$0xff]  }
  0x8a   : > { %v572_v57 = vpop.permute.xlu0 %571 }
  0x8b   : > { %v579_v59 = vrot.slane %v572_v57, %v564_v52  ;;  %v6712_v52 = vld [vmem:[%s9594_s5 + $0x60] ss:$8 sps:$4 sm:$0xff]   ;;  %v6719_v57 = vld [vmem:[%s9594_s5 + $0x94] ss:$8 sps:$4 sm:$0xff]  }
  0x8c   : > { %1097 = vmatpush1.bf16.msra.mxu0 %v6712_v52 }
  0x8d   : > { %v581_v60 = vadd.f32 %v579_v59, %v567_v58  ;;  %1098 = vmatprep.subr.bf16.mxu0 %v6713_v53  ;;  %v6721_v58 = vld [vmem:[%s9594_s5 + $0x90] ss:$8 sps:$4 sm:$0xff]   ;;  %v6722_v59 = vld [vmem:[%s9594_s5 + $0xa4] ss:$8 sps:$4 sm:$0xff]  }
  0x8f   : > { %v584_v63 = vcombine.high %v581_v60, %v581_v60  ;;  %v586_v0 = vpack.c.bf16 %v581_v60, %v581_v60  ;;  %v6724_v60 = vld [vmem:[%s9594_s5 + $0xa0] ss:$8 sps:$4 sm:$0xff]  }
  0x90   : > { %1099 = vmatpush1.bf16.msra.mxu0 %v6715_v54  ;;  %v6745_v54 = vld [vmem:[%s9593_s4 + $0x114] ss:$8 sps:$4 sm:$0xff]  }
  0x91   : > { %v587_v3 = vpack.c.bf16 %v584_v63, %v584_v63  ;;  %v594_v5 = vsel %vm592_vm1, %v586_v0, 0  ;;  %1100 = vmatprep.subr.bf16.mxu0 %v6716_v55  ;;  %v6728_v63 = vld [vmem:[%s9594_s5 + $0xc4] ss:$8 sps:$4 sm:$0xff]   ;;  %v6730_v0 = vld [vmem:[%s9594_s5 + $0xc0] ss:$8 sps:$4 sm:$0xff]  }
  0x93   : > { %5566 = vmatprep.subr.msk.bf16.mxu1 %vm592_vm1, %v587_v3  ;;  %v6733_v3 = vld [vmem:[%s9594_s5 + $0xd0] ss:$8 sps:$4 sm:$0xff]  }
  0x94   : > { %600 = vmatpush1.bf16.msra.mxu1 %v594_v5  ;;  %1101 = vmatpush1.bf16.msra.mxu0 %v6718_v56  ;;  %v6736_v5 = vld [vmem:[%s9594_s5 + $0xe0] ss:$8 sps:$4 sm:$0xff]   ;;  %v6743_v56 = vld [vmem:[%s9593_s4 + $0x110] ss:$8 sps:$4 sm:$0xff]  }
  0x95   : > { %837 = vmatprep.subr.bf16.mxu1 %v6646_v2  ;;  %1102 = vmatprep.subr.bf16.mxu0 %v6719_v57  ;;  %v6731_v2 = vld [vmem:[%s9594_s5 + $0xd4] ss:$8 sps:$4 sm:$0xff]   ;;  %v6748_v57 = vld [vmem:[%s9593_s4 + $0x124] ss:$8 sps:$4 sm:$0xff]  }
  0x97   : > { %5567 = vmatmul.mubr.msk.bf16.vlgmr.msra.gmra.mrb[0].mxu1 %vm588_vm2, %v582_v7 }
  0x98   : > { %838 = vmatpush1.bf16.msra.mxu1 %v6644_v4  ;;  %1103 = vmatpush1.bf16.msra.mxu0 %v6721_v58  ;;  %v6734_v4 = vld [vmem:[%s9594_s5 + $0xe4] ss:$8 sps:$4 sm:$0xff]   ;;  %v6746_v58 = vld [vmem:[%s9593_s4 + $0x120] ss:$8 sps:$4 sm:$0xff]  }
  0x99   : > { %839 = vmatprep.subr.bf16.mxu1 %v6649_v8  ;;  %1104 = vmatprep.subr.bf16.mxu0 %v6722_v59  ;;  %v6751_v59 = vld [vmem:[%s9593_s4 + $0x134] ss:$8 sps:$4 sm:$0xff]  }
  0x9c   : > { %840 = vmatpush1.bf16.msra.mxu1 %v6647_v9  ;;  %1105 = vmatpush1.bf16.msra.mxu0 %v6724_v60  ;;  %v6749_v60 = vld [vmem:[%s9593_s4 + $0x130] ss:$8 sps:$4 sm:$0xff]  }
  0x9d   : > { %841 = vmatprep.subr.bf16.mxu1 %v6652_v10  ;;  %1106 = vmatprep.subr.bf16.mxu0 %v6725_v61  ;;  %v6754_v61 = vld [vmem:[%s9593_s4 + $0x144] ss:$8 sps:$4 sm:$0xff]  }
  0xa0   : > { %842 = vmatpush1.bf16.msra.mxu1 %v6650_v11  ;;  %1107 = vmatpush1.bf16.msra.mxu0 %v6727_v62  ;;  %v6752_v62 = vld [vmem:[%s9593_s4 + $0x140] ss:$8 sps:$4 sm:$0xff]  }
  0xa1   : > { %843 = vmatprep.subr.bf16.mxu1 %v6655_v12  ;;  %1108 = vmatprep.subr.bf16.mxu0 %v6728_v63  ;;  %v6757_v63 = vld [vmem:[%s9593_s4 + $0x154] ss:$8 sps:$4 sm:$0xff]  }
  0xa4   : > { %844 = vmatpush1.bf16.msra.mxu1 %v6653_v13  ;;  %1109 = vmatpush1.bf16.msra.mxu0 %v6730_v0  ;;  %v6737_v13 = vld [vmem:[%s9594_s5 + $0xf4] ss:$8 sps:$4 sm:$0xff]   ;;  %v6755_v0 = vld [vmem:[%s9593_s4 + $0x150] ss:$8 sps:$4 sm:$0xff]  }
  0xa5   : > { %845 = vmatprep.subr.bf16.mxu1 %v6658_v14  ;;  %1110 = vmatprep.subr.bf16.mxu0 %v6731_v2  ;;  %v6739_v14 = vld [vmem:[%s9594_s5 + $0xf0] ss:$8 sps:$4 sm:$0xff]   ;;  %v6760_v2 = vld [vmem:[%s9593_s4 + $0x164] ss:$8 sps:$4 sm:$0xff]  }
  0xa8   : > { %846 = vmatpush1.bf16.msra.mxu1 %v6656_v15  ;;  %1111 = vmatpush1.bf16.msra.mxu0 %v6733_v3  ;;  %v6742_v15 = vld [vmem:[%s9593_s4 + $0x104] ss:$8 sps:$4 sm:$0xff]   ;;  %v6758_v3 = vld [vmem:[%s9593_s4 + $0x160] ss:$8 sps:$4 sm:$0xff]  }
  0xa9   : > { %847 = vmatprep.subr.bf16.mxu1 %v6661_v16  ;;  %1112 = vmatprep.subr.bf16.mxu0 %v6734_v4  ;;  %v6788_v16 = vld [vmem:[%s9595_s6] ss:$8 sps:$4 sm:$0xff]   ;;  %v6763_v4 = vld [vmem:[%s9593_s4 + $0x174] ss:$8 sps:$4 sm:$0xff]  }
  0xac   : > { %848 = vmatpush1.bf16.msra.mxu1 %v6659_v17  ;;  %1113 = vmatpush1.bf16.msra.mxu0 %v6736_v5  ;;  %v6790_v17 = vld [vmem:[%s9595_s6 + $0x4] ss:$8 sps:$4 sm:$0xff]   ;;  %v6761_v5 = vld [vmem:[%s9593_s4 + $0x170] ss:$8 sps:$4 sm:$0xff]  }
  0xad   : > { %849 = vmatprep.subr.bf16.mxu1 %v6664_v18  ;;  %1114 = vmatprep.subr.bf16.mxu0 %v6737_v13  ;;  %v6793_v18 = vld [vmem:[%s9595_s6 + $0x14] ss:$8 sps:$4 sm:$0xff]   ;;  %v6764_v13 = vld [vmem:[%s9593_s4 + $0x180] ss:$8 sps:$4 sm:$0xff]  }
  0xb0   : > { %850 = vmatpush1.bf16.msra.mxu1 %v6662_v19  ;;  %1115 = vmatpush1.bf16.msra.mxu0 %v6739_v14  ;;  %v6791_v19 = vld [vmem:[%s9595_s6 + $0x10] ss:$8 sps:$4 sm:$0xff]   ;;  %v6769_v14 = vld [vmem:[%s9593_s4 + $0x194] ss:$8 sps:$4 sm:$0xff]  }
  0xb1   : > { %851 = vmatprep.subr.bf16.mxu1 %v6667_v20  ;;  %1564 = vmatprep.subr.bf16.mxu0 %v6742_v15  ;;  %v6796_v20 = vld [vmem:[%s9595_s6 + $0x24] ss:$8 sps:$4 sm:$0xff]   ;;  %v6767_v15 = vld [vmem:[%s9593_s4 + $0x190] ss:$8 sps:$4 sm:$0xff]  }
  0xb4   : > { %852 = vmatpush1.bf16.msra.mxu1 %v6665_v21  ;;  %v6794_v21 = vld [vmem:[%s9595_s6 + $0x20] ss:$8 sps:$4 sm:$0xff]  }
  0xb5   : > { %853 = vmatprep.subr.bf16.mxu1 %v6670_v22  ;;  %v6799_v22 = vld [vmem:[%s9595_s6 + $0x34] ss:$8 sps:$4 sm:$0xff]  }
  0xb8   : > { %854 = vmatpush1.bf16.msra.mxu1 %v6668_v23  ;;  %v6797_v23 = vld [vmem:[%s9595_s6 + $0x30] ss:$8 sps:$4 sm:$0xff]  }
  0xb9   : > { %855 = vmatprep.subr.bf16.mxu1 %v6673_v24  ;;  %v6802_v24 = vld [vmem:[%s9595_s6 + $0x44] ss:$8 sps:$4 sm:$0xff]  }
  0xbc   : > { %856 = vmatpush1.bf16.msra.mxu1 %v6671_v25  ;;  %v6800_v25 = vld [vmem:[%s9595_s6 + $0x40] ss:$8 sps:$4 sm:$0xff]  }
  0xbd   : > { %857 = vmatprep.subr.bf16.mxu1 %v6676_v26  ;;  %v6805_v26 = vld [vmem:[%s9595_s6 + $0x54] ss:$8 sps:$4 sm:$0xff]  }
  0xc0   : > { %858 = vmatpush1.bf16.msra.mxu1 %v6674_v27  ;;  %v6803_v27 = vld [vmem:[%s9595_s6 + $0x50] ss:$8 sps:$4 sm:$0xff]  }
  0xc1   : > { %859 = vmatprep.subr.bf16.mxu1 %v6679_v28  ;;  %v6808_v28 = vld [vmem:[%s9595_s6 + $0x64] ss:$8 sps:$4 sm:$0xff]  }
  0xc4   : > { %860 = vmatpush1.bf16.msra.mxu1 %v6677_v29  ;;  %v6806_v29 = vld [vmem:[%s9595_s6 + $0x60] ss:$8 sps:$4 sm:$0xff]  }
  0xc5   : > { %861 = vmatprep.subr.bf16.mxu1 %v6682_v30  ;;  %v6811_v30 = vld [vmem:[%s9595_s6 + $0x74] ss:$8 sps:$4 sm:$0xff]  }
  0xc8   : > { %862 = vmatpush1.bf16.msra.mxu1 %v6680_v31  ;;  %v6809_v31 = vld [vmem:[%s9595_s6 + $0x70] ss:$8 sps:$4 sm:$0xff]  }
  0xc9   : > { %863 = vmatprep.subr.bf16.mxu1 %v6685_v32  ;;  %v6814_v32 = vld [vmem:[%s9595_s6 + $0x84] ss:$8 sps:$4 sm:$0xff]  }
  0xcc   : > { %864 = vmatpush1.bf16.msra.mxu1 %v6683_v33  ;;  %v6812_v33 = vld [vmem:[%s9595_s6 + $0x80] ss:$8 sps:$4 sm:$0xff]  }
  0xcd   : > { %865 = vmatprep.subr.bf16.mxu1 %v6688_v34  ;;  %v6817_v34 = vld [vmem:[%s9595_s6 + $0x94] ss:$8 sps:$4 sm:$0xff]  }
  0xd0   : > { %866 = vmatpush1.bf16.msra.mxu1 %v6686_v35  ;;  %v6815_v35 = vld [vmem:[%s9595_s6 + $0x90] ss:$8 sps:$4 sm:$0xff]  }
  0xd1   : > { %867 = vmatprep.subr.bf16.mxu1 %v6691_v36  ;;  %v6820_v36 = vld [vmem:[%s9595_s6 + $0xa4] ss:$8 sps:$4 sm:$0xff]  }
  0xd4   : > { %868 = vmatpush1.bf16.msra.mxu1 %v6689_v37  ;;  %v6818_v37 = vld [vmem:[%s9595_s6 + $0xa0] ss:$8 sps:$4 sm:$0xff]  }
  0xd5   : > { %1319 = vmatprep.subr.bf16.mxu1 %v6790_v17  ;;  %v6770_v17 = vld [vmem:[%s9593_s4 + $0x1a0] ss:$8 sps:$4 sm:$0xff]  }
 0x16a   : > { %v7874_v7 = vpop.f32.mrb[0].mxu1 }
 0x16b   : > { %v7876_v8 = vpop.f32.mrb[1].mxu1  ;;  %v7886_v11 = vpack.c.bf16 %v7874_v7, %v7874_v7 }
 0x16c   : > { %v7880_v9 = vpack.c.bf16 %v7876_v8, %v7876_v8  ;;  %v7882_v10 = vpop.f32.mrb[2].mxu1 }
 0x16d   : > { %v7888_v12 = vpop.f32.mrb[3].mxu1 }
 0x16e   : > { %869 = vmatprep.mubr.bf16.mxu1 %v7880_v9  ;;  %v1401_v55 = vrot.slane %v7880_v9, 2  ;;  %v6766_v9 = vld [vmem:[%s9593_s4 + $0x184] ss:$8 sps:$4 sm:$0xff]  }
 0x16f   : > { %870 = vmatmul.mubr.bf16.vlgmr.msra.gmra.mrb[4].mxu1 %v7886_v11 }
 0x170   : > { %1320 = vmatpush1.bf16.msra.mxu1 %v6788_v16  ;;  %v6772_v16 = vld [vmem:[%s9593_s4 + $0x1a4] ss:$8 sps:$4 sm:$0xff]  }
 0x171   : > { %1321 = vmatprep.subr.bf16.mxu1 %v6793_v18  ;;  %v6775_v18 = vld [vmem:[%s9593_s4 + $0x1b4] ss:$8 sps:$4 sm:$0xff]  }
 0x174   : > { %1322 = vmatpush1.bf16.msra.mxu1 %v6791_v19  ;;  %v6773_v19 = vld [vmem:[%s9593_s4 + $0x1b0] ss:$8 sps:$4 sm:$0xff]  }
 0x175   : > { %1323 = vmatprep.subr.bf16.mxu1 %v6796_v20  ;;  %v6778_v20 = vld [vmem:[%s9593_s4 + $0x1c4] ss:$8 sps:$4 sm:$0xff]  }
 0x178   : > { %1324 = vmatpush1.bf16.msra.mxu1 %v6794_v21  ;;  %v6776_v21 = vld [vmem:[%s9593_s4 + $0x1c0] ss:$8 sps:$4 sm:$0xff]  }
 0x179   : > { %1325 = vmatprep.subr.bf16.mxu1 %v6799_v22  ;;  %v6781_v22 = vld [vmem:[%s9593_s4 + $0x1d4] ss:$8 sps:$4 sm:$0xff]  }
 0x17c   : > { %1326 = vmatpush1.bf16.msra.mxu1 %v6797_v23  ;;  %v6779_v23 = vld [vmem:[%s9593_s4 + $0x1d0] ss:$8 sps:$4 sm:$0xff]  }
 0x17d   : > { %1327 = vmatprep.subr.bf16.mxu1 %v6802_v24  ;;  %v6784_v24 = vld [vmem:[%s9593_s4 + $0x1e4] ss:$8 sps:$4 sm:$0xff]  }
 0x180   : > { %1328 = vmatpush1.bf16.msra.mxu1 %v6800_v25  ;;  %v6782_v25 = vld [vmem:[%s9593_s4 + $0x1e0] ss:$8 sps:$4 sm:$0xff]  }
 0x181   : > { %1329 = vmatprep.subr.bf16.mxu1 %v6805_v26  ;;  %v6787_v26 = vld [vmem:[%s9593_s4 + $0x1f4] ss:$8 sps:$4 sm:$0xff]  }
 0x184   : > { %1330 = vmatpush1.bf16.msra.mxu1 %v6803_v27  ;;  %v6785_v27 = vld [vmem:[%s9593_s4 + $0x1f0] ss:$8 sps:$4 sm:$0xff]  }
 0x185   : > { %1331 = vmatprep.subr.bf16.mxu1 %v6808_v28  ;;  %v1400_v28 = vrot.slane %v7886_v11, 2  ;;  %v6884_v11 = vld [vmem:[%s9595_s6 + $0x100] ss:$8 sps:$4 sm:$0xff]  }
 0x188   : > { %1332 = vmatpush1.bf16.msra.mxu1 %v6806_v29  ;;  %v6835_v29 = vld [vmem:[%s9595_s6 + $0xf4] ss:$8 sps:$4 sm:$0xff]  }
 0x189   : > { %1333 = vmatprep.subr.bf16.mxu1 %v6811_v30  ;;  %v6833_v30 = vld [vmem:[%s9595_s6 + $0xf0] ss:$8 sps:$4 sm:$0xff]  }
 0x18c   : > { %1334 = vmatpush1.bf16.msra.mxu1 %v6809_v31  ;;  %v6838_v31 = vld [vmem:[%s9594_s5 + $0x104] ss:$8 sps:$4 sm:$0xff]  }
 0x18d   : > { %1335 = vmatprep.subr.bf16.mxu1 %v6814_v32  ;;  %v6886_v32 = vld [vmem:[%s9595_s6 + $0x104] ss:$8 sps:$4 sm:$0xff]  }
 0x190   : > { %1336 = vmatpush1.bf16.msra.mxu1 %v6812_v33  ;;  %v6889_v33 = vld [vmem:[%s9595_s6 + $0x114] ss:$8 sps:$4 sm:$0xff]  }
 0x191   : > { %1337 = vmatprep.subr.bf16.mxu1 %v6817_v34  ;;  %v6887_v34 = vld [vmem:[%s9595_s6 + $0x110] ss:$8 sps:$4 sm:$0xff]  }
 0x194   : > { %1338 = vmatpush1.bf16.msra.mxu1 %v6815_v35  ;;  %v6892_v35 = vld [vmem:[%s9595_s6 + $0x124] ss:$8 sps:$4 sm:$0xff]  }
 0x195   : > { %1339 = vmatprep.subr.bf16.mxu1 %v6820_v36  ;;  %v6890_v36 = vld [vmem:[%s9595_s6 + $0x120] ss:$8 sps:$4 sm:$0xff]  }
 0x198   : > { %1340 = vmatpush1.bf16.msra.mxu1 %v6818_v37  ;;  %v6895_v37 = vld [vmem:[%s9595_s6 + $0x134] ss:$8 sps:$4 sm:$0xff]  }
 0x199   : > { %1341 = vmatprep.subr.bf16.mxu1 %v6823_v38  ;;  %v6893_v38 = vld [vmem:[%s9595_s6 + $0x130] ss:$8 sps:$4 sm:$0xff]  }
 0x19c   : > { %1342 = vmatpush1.bf16.msra.mxu1 %v6821_v39  ;;  %v6898_v39 = vld [vmem:[%s9595_s6 + $0x144] ss:$8 sps:$4 sm:$0xff]  }
 0x19d   : > { %1343 = vmatprep.subr.bf16.mxu1 %v6826_v40  ;;  %v6896_v40 = vld [vmem:[%s9595_s6 + $0x140] ss:$8 sps:$4 sm:$0xff]  }
 0x1a0   : > { %1344 = vmatpush1.bf16.msra.mxu1 %v6824_v41  ;;  %v6901_v41 = vld [vmem:[%s9595_s6 + $0x154] ss:$8 sps:$4 sm:$0xff]  }
 0x1a1   : > { %1345 = vmatprep.subr.bf16.mxu1 %v6829_v42  ;;  %v6899_v42 = vld [vmem:[%s9595_s6 + $0x150] ss:$8 sps:$4 sm:$0xff]  }
 0x1a4   : > { %1346 = vmatpush1.bf16.msra.mxu1 %v6827_v43  ;;  %v6904_v43 = vld [vmem:[%s9595_s6 + $0x164] ss:$8 sps:$4 sm:$0xff]  }
 0x1a5   : > { %1347 = vmatprep.subr.bf16.mxu1 %v6832_v44  ;;  %v6902_v44 = vld [vmem:[%s9595_s6 + $0x160] ss:$8 sps:$4 sm:$0xff]  }
 0x1a8   : > { %1348 = vmatpush1.bf16.msra.mxu1 %v6830_v45  ;;  %v6907_v45 = vld [vmem:[%s9595_s6 + $0x174] ss:$8 sps:$4 sm:$0xff]  }
 0x1a9   : > { %1349 = vmatprep.subr.bf16.mxu1 %v6835_v29  ;;  %v6857_v29 = vld [vmem:[%s9594_s5 + $0x170] ss:$8 sps:$4 sm:$0xff]  }
 0x1ac   : > { %1350 = vmatpush1.bf16.msra.mxu1 %v6833_v30  ;;  %v6862_v30 = vld [vmem:[%s9594_s5 + $0x184] ss:$8 sps:$4 sm:$0xff]  }
 0x1ad   : > { %1813 = vmatprep.subr.bf16.mxu1 %v6838_v31  ;;  %v6860_v31 = vld [vmem:[%s9594_s5 + $0x180] ss:$8 sps:$4 sm:$0xff]  }
 0x242   : > { %v871_v46 = vpop.f32.mrb[4].mxu1 }
 0x243   : > { %v873_v47 = vpop.f32.mrb[5].mxu1  ;;  %v910_v52 = vpack.c.bf16 %v871_v46, %v871_v46  ;;  %v6905_v46 = vld [vmem:[%s9595_s6 + $0x170] ss:$8 sps:$4 sm:$0xff]  }
 0x244   : > { %v875_v48 = vpop.f32.mrb[6].mxu1  ;;  %v911_v49 = vpack.c.bf16 %v873_v47, %v873_v47  ;;  %v6910_v47 = vld [vmem:[%s9595_s6 + $0x184] ss:$8 sps:$4 sm:$0xff]  }
 0x245   : > { %v876_v53 = vpop.f32.mrb[7].mxu1  ;;  %v6908_v48 = vld [vmem:[%s9595_s6 + $0x180] ss:$8 sps:$4 sm:$0xff]  }
 0x246   : > { %1116 = vmatprep.mubr.bf16.mxu0 %v911_v49  ;;  %v6913_v49 = vld [vmem:[%s9595_s6 + $0x194] ss:$8 sps:$4 sm:$0xff]   ;;  %v6914_v53 = vld [vmem:[%s9595_s6 + $0x1a0] ss:$8 sps:$4 sm:$0xff]  }
 0x247   : > { %1117 = vmatmul.mubr.bf16.vlgmr.msra.gmra.mrb[0].mxu0 %v910_v52  ;;  %v6916_v52 = vld [vmem:[%s9595_s6 + $0x1a4] ss:$8 sps:$4 sm:$0xff]  }
 0x248   : > { %1565 = vmatpush1.bf16.msra.mxu0 %v6740_v51  ;;  %1596 = vmatprep.mubr.bf16.mxu0 %v1401_v55  ;;  %v6911_v51 = vld [vmem:[%s9595_s6 + $0x190] ss:$8 sps:$4 sm:$0xff]  }
 0x249   : > { %1566 = vmatprep.subr.bf16.mxu0 %v6745_v54  ;;  %v6919_v54 = vld [vmem:[%s9595_s6 + $0x1b4] ss:$8 sps:$4 sm:$0xff]   ;;  %v6917_v55 = vld [vmem:[%s9595_s6 + $0x1b0] ss:$8 sps:$4 sm:$0xff]  }
 0x24c   : > { %1567 = vmatpush1.bf16.msra.mxu0 %v6743_v56  ;;  %v6922_v56 = vld [vmem:[%s9595_s6 + $0x1c4] ss:$8 sps:$4 sm:$0xff]  }
 0x24d   : > { %1568 = vmatprep.subr.bf16.mxu0 %v6748_v57  ;;  %v6920_v57 = vld [vmem:[%s9595_s6 + $0x1c0] ss:$8 sps:$4 sm:$0xff]  }
 0x250   : > { %1569 = vmatpush1.bf16.msra.mxu0 %v6746_v58  ;;  %v6925_v58 = vld [vmem:[%s9595_s6 + $0x1d4] ss:$8 sps:$4 sm:$0xff]  }
 0x251   : > { %1570 = vmatprep.subr.bf16.mxu0 %v6751_v59  ;;  %v8177_v59 = vsub.s32 0, %v7676_v50 }
 0x254   : > { %1571 = vmatpush1.bf16.msra.mxu0 %v6749_v60  ;;  %v912_v60 = vld [vmem:[%s9596_s7] sm:$0x3] }
 0x255   : > { %1572 = vmatprep.subr.bf16.mxu0 %v6754_v61  ;;  %v8183_v61 = vsub.s32 1, %v7676_v50  ;;  %v6836_v50 = vld [vmem:[%s9594_s5 + $0x100] ss:$8 sps:$4 sm:$0xff]  }
 0x258   : > { %1573 = vmatpush1.bf16.msra.mxu0 %v6752_v62  ;;  %v6923_v62 = vld [vmem:[%s9595_s6 + $0x1d0] ss:$8 sps:$4 sm:$0xff]  }
 0x259   : > { %1574 = vmatprep.subr.bf16.mxu0 %v6757_v63  ;;  %v917_v63 = vrot.slane %v912_v60, %v8177_v59 }
 0x25c   : > { %1575 = vmatpush1.bf16.msra.mxu0 %v6755_v0  ;;  %v921_v0 = vrot.slane %v912_v60, %v8183_v61 }
 0x25d   : > { %1576 = vmatprep.subr.bf16.mxu0 %v6760_v2 }
 0x260   : > { %1577 = vmatpush1.bf16.msra.mxu0 %v6758_v3 }
 0x261   : > { %1578 = vmatprep.subr.bf16.mxu0 %v6763_v4 }
 0x264   : > { %1579 = vmatpush1.bf16.msra.mxu0 %v6761_v5 }
 0x265   : > { %1580 = vmatprep.subr.bf16.mxu0 %v6766_v9 }
 0x268   : > { %1581 = vmatpush1.bf16.msra.mxu0 %v6764_v13 }
 0x269   : > { %1582 = vmatprep.subr.bf16.mxu0 %v6769_v14 }
 0x26c   : > { %1583 = vmatpush1.bf16.msra.mxu0 %v6767_v15 }
 0x26d   : > { %1584 = vmatprep.subr.bf16.mxu0 %v6772_v16  ;;  %v6841_v16 = vld [vmem:[%s9594_s5 + $0x114] ss:$8 sps:$4 sm:$0xff]  }
 0x270   : > { %1585 = vmatpush1.bf16.msra.mxu0 %v6770_v17  ;;  %v6839_v17 = vld [vmem:[%s9594_s5 + $0x110] ss:$8 sps:$4 sm:$0xff]  }
 0x271   : > { %1586 = vmatprep.subr.bf16.mxu0 %v6775_v18  ;;  %v6844_v18 = vld [vmem:[%s9594_s5 + $0x124] ss:$8 sps:$4 sm:$0xff]  }
 0x274   : > { %1587 = vmatpush1.bf16.msra.mxu0 %v6773_v19  ;;  %v6842_v19 = vld [vmem:[%s9594_s5 + $0x120] ss:$8 sps:$4 sm:$0xff]  }
 0x275   : > { %1588 = vmatprep.subr.bf16.mxu0 %v6778_v20  ;;  %v6847_v20 = vld [vmem:[%s9594_s5 + $0x134] ss:$8 sps:$4 sm:$0xff]  }
 0x278   : > { %1589 = vmatpush1.bf16.msra.mxu0 %v6776_v21  ;;  %v6845_v21 = vld [vmem:[%s9594_s5 + $0x130] ss:$8 sps:$4 sm:$0xff]  }
 0x279   : > { %1590 = vmatprep.subr.bf16.mxu0 %v6781_v22  ;;  %v6850_v22 = vld [vmem:[%s9594_s5 + $0x144] ss:$8 sps:$4 sm:$0xff]  }
 0x27c   : > { %1591 = vmatpush1.bf16.msra.mxu0 %v6779_v23  ;;  %v6848_v23 = vld [vmem:[%s9594_s5 + $0x140] ss:$8 sps:$4 sm:$0xff]  }
 0x27d   : > { %1592 = vmatprep.subr.bf16.mxu0 %v6784_v24  ;;  %v6853_v24 = vld [vmem:[%s9594_s5 + $0x154] ss:$8 sps:$4 sm:$0xff]  }
 0x280   : > { %1593 = vmatpush1.bf16.msra.mxu0 %v6782_v25  ;;  %v6851_v25 = vld [vmem:[%s9594_s5 + $0x150] ss:$8 sps:$4 sm:$0xff]  }
 0x281   : > { %1594 = vmatprep.subr.bf16.mxu0 %v6787_v26  ;;  %v6856_v26 = vld [vmem:[%s9594_s5 + $0x164] ss:$8 sps:$4 sm:$0xff]  }
 0x284   : > { %1595 = vmatpush1.bf16.msra.mxu0 %v6785_v27  ;;  %v6854_v27 = vld [vmem:[%s9594_s5 + $0x160] ss:$8 sps:$4 sm:$0xff]  }
 0x285   : > { %2049 = vmatprep.subr.bf16.mxu0 %v6886_v32  ;;  %v6863_v32 = vld [vmem:[%s9594_s5 + $0x190] ss:$8 sps:$4 sm:$0xff]  }
 0x287   : > { %1597 = vmatmul.mubr.bf16.vlgmr.msra.gmra.mrb[4].mxu0 %v1400_v28  ;;  %v6859_v28 = vld [vmem:[%s9594_s5 + $0x174] ss:$8 sps:$4 sm:$0xff]  }
 0x288   : > { %2050 = vmatpush1.bf16.msra.mxu0 %v6884_v11  ;;  %v6865_v11 = vld [vmem:[%s9594_s5 + $0x194] ss:$8 sps:$4 sm:$0xff]  }
 0x289   : > { %2051 = vmatprep.subr.bf16.mxu0 %v6889_v33  ;;  %v6868_v33 = vld [vmem:[%s9594_s5 + $0x1a4] ss:$8 sps:$4 sm:$0xff]  }
 0x28c   : > { %2052 = vmatpush1.bf16.msra.mxu0 %v6887_v34  ;;  %v6866_v34 = vld [vmem:[%s9594_s5 + $0x1a0] ss:$8 sps:$4 sm:$0xff]  }
 0x28d   : > { %2053 = vmatprep.subr.bf16.mxu0 %v6892_v35  ;;  %v6871_v35 = vld [vmem:[%s9594_s5 + $0x1b4] ss:$8 sps:$4 sm:$0xff]  }
 0x290   : > { %2054 = vmatpush1.bf16.msra.mxu0 %v6890_v36  ;;  %v6869_v36 = vld [vmem:[%s9594_s5 + $0x1b0] ss:$8 sps:$4 sm:$0xff]  }
 0x291   : > { %2055 = vmatprep.subr.bf16.mxu0 %v6895_v37  ;;  %v6874_v37 = vld [vmem:[%s9594_s5 + $0x1c4] ss:$8 sps:$4 sm:$0xff]  }
 0x294   : > { %2056 = vmatpush1.bf16.msra.mxu0 %v6893_v38  ;;  %v6872_v38 = vld [vmem:[%s9594_s5 + $0x1c0] ss:$8 sps:$4 sm:$0xff]  }
 0x295   : > { %2057 = vmatprep.subr.bf16.mxu0 %v6898_v39  ;;  %v6877_v39 = vld [vmem:[%s9594_s5 + $0x1d4] ss:$8 sps:$4 sm:$0xff]  }
 0x298   : > { %2058 = vmatpush1.bf16.msra.mxu0 %v6896_v40  ;;  %v6875_v40 = vld [vmem:[%s9594_s5 + $0x1d0] ss:$8 sps:$4 sm:$0xff]  }
 0x299   : > { %2059 = vmatprep.subr.bf16.mxu0 %v6901_v41  ;;  %v6880_v41 = vld [vmem:[%s9594_s5 + $0x1e4] ss:$8 sps:$4 sm:$0xff]  }
 0x29c   : > { %2060 = vmatpush1.bf16.msra.mxu0 %v6899_v42  ;;  %v6878_v42 = vld [vmem:[%s9594_s5 + $0x1e0] ss:$8 sps:$4 sm:$0xff]  }
 0x29d   : > { %2061 = vmatprep.subr.bf16.mxu0 %v6904_v43  ;;  %v6883_v43 = vld [vmem:[%s9594_s5 + $0x1f4] ss:$8 sps:$4 sm:$0xff]  }
 0x2a0   : > { %2062 = vmatpush1.bf16.msra.mxu0 %v6902_v44 }
 0x2a1   : > { %2063 = vmatprep.subr.bf16.mxu0 %v6907_v45  ;;  %v6881_v45 = vld [vmem:[%s9594_s5 + $0x1f0] ss:$8 sps:$4 sm:$0xff]  }
 0x2a4   : > { %2064 = vmatpush1.bf16.msra.mxu0 %v6905_v46 }
 0x2a5   : > { %2065 = vmatprep.subr.bf16.mxu0 %v6910_v47 }
 0x2a8   : > { %2066 = vmatpush1.bf16.msra.mxu0 %v6908_v48 }
 0x2a9   : > { %2067 = vmatprep.subr.bf16.mxu0 %v6913_v49 }
 0x2ac   : > { %2068 = vmatpush1.bf16.msra.mxu0 %v6911_v51 }
 0x2ad   : > { %2069 = vmatprep.subr.bf16.mxu0 %v6916_v52  ;;  %v6928_v52 = vld [vmem:[%s9595_s6 + $0x1e4] ss:$8 sps:$4 sm:$0xff]  }
 0x2b0   : > { %2070 = vmatpush1.bf16.msra.mxu0 %v6914_v53  ;;  %v6926_v53 = vld [vmem:[%s9595_s6 + $0x1e0] ss:$8 sps:$4 sm:$0xff]  }
 0x2b1   : > { %2071 = vmatprep.subr.bf16.mxu0 %v6919_v54  ;;  %v6931_v54 = vld [vmem:[%s9595_s6 + $0x1f4] ss:$8 sps:$4 sm:$0xff]  }
 0x2b4   : > { %2072 = vmatpush1.bf16.msra.mxu0 %v6917_v55  ;;  %v6929_v55 = vld [vmem:[%s9595_s6 + $0x1f0] ss:$8 sps:$4 sm:$0xff]  }
 0x2b5   : > { %2073 = vmatprep.subr.bf16.mxu0 %v6922_v56  ;;  %v642_v56 = vld [vmem:[%s9597_s8] sm:$0xf] }
 0x2b8   : > { %2074 = vmatpush1.bf16.msra.mxu0 %v6920_v57  ;;  %v8299_v57 = vpack.c.bf16 %v642_v56, %v642_v56  ;;  %v6962_v56 = vld [vmem:[%s9593_s4 + $0x2a0] ss:$8 sps:$4 sm:$0xff]  }
 0x2b9   : > { %2075 = vmatprep.subr.bf16.mxu0 %v6925_v58 }
 0x2ba   : > { %2101 = vrot.lane.b32.xlu1 %v8299_v57, %s7545_s26 }
 0x2bc   : > { %2076 = vmatpush1.bf16.msra.mxu0 %v6923_v62 }
 0x2bd   : > { %2077 = vmatprep.subr.bf16.mxu0 %v6928_v52  ;;  %v6956_v52 = vld [vmem:[%s9593_s4 + $0x280] ss:$8 sps:$4 sm:$0xff]  }
 0x2be   : > { %2932 = vrot.lane.b32.xlu1 %v8299_v57, %s7546_s23 }
 0x2c0   : > { %2078 = vmatpush1.bf16.msra.mxu0 %v6926_v53  ;;  %v6961_v53 = vld [vmem:[%s9593_s4 + $0x294] ss:$8 sps:$4 sm:$0xff]  }
 0x2c1   : > { %2079 = vmatprep.subr.bf16.mxu0 %v6931_v54  ;;  %v6959_v54 = vld [vmem:[%s9593_s4 + $0x290] ss:$8 sps:$4 sm:$0xff]  }
 0x2c4   : > { %2080 = vmatpush1.bf16.msra.mxu0 %v6929_v55  ;;  %v6964_v55 = vld [vmem:[%s9593_s4 + $0x2a4] ss:$8 sps:$4 sm:$0xff]  }
 0x31a   : > { %v1118_v2 = vpop.f32.mrb[0].mxu0 }
 0x31b   : > { %v1119_v3 = vadd.f32 %v1118_v2, %v917_v63  ;;  %v1120_v4 = vpop.f32.mrb[1].mxu0 }
 0x31c   : > { %v1121_v5 = vadd.f32 %v1120_v4, %v921_v0  ;;  %v1122_v9 = vpop.f32.mrb[2].mxu0  ;;  %v5760_v4 = vld [vmem:[%s9596_s7 + $0x2] sm:$0x3] }
 0x31d   : > { %v1123_v13 = vpop.f32.mrb[3].mxu0  ;;  %v1157_v15 = vpack.c.bf16 %v1119_v3, %v1119_v3  ;;  %v1650_v9 = vrot.slane %v5760_v4, %v8183_v61 }
 0x31e   : > { %v1158_v14 = vpack.c.bf16 %v1121_v5, %v1121_v5  ;;  %v1646_v5 = vrot.slane %v5760_v4, %v8177_v59  ;;  %v6974_v4 = vld [vmem:[%s9593_s4 + $0x2e0] ss:$8 sps:$4 sm:$0xff]  }
 0x320   : > { %1351 = vmatprep.mubr.bf16.mxu1 %v1158_v14 }
 0x321   : > { %1352 = vmatmul.mubr.bf16.vlgmr.msra.gmra.mrb[8].mxu1 %v1157_v15 }
 0x322   : > { %1814 = vmatpush1.bf16.msra.mxu1 %v6836_v50 }
 0x323   : > { %1815 = vmatprep.subr.bf16.mxu1 %v6841_v16 }
 0x326   : > { %1816 = vmatpush1.bf16.msra.mxu1 %v6839_v17 }
 0x327   : > { %1817 = vmatprep.subr.bf16.mxu1 %v6844_v18 }
 0x32a   : > { %1818 = vmatpush1.bf16.msra.mxu1 %v6842_v19 }
 0x32b   : > { %1819 = vmatprep.subr.bf16.mxu1 %v6847_v20 }
 0x32e   : > { %1820 = vmatpush1.bf16.msra.mxu1 %v6845_v21 }
 0x32f   : > { %1821 = vmatprep.subr.bf16.mxu1 %v6850_v22 }
 0x332   : > { %1822 = vmatpush1.bf16.msra.mxu1 %v6848_v23 }
 0x333   : > { %1823 = vmatprep.subr.bf16.mxu1 %v6853_v24 }
 0x336   : > { %1824 = vmatpush1.bf16.msra.mxu1 %v6851_v25 }
 0x337   : > { %1825 = vmatprep.subr.bf16.mxu1 %v6856_v26 }
 0x33a   : > { %1826 = vmatpush1.bf16.msra.mxu1 %v6854_v27 }
 0x33b   : > { %1827 = vmatprep.subr.bf16.mxu1 %v6859_v28 }
 0x33e   : > { %1828 = vmatpush1.bf16.msra.mxu1 %v6857_v29 }
 0x33f   : > { %1829 = vmatprep.subr.bf16.mxu1 %v6862_v30 }
 0x342   : > { %1830 = vmatpush1.bf16.msra.mxu1 %v6860_v31 }
 0x343   : > { %1831 = vmatprep.subr.bf16.mxu1 %v6865_v11 }
 0x346   : > { %1832 = vmatpush1.bf16.msra.mxu1 %v6863_v32 }
 0x347   : > { %1833 = vmatprep.subr.bf16.mxu1 %v6868_v33  ;;  %v6934_v33 = vld [vmem:[%s9593_s4 + $0x204] ss:$8 sps:$4 sm:$0xff]  }
 0x34a   : > { %1834 = vmatpush1.bf16.msra.mxu1 %v6866_v34 }
 0x34b   : > { %1835 = vmatprep.subr.bf16.mxu1 %v6871_v35  ;;  %v2102_v35 = vpop.permute.xlu1 %2101 }
 0x34e   : > { %1836 = vmatpush1.bf16.msra.mxu1 %v6869_v36  ;;  %v2241_v36 = vpack.c.bf16 %v7888_v12, %v7888_v12 }
 0x34f   : > { %1837 = vmatprep.subr.bf16.mxu1 %v6874_v37  ;;  %v6935_v37 = vld [vmem:[%s9593_s4 + $0x210] ss:$8 sps:$4 sm:$0xff]  }
 0x352   : > { %1838 = vmatpush1.bf16.msra.mxu1 %v6872_v38  ;;  %v6940_v38 = vld [vmem:[%s9593_s4 + $0x224] ss:$8 sps:$4 sm:$0xff]  }
 0x353   : > { %1839 = vmatprep.subr.bf16.mxu1 %v6877_v39  ;;  %v6938_v39 = vld [vmem:[%s9593_s4 + $0x220] ss:$8 sps:$4 sm:$0xff]  }
 0x356   : > { %1840 = vmatpush1.bf16.msra.mxu1 %v6875_v40  ;;  %v6943_v40 = vld [vmem:[%s9593_s4 + $0x234] ss:$8 sps:$4 sm:$0xff]  }
 0x357   : > { %1841 = vmatprep.subr.bf16.mxu1 %v6880_v41  ;;  %v6941_v41 = vld [vmem:[%s9593_s4 + $0x230] ss:$8 sps:$4 sm:$0xff]  }
 0x35a   : > { %v1598_v44 = vpop.f32.mrb[4].mxu0  ;;  %1842 = vmatpush1.bf16.msra.mxu1 %v6878_v42  ;;  %v6946_v42 = vld [vmem:[%s9593_s4 + $0x244] ss:$8 sps:$4 sm:$0xff]  }
 0x35b   : > { %v1600_v46 = vpop.f32.mrb[5].mxu0  ;;  %1843 = vmatprep.subr.bf16.mxu1 %v6883_v43  ;;  %v1638_v51 = vpack.c.bf16 %v1598_v44, %v1598_v44  ;;  %v6944_v43 = vld [vmem:[%s9593_s4 + $0x240] ss:$8 sps:$4 sm:$0xff]   ;;  %v6949_v44 = vld [vmem:[%s9593_s4 + $0x254] ss:$8 sps:$4 sm:$0xff]  }
 0x35c   : > { %v1639_v47 = vpack.c.bf16 %v1600_v46, %v1600_v46  ;;  %v1602_v48 = vpop.f32.mrb[6].mxu0  ;;  %v6952_v46 = vld [vmem:[%s9593_s4 + $0x264] ss:$8 sps:$4 sm:$0xff]  }
 0x35d   : > { %v1603_v49 = vpop.f32.mrb[7].mxu0  ;;  %v6955_v48 = vld [vmem:[%s9593_s4 + $0x274] ss:$8 sps:$4 sm:$0xff]  }
 0x35e   : > { %1844 = vmatpush1.bf16.msra.mxu1 %v6881_v45  ;;  %1845 = vmatprep.mubr.bf16.mxu1 %v1639_v47  ;;  %v6947_v45 = vld [vmem:[%s9593_s4 + $0x250] ss:$8 sps:$4 sm:$0xff]   ;;  %v6950_v47 = vld [vmem:[%s9593_s4 + $0x260] ss:$8 sps:$4 sm:$0xff]  }
 0x35f   : > { %v6953_v49 = vld [vmem:[%s9593_s4 + $0x270] ss:$8 sps:$4 sm:$0xff]  }
 0x361   : > { %1846 = vmatmul.mubr.bf16.vlgmr.msra.gmra.mrb[12].mxu1 %v1638_v51  ;;  %v6958_v51 = vld [vmem:[%s9593_s4 + $0x284] ss:$8 sps:$4 sm:$0xff]  }
 0x362   : > { %2148 = vmatprep.mubr.bf16.mxu1 %v7543_v1 }
 0x3f4   : > { %v1353_v58 = vpop.f32.mrb[8].mxu1 }
 0x3f5   : > { %v1360_v60 = vmul.f32 %v1353_v58, %v7874_v7  ;;  %v1355_v62 = vpop.f32.mrb[9].mxu1  ;;  %v6967_v58 = vld [vmem:[%s9593_s4 + $0x2b4] ss:$8 sps:$4 sm:$0xff]  }
 0x3f6   : > { %v1361_v63 = vmul.f32 %v1355_v62, %v7876_v8  ;;  %v1357_v0 = vpop.f32.mrb[10].mxu1  ;;  %v6970_v62 = vld [vmem:[%s9593_s4 + $0x2c4] ss:$8 sps:$4 sm:$0xff]  }
 0x3f7   : > { %v1358_v2 = vpop.f32.mrb[11].mxu1  ;;  %v1363_v17 = vpack.c.bf16 %v1360_v60, %v1360_v60  ;;  %v6965_v60 = vld [vmem:[%s9593_s4 + $0x2b0] ss:$8 sps:$4 sm:$0xff]   ;;  %v6973_v0 = vld [vmem:[%s9593_s4 + $0x2d4] ss:$8 sps:$4 sm:$0xff]  }
 0x3f8   : > { %v1364_v3 = vpack.c.bf16 %v1361_v63, %v1361_v63  ;;  %v6968_v63 = vld [vmem:[%s9593_s4 + $0x2c0] ss:$8 sps:$4 sm:$0xff]   ;;  %v6971_v2 = vld [vmem:[%s9593_s4 + $0x2d0] ss:$8 sps:$4 sm:$0xff]  }
 0x3f9   : > { %v2161_v21 = vsel %vm592_vm1, %v1363_v17, 0  ;;  %v6982_v17 = vld [vmem:[%s9594_s5 + $0x204] ss:$8 sps:$4 sm:$0xff]  }
 0x3fa   : > { %5859 = vmatprep.subr.msk.bf16.mxu0 %vm592_vm1, %v1364_v3  ;;  %v6976_v3 = vld [vmem:[%s9593_s4 + $0x2e4] ss:$8 sps:$4 sm:$0xff]  }
 0x434   : > { %v1847_v13 = vpop.f32.mrb[12].mxu1 }
 0x435   : > { %v1848_v14 = vadd.f32 %v1847_v13, %v1646_v5  ;;  %v1849_v50 = vpop.f32.mrb[13].mxu1  ;;  %v6979_v5 = vld [vmem:[%s9593_s4 + $0x2f4] ss:$8 sps:$4 sm:$0xff]   ;;  %v2240_v13 = vpack.c.bf16 %v7882_v10, %v7882_v10 }
 0x436   : > { %v1850_v15 = vadd.f32 %v1849_v50, %v1650_v9  ;;  %v1851_v16 = vpop.f32.mrb[14].mxu1  ;;  %v6977_v9 = vld [vmem:[%s9593_s4 + $0x2f0] ss:$8 sps:$4 sm:$0xff]  }
 0x437   : > { %v1852_v18 = vpop.f32.mrb[15].mxu1  ;;  %v1887_v20 = vpack.c.bf16 %v1848_v14, %v1848_v14  ;;  %v6980_v16 = vld [vmem:[%s9594_s5 + $0x200] ss:$8 sps:$4 sm:$0xff]  }
 0x438   : > { %v1888_v19 = vpack.c.bf16 %v1850_v15, %v1850_v15  ;;  %v6985_v18 = vld [vmem:[%s9594_s5 + $0x214] ss:$8 sps:$4 sm:$0xff]  }
 0x43a   : > { %2081 = vmatprep.mubr.bf16.mxu0 %v1888_v19  ;;  %v6983_v19 = vld [vmem:[%s9594_s5 + $0x210] ss:$8 sps:$4 sm:$0xff]  }
 0x43b   : > { %2082 = vmatmul.mubr.bf16.vlgmr.msra.gmra.mrb[8].mxu0 %v1887_v20  ;;  %v6988_v20 = vld [vmem:[%s9594_s5 + $0x224] ss:$8 sps:$4 sm:$0xff]  }
 0x43c   : > { %2167 = vmatpush1.bf16.msra.mxu0 %v2161_v21  ;;  %2198 = vmatprep.mubr.bf16.mxu0 %v7543_v1  ;;  %v6986_v21 = vld [vmem:[%s9594_s5 + $0x220] ss:$8 sps:$4 sm:$0xff]  }
 0x43d   : > { %2651 = vmatprep.subr.bf16.mxu0 %v6982_v17  ;;  %v7061_v17 = vld [vmem:[%s9595_s6 + $0x2b0] ss:$8 sps:$4 sm:$0xff]  }
 0x443   : > { %5860 = vmatmul.mubr.msk.bf16.vlgmr.msra.gmra.mrb[12].mxu0 %vm588_vm2, %v8299_v57  ;;  %v3040_v57 = vld [vmem:[%s9599_s10] sm:$0xf] }
 0x444   : > { %2652 = vmatpush1.bf16.msra.mxu0 %v6980_v16  ;;  %v7063_v16 = vld [vmem:[%s9595_s6 + $0x2b4] ss:$8 sps:$4 sm:$0xff]   ;;  %3043 = vperm.xlu1 %6628, %v3040_v57  }
 0x445   : > { %2653 = vmatprep.subr.bf16.mxu0 %v6985_v18  ;;  %v7066_v18 = vld [vmem:[%s9595_s6 + $0x2c4] ss:$8 sps:$4 sm:$0xff]  }
 0x448   : > { %2654 = vmatpush1.bf16.msra.mxu0 %v6983_v19  ;;  %v7064_v19 = vld [vmem:[%s9595_s6 + $0x2c0] ss:$8 sps:$4 sm:$0xff]  }
 0x449   : > { %2655 = vmatprep.subr.bf16.mxu0 %v6988_v20  ;;  %v7069_v20 = vld [vmem:[%s9595_s6 + $0x2d4] ss:$8 sps:$4 sm:$0xff]  }
 0x44c   : > { %2656 = vmatpush1.bf16.msra.mxu0 %v6986_v21  ;;  %v7067_v21 = vld [vmem:[%s9595_s6 + $0x2d0] ss:$8 sps:$4 sm:$0xff]  }
 0x50e   : > { %v2083_v22 = vpop.f32.mrb[8].mxu0 }
 0x50f   : > { %v2092_v23 = vrot.slane %v2083_v22, 4  ;;  %v2085_v24 = vpop.f32.mrb[9].mxu0  ;;  %v6991_v22 = vld [vmem:[%s9594_s5 + $0x234] ss:$8 sps:$4 sm:$0xff]  }
 0x510   : > { %v2093_v25 = vrot.slane %v2085_v24, 4  ;;  %v2087_v26 = vpop.f32.mrb[10].mxu0  ;;  %v6989_v24 = vld [vmem:[%s9594_s5 + $0x230] ss:$8 sps:$4 sm:$0xff]   ;;  %2657 = vmatprep.subr.bf16.mxu0 %v6991_v22  ;;  %v7072_v22 = vld [vmem:[%s9595_s6 + $0x2e4] ss:$8 sps:$4 sm:$0xff]  }
 0x511   : > { %v2096_v27 = vmul.f32 %v2092_v23, %v7874_v7  ;;  %v2088_v28 = vpop.f32.mrb[11].mxu0  ;;  %v6932_v7 = vld [vmem:[%s9593_s4 + $0x200] ss:$8 sps:$4 sm:$0xff]   ;;  %2658 = vmatpush1.bf16.msra.mxu0 %v6989_v24 }
 0x512   : > { %v2097_v29 = vmul.f32 %v2093_v25, %v7876_v8  ;;  %v6937_v8 = vld [vmem:[%s9593_s4 + $0x214] ss:$8 sps:$4 sm:$0xff]   ;;  %v6994_v25 = vld [vmem:[%s9594_s5 + $0x244] ss:$8 sps:$4 sm:$0xff]   ;;  %v6992_v26 = vld [vmem:[%s9594_s5 + $0x240] ss:$8 sps:$4 sm:$0xff]  }
 0x513   : > { %v2098_v30 = vpack.c.bf16 %v2096_v27, %v2096_v27  ;;  %2659 = vmatprep.subr.bf16.mxu0 %v6994_v25  ;;  %v6997_v27 = vld [vmem:[%s9594_s5 + $0x254] ss:$8 sps:$4 sm:$0xff]   ;;  %v6995_v28 = vld [vmem:[%s9594_s5 + $0x250] ss:$8 sps:$4 sm:$0xff]  }
 0x514   : > { %v2099_v31 = vpack.c.bf16 %v2097_v29, %v2097_v29  ;;  %v7000_v29 = vld [vmem:[%s9594_s5 + $0x264] ss:$8 sps:$4 sm:$0xff]  }
 0x515   : > { %v2105_v11 = vrot.slane %v2098_v30, 2  ;;  %2660 = vmatpush1.bf16.msra.mxu0 %v6992_v26  ;;  %v6998_v30 = vld [vmem:[%s9594_s5 + $0x260] ss:$8 sps:$4 sm:$0xff]  }
 0x516   : > { %v2106_v32 = vrot.slane %v2099_v31, 2  ;;  %v8419_v14 = vpop.f32.mrb[12].mxu0  ;;  %2661 = vmatprep.subr.bf16.mxu0 %v6997_v27  ;;  %v7003_v31 = vld [vmem:[%s9594_s5 + $0x274] ss:$8 sps:$4 sm:$0xff]  }
 0x517   : > { %v2111_v34 = vsel %vm592_vm1, %v2105_v11, 0  ;;  %v8421_v50 = vpop.f32.mrb[13].mxu0  ;;  %v7001_v11 = vld [vmem:[%s9594_s5 + $0x270] ss:$8 sps:$4 sm:$0xff]  }
 0x518   : > { %5857 = vmatprep.subr.msk.bf16.mxu1 %vm592_vm1, %v2106_v32  ;;  %v2204_v15 = vpop.f32.mrb[14].mxu0  ;;  %v7006_v32 = vld [vmem:[%s9594_s5 + $0x284] ss:$8 sps:$4 sm:$0xff]  }
 0x519   : > { %2117 = vmatpush1.bf16.msra.mxu1 %v2111_v34  ;;  %v2205_v23 = vpop.f32.mrb[15].mxu0  ;;  %2662 = vmatpush1.bf16.msra.mxu0 %v6995_v28  ;;  %v7009_v34 = vld [vmem:[%s9594_s5 + $0x294] ss:$8 sps:$4 sm:$0xff]   ;;  %v7058_v15 = vld [vmem:[%s9595_s6 + $0x2a0] ss:$8 sps:$4 sm:$0xff]  }
 0x51a   : > { %2402 = vmatprep.subr.bf16.mxu1 %v6934_v33  ;;  %2663 = vmatprep.subr.bf16.mxu0 %v7000_v29  ;;  %v7004_v33 = vld [vmem:[%s9594_s5 + $0x280] ss:$8 sps:$4 sm:$0xff]  }
 0x51b   : > { %v7070_v23 = vld [vmem:[%s9595_s6 + $0x2e0] ss:$8 sps:$4 sm:$0xff]  }
 0x51c   : > { %5858 = vmatmul.mubr.msk.bf16.vlgmr.msra.gmra.mrb[16].mxu1 %vm588_vm2, %v2102_v35  ;;  %v7007_v35 = vld [vmem:[%s9594_s5 + $0x290] ss:$8 sps:$4 sm:$0xff]  }
 0x51d   : > { %2403 = vmatpush1.bf16.msra.mxu1 %v6932_v7  ;;  %2434 = vmatprep.mubr.bf16.mxu1 %v2241_v36  ;;  %v7012_v7 = vld [vmem:[%s9594_s5 + $0x2a4] ss:$8 sps:$4 sm:$0xff]   ;;  %v7015_v36 = vld [vmem:[%s9594_s5 + $0x2b4] ss:$8 sps:$4 sm:$0xff]  }
 0x51e   : > { %2404 = vmatprep.subr.bf16.mxu1 %v6937_v8  ;;  %2664 = vmatpush1.bf16.msra.mxu0 %v6998_v30  ;;  %v7010_v8 = vld [vmem:[%s9594_s5 + $0x2a0] ss:$8 sps:$4 sm:$0xff]  }
 0x51f   : > { %2665 = vmatprep.subr.bf16.mxu0 %v7003_v31 }
 0x521   : > { %2405 = vmatpush1.bf16.msra.mxu1 %v6935_v37  ;;  %v7013_v37 = vld [vmem:[%s9594_s5 + $0x2b0] ss:$8 sps:$4 sm:$0xff]  }
 0x522   : > { %2406 = vmatprep.subr.bf16.mxu1 %v6940_v38  ;;  %2666 = vmatpush1.bf16.msra.mxu0 %v7001_v11  ;;  %v7018_v38 = vld [vmem:[%s9594_s5 + $0x2c4] ss:$8 sps:$4 sm:$0xff]  }
 0x523   : > { %2667 = vmatprep.subr.bf16.mxu0 %v7006_v32 }
 0x525   : > { %2407 = vmatpush1.bf16.msra.mxu1 %v6938_v39  ;;  %v7016_v39 = vld [vmem:[%s9594_s5 + $0x2c0] ss:$8 sps:$4 sm:$0xff]  }
 0x526   : > { %2408 = vmatprep.subr.bf16.mxu1 %v6943_v40  ;;  %2668 = vmatpush1.bf16.msra.mxu0 %v7004_v33  ;;  %v7021_v40 = vld [vmem:[%s9594_s5 + $0x2d4] ss:$8 sps:$4 sm:$0xff]  }
 0x527   : > { %2669 = vmatprep.subr.bf16.mxu0 %v7009_v34 }
 0x529   : > { %2409 = vmatpush1.bf16.msra.mxu1 %v6941_v41  ;;  %v7019_v41 = vld [vmem:[%s9594_s5 + $0x2d0] ss:$8 sps:$4 sm:$0xff]  }
 0x52a   : > { %2410 = vmatprep.subr.bf16.mxu1 %v6946_v42  ;;  %2670 = vmatpush1.bf16.msra.mxu0 %v7007_v35  ;;  %v7024_v42 = vld [vmem:[%s9594_s5 + $0x2e4] ss:$8 sps:$4 sm:$0xff]  }
 0x52b   : > { %2671 = vmatprep.subr.bf16.mxu0 %v7012_v7  ;;  %v5957_v35 = vld [vmem:[%s9596_s7 + $0x4] sm:$0x3] }
 0x52c   : > { %v2484_v7 = vrot.slane %v5957_v35, %v8177_v59  ;;  %v8634_v59 = vld [vmem:[%s9602_s13 + $0x8] sm:$0xff] }
 0x52d   : > { %2411 = vmatpush1.bf16.msra.mxu1 %v6944_v43  ;;  %v7022_v43 = vld [vmem:[%s9594_s5 + $0x2e0] ss:$8 sps:$4 sm:$0xff]   ;;  %3385 = vperm.xlu1 %6628, %v8634_v59  }
 0x52e   : > { %2412 = vmatprep.subr.bf16.mxu1 %v6949_v44  ;;  %2672 = vmatpush1.bf16.msra.mxu0 %v7010_v8  ;;  %v7027_v44 = vld [vmem:[%s9594_s5 + $0x2f4] ss:$8 sps:$4 sm:$0xff]   ;;  %v2488_v8 = vrot.slane %v5957_v35, %v8183_v61 }
 0x52f   : > { %2673 = vmatprep.subr.bf16.mxu0 %v7015_v36 }
 0x531   : > { %2413 = vmatpush1.bf16.msra.mxu1 %v6947_v45  ;;  %v7025_v45 = vld [vmem:[%s9594_s5 + $0x2f0] ss:$8 sps:$4 sm:$0xff]  }
 0x532   : > { %2414 = vmatprep.subr.bf16.mxu1 %v6952_v46  ;;  %2674 = vmatpush1.bf16.msra.mxu0 %v7013_v37  ;;  %v7028_v46 = vld [vmem:[%s9595_s6 + $0x200] ss:$8 sps:$4 sm:$0xff]  }
 0x533   : > { %2675 = vmatprep.subr.bf16.mxu0 %v7018_v38 }
 0x535   : > { %2415 = vmatpush1.bf16.msra.mxu1 %v6950_v47  ;;  %v7030_v47 = vld [vmem:[%s9595_s6 + $0x204] ss:$8 sps:$4 sm:$0xff]  }
 0x536   : > { %2416 = vmatprep.subr.bf16.mxu1 %v6955_v48  ;;  %2676 = vmatpush1.bf16.msra.mxu0 %v7016_v39  ;;  %v7033_v48 = vld [vmem:[%s9595_s6 + $0x214] ss:$8 sps:$4 sm:$0xff]  }
 0x537   : > { %2677 = vmatprep.subr.bf16.mxu0 %v7021_v40 }
 0x539   : > { %2417 = vmatpush1.bf16.msra.mxu1 %v6953_v49  ;;  %v7031_v49 = vld [vmem:[%s9595_s6 + $0x210] ss:$8 sps:$4 sm:$0xff]  }
 0x53a   : > { %2418 = vmatprep.subr.bf16.mxu1 %v6958_v51  ;;  %2678 = vmatpush1.bf16.msra.mxu0 %v7019_v41  ;;  %v7036_v51 = vld [vmem:[%s9595_s6 + $0x224] ss:$8 sps:$4 sm:$0xff]  }
 0x53b   : > { %2679 = vmatprep.subr.bf16.mxu0 %v7024_v42 }
 0x53d   : > { %2419 = vmatpush1.bf16.msra.mxu1 %v6956_v52  ;;  %v7034_v52 = vld [vmem:[%s9595_s6 + $0x220] ss:$8 sps:$4 sm:$0xff]  }
 0x53e   : > { %2420 = vmatprep.subr.bf16.mxu1 %v6961_v53  ;;  %2680 = vmatpush1.bf16.msra.mxu0 %v7022_v43  ;;  %v7039_v53 = vld [vmem:[%s9595_s6 + $0x234] ss:$8 sps:$4 sm:$0xff]  }
 0x53f   : > { %2681 = vmatprep.subr.bf16.mxu0 %v7027_v44 }
 0x541   : > { %2421 = vmatpush1.bf16.msra.mxu1 %v6959_v54  ;;  %v7037_v54 = vld [vmem:[%s9595_s6 + $0x230] ss:$8 sps:$4 sm:$0xff]  }
 0x542   : > { %2422 = vmatprep.subr.bf16.mxu1 %v6964_v55  ;;  %2682 = vmatpush1.bf16.msra.mxu0 %v7025_v45  ;;  %v7042_v55 = vld [vmem:[%s9595_s6 + $0x244] ss:$8 sps:$4 sm:$0xff]  }
 0x545   : > { %2423 = vmatpush1.bf16.msra.mxu1 %v6962_v56  ;;  %v7040_v56 = vld [vmem:[%s9595_s6 + $0x240] ss:$8 sps:$4 sm:$0xff]  }
 0x546   : > { %2424 = vmatprep.subr.bf16.mxu1 %v6967_v58  ;;  %v7045_v58 = vld [vmem:[%s9595_s6 + $0x254] ss:$8 sps:$4 sm:$0xff]  }
 0x549   : > { %2425 = vmatpush1.bf16.msra.mxu1 %v6965_v60  ;;  %v7043_v60 = vld [vmem:[%s9595_s6 + $0x250] ss:$8 sps:$4 sm:$0xff]  }
 0x54a   : > { %2426 = vmatprep.subr.bf16.mxu1 %v6970_v62  ;;  %v7048_v62 = vld [vmem:[%s9595_s6 + $0x264] ss:$8 sps:$4 sm:$0xff]  }
 0x54d   : > { %2427 = vmatpush1.bf16.msra.mxu1 %v6968_v63  ;;  %v7046_v63 = vld [vmem:[%s9595_s6 + $0x260] ss:$8 sps:$4 sm:$0xff]  }
 0x54e   : > { %2428 = vmatprep.subr.bf16.mxu1 %v6973_v0  ;;  %v7051_v0 = vld [vmem:[%s9595_s6 + $0x274] ss:$8 sps:$4 sm:$0xff]  }
 0x551   : > { %2429 = vmatpush1.bf16.msra.mxu1 %v6971_v2  ;;  %v7049_v2 = vld [vmem:[%s9595_s6 + $0x270] ss:$8 sps:$4 sm:$0xff]  }
 0x552   : > { %2430 = vmatprep.subr.bf16.mxu1 %v6976_v3  ;;  %v7054_v3 = vld [vmem:[%s9595_s6 + $0x284] ss:$8 sps:$4 sm:$0xff]  }
 0x555   : > { %2431 = vmatpush1.bf16.msra.mxu1 %v6974_v4  ;;  %v7052_v4 = vld [vmem:[%s9595_s6 + $0x280] ss:$8 sps:$4 sm:$0xff]  }
 0x556   : > { %2432 = vmatprep.subr.bf16.mxu1 %v6979_v5  ;;  %v7057_v5 = vld [vmem:[%s9595_s6 + $0x294] ss:$8 sps:$4 sm:$0xff]  }
 0x559   : > { %2433 = vmatpush1.bf16.msra.mxu1 %v6977_v9  ;;  %v7055_v9 = vld [vmem:[%s9595_s6 + $0x290] ss:$8 sps:$4 sm:$0xff]  }
 0x55a   : > { %2887 = vmatprep.subr.bf16.mxu1 %v7030_v47 }
 0x55c   : > { %2435 = vmatmul.mubr.bf16.vlgmr.msra.gmra.mrb[20].mxu1 %v2240_v13  ;;  %v7060_v13 = vld [vmem:[%s9595_s6 + $0x2a4] ss:$8 sps:$4 sm:$0xff]  }
 0x55d   : > { %2888 = vmatpush1.bf16.msra.mxu1 %v7028_v46 }
 0x55e   : > { %2889 = vmatprep.subr.bf16.mxu1 %v7033_v48 }
 0x561   : > { %2890 = vmatpush1.bf16.msra.mxu1 %v7031_v49 }
 0x562   : > { %2891 = vmatprep.subr.bf16.mxu1 %v7036_v51 }
 0x565   : > { %2892 = vmatpush1.bf16.msra.mxu1 %v7034_v52 }
 0x566   : > { %2893 = vmatprep.subr.bf16.mxu1 %v7039_v53  ;;  %v2933_v53 = vpop.permute.xlu1 %2932 }
 0x569   : > { %2894 = vmatpush1.bf16.msra.mxu1 %v7037_v54  ;;  %v7087_v54 = vld [vmem:[%s9601_s12 + $0x114] ss:$8 sps:$4 sm:$0xff]  }
 0x56a   : > { %2895 = vmatprep.subr.bf16.mxu1 %v7042_v55  ;;  %v7085_v55 = vld [vmem:[%s9601_s12 + $0x110] ss:$8 sps:$4 sm:$0xff]  }
 0x56d   : > { %2896 = vmatpush1.bf16.msra.mxu1 %v7040_v56  ;;  %v7093_v56 = vld [vmem:[%s9601_s12 + $0x124] ss:$8 sps:$4 sm:$0xff]  }
 0x56e   : > { %2897 = vmatprep.subr.bf16.mxu1 %v7045_v58  ;;  %v7091_v58 = vld [vmem:[%s9601_s12 + $0x120] ss:$8 sps:$4 sm:$0xff]  }
 0x571   : > { %2898 = vmatpush1.bf16.msra.mxu1 %v7043_v60  ;;  %v7099_v60 = vld [vmem:[%s9601_s12 + $0x134] ss:$8 sps:$4 sm:$0xff]  }
 0x572   : > { %2899 = vmatprep.subr.bf16.mxu1 %v7048_v62  ;;  %v7097_v62 = vld [vmem:[%s9601_s12 + $0x130] ss:$8 sps:$4 sm:$0xff]  }
 0x575   : > { %2900 = vmatpush1.bf16.msra.mxu1 %v7046_v63  ;;  %v7105_v63 = vld [vmem:[%s9601_s12 + $0x144] ss:$8 sps:$4 sm:$0xff]  }
 0x576   : > { %2901 = vmatprep.subr.bf16.mxu1 %v7051_v0  ;;  %v7103_v0 = vld [vmem:[%s9601_s12 + $0x140] ss:$8 sps:$4 sm:$0xff]  }
 0x579   : > { %2902 = vmatpush1.bf16.msra.mxu1 %v7049_v2  ;;  %v7111_v2 = vld [vmem:[%s9601_s12 + $0x154] ss:$8 sps:$4 sm:$0xff]  }
 0x57a   : > { %2903 = vmatprep.subr.bf16.mxu1 %v7054_v3  ;;  %v7109_v3 = vld [vmem:[%s9601_s12 + $0x150] ss:$8 sps:$4 sm:$0xff]  }
 0x57d   : > { %2904 = vmatpush1.bf16.msra.mxu1 %v7052_v4  ;;  %v7117_v4 = vld [vmem:[%s9601_s12 + $0x164] ss:$8 sps:$4 sm:$0xff]  }
 0x57e   : > { %2905 = vmatprep.subr.bf16.mxu1 %v7057_v5  ;;  %v7115_v5 = vld [vmem:[%s9601_s12 + $0x160] ss:$8 sps:$4 sm:$0xff]  }
 0x581   : > { %2906 = vmatpush1.bf16.msra.mxu1 %v7055_v9  ;;  %v7123_v9 = vld [vmem:[%s9601_s12 + $0x174] ss:$8 sps:$4 sm:$0xff]  }
 0x582   : > { %2907 = vmatprep.subr.bf16.mxu1 %v7060_v13  ;;  %v7121_v13 = vld [vmem:[%s9601_s12 + $0x170] ss:$8 sps:$4 sm:$0xff]  }
 0x585   : > { %2908 = vmatpush1.bf16.msra.mxu1 %v7058_v15  ;;  %v7129_v15 = vld [vmem:[%s9601_s12 + $0x184] ss:$8 sps:$4 sm:$0xff]  }
 0x586   : > { %2909 = vmatprep.subr.bf16.mxu1 %v7063_v16  ;;  %v7127_v16 = vld [vmem:[%s9601_s12 + $0x180] ss:$8 sps:$4 sm:$0xff]  }
 0x589   : > { %2910 = vmatpush1.bf16.msra.mxu1 %v7061_v17 }
 0x58a   : > { %2911 = vmatprep.subr.bf16.mxu1 %v7066_v18 }
 0x58d   : > { %2912 = vmatpush1.bf16.msra.mxu1 %v7064_v19 }
 0x58e   : > { %2913 = vmatprep.subr.bf16.mxu1 %v7069_v20 }
 0x591   : > { %2914 = vmatpush1.bf16.msra.mxu1 %v7067_v21 }
 0x592   : > { %2915 = vmatprep.subr.bf16.mxu1 %v7072_v22  ;;  %v7532_v22 = vld [vmem:[%s7666_s16] sm:$0xff]  ;;  %s494_s16 = scalar_lea.vmem %s9604_s15, %s6605_s28 }
 0x595   : > { %2916 = vmatpush1.bf16.msra.mxu1 %v7070_v23 }
 0x5ef   : > { %v2150_v24 = vpop.f32.mrb[16].mxu1 }
 0x5f0   : > { %v8610_v25 = vadd.f32 %v8419_v14, %v2150_v24  ;;  %v2152_v26 = vpop.f32.mrb[17].mxu1  ;;  %v7075_v14 = vld [vmem:[%s9595_s6 + $0x2f4] ss:$8 sps:$4 sm:$0xff]  }
 0x5f1   : > { %v8613_v27 = vadd.f32 %v8421_v50, %v2152_v26  ;;  %v2154_v28 = vpop.f32.mrb[18].mxu1  ;;  %v7073_v50 = vld [vmem:[%s9595_s6 + $0x2f0] ss:$8 sps:$4 sm:$0xff]   ;;  %2917 = vmatprep.subr.bf16.mxu1 %v7075_v14 }
 0x5f2   : > { %v2155_v29 = vpop.f32.mrb[19].mxu1  ;;  %2918 = vmatpush1.bf16.msra.mxu1 %v7073_v50 }
 0x62f   : > { %v2436_v30 = vpop.f32.mrb[20].mxu1 }
 0x630   : > { %v2438_v31 = vpop.f32.mrb[21].mxu1  ;;  %v2476_v33 = vpack.c.bf16 %v2436_v30, %v2436_v30 }
 0x631   : > { %v2477_v11 = vpack.c.bf16 %v2438_v31, %v2438_v31  ;;  %v2440_v32 = vpop.f32.mrb[22].mxu1 }
 0x632   : > { %v2441_v34 = vpop.f32.mrb[23].mxu1 }
 0x633   : > { %2683 = vmatprep.mubr.bf16.mxu0 %v2477_v11 }
 0x634   : > { %2684 = vmatmul.mubr.bf16.vlgmr.msra.gmra.mrb[16].mxu0 %v2476_v33 }
 0x635   : > { %2975 = vmatprep.mubr.bf16.mxu0 %v7543_v1 }
 0x707   : > { %v2685_v36 = vpop.f32.mrb[16].mxu0 }
 0x708   : > { %v2686_v37 = vadd.f32 %v2685_v36, %v2484_v7  ;;  %v2687_v38 = vpop.f32.mrb[17].mxu0 }
 0x709   : > { %v2688_v39 = vadd.f32 %v2687_v38, %v2488_v8  ;;  %v2689_v40 = vpop.f32.mrb[18].mxu0 }
 0x70a   : > { %v2690_v41 = vpop.f32.mrb[19].mxu0  ;;  %v2725_v43 = vpack.c.bf16 %v2686_v37, %v2686_v37 }
 0x70b   : > { %v2726_v42 = vpack.c.bf16 %v2688_v39, %v2688_v39 }
 0x70d   : > { %2919 = vmatprep.mubr.bf16.mxu1 %v2726_v42 }
 0x70e   : > { %2920 = vmatmul.mubr.bf16.vlgmr.msra.gmra.mrb[24].mxu1 %v2725_v43 }
 0x7e1   : > { %v2921_v61 = vpop.f32.mrb[24].mxu1 }
 0x7e2   : > { %v2928_v44 = vmul.f32 %v2921_v61, %v7882_v10  ;;  %v2923_v45 = vpop.f32.mrb[25].mxu1  ;;  %v7079_v10 = vld [vmem:[%s9601_s12 + $0x100] ss:$8 sps:$4 sm:$0xff]  }
 0x7e3   : > { %v2929_v46 = vmul.f32 %v2923_v45, %v7888_v12  ;;  %v2925_v47 = vpop.f32.mrb[26].mxu1  ;;  %v7081_v12 = vld [vmem:[%s9601_s12 + $0x104] ss:$8 sps:$4 sm:$0xff]  }
 0x7e4   : > { %v2930_v48 = vpack.c.bf16 %v2928_v44, %v2928_v44  ;;  %v2926_v49 = vpop.f32.mrb[27].mxu1  ;;  %3589 = vmatprep.subr.bf16.mxu1 %v7081_v12 }
 0x7e5   : > { %v2931_v51 = vpack.c.bf16 %v2929_v46, %v2929_v46  ;;  %3590 = vmatpush1.bf16.msra.mxu1 %v7079_v10 }
 0x7e6   : > { %v2938_v52 = vsel %vm592_vm1, %v2930_v48, 0  ;;  %3591 = vmatprep.subr.bf16.mxu1 %v7087_v54 }
 0x7e7   : > { %6054 = vmatprep.subr.msk.bf16.mxu0 %vm592_vm1, %v2931_v51 }
 0x7e8   : > { %2944 = vmatpush1.bf16.msra.mxu0 %v2938_v52 }
 0x7e9   : > { %3592 = vmatpush1.bf16.msra.mxu1 %v7085_v55 }
 0x7ea   : > { %3593 = vmatprep.subr.bf16.mxu1 %v7093_v56 }
 0x7eb   : > { %6055 = vmatmul.mubr.msk.bf16.vlgmr.msra.gmra.mrb[20].mxu0 %vm588_vm2, %v2933_v53 }
 0x7ec   : > { %3092 = vmatprep.mubr.bf16.mxu0 %v7543_v1 }
 0x7ed   : > { %3594 = vmatpush1.bf16.msra.mxu1 %v7091_v58 }
 0x7ee   : > { %3595 = vmatprep.subr.bf16.mxu1 %v7099_v60  ;;  %v3036_v60 = vpop.permute.xlu0 %3035 }
 0x7f1   : > { %3596 = vmatpush1.bf16.msra.mxu1 %v7097_v62 }
 0x7f2   : > { %3597 = vmatprep.subr.bf16.mxu1 %v7105_v63 }
 0x7f5   : > { %3598 = vmatpush1.bf16.msra.mxu1 %v7103_v0  ;;  %v3044_v0 = vpop.permute.xlu1 %3043 }
 0x7f6   : > { %3599 = vmatprep.subr.bf16.mxu1 %v7111_v2 }
 0x7f9   : > { %3600 = vmatpush1.bf16.msra.mxu1 %v7109_v3 }
 0x7fa   : > { %3601 = vmatprep.subr.bf16.mxu1 %v7117_v4 }
 0x7fd   : > { %3602 = vmatpush1.bf16.msra.mxu1 %v7115_v5 }
 0x7fe   : > { %3603 = vmatprep.subr.bf16.mxu1 %v7123_v9  ;;  %v2988_v9 = vld [vmem:[%s9600_s11] sm:$0xff] }
 0x801   : > { %3604 = vmatpush1.bf16.msra.mxu1 %v7121_v13  ;;  %v2989_v13 = vld [vmem:[%s9600_s11 + $0x8] sm:$0xff] }
 0x802   : > { %3605 = vmatprep.subr.bf16.mxu1 %v7129_v15 }
 0x805   : > { %3606 = vmatpush1.bf16.msra.mxu1 %v7127_v16  ;;  %v7078_v16 = vld [vmem:[%s9601_s12 + $0x4] ss:$8 sps:$4 sm:$0xff]  }
 0x8be   : > { %v2977_v17 = vpop.f32.mrb[20].mxu0 }
 0x8bf   : > { %v2984_v18 = vadd.f32 %v2977_v17, %v8610_v25  ;;  %v2979_v19 = vpop.f32.mrb[21].mxu0 }
 0x8c0   : > { %v2985_v20 = vadd.f32 %v2979_v19, %v8613_v27  ;;  %v2981_v21 = vpop.f32.mrb[22].mxu0  ;;  %v7076_v19 = vld [vmem:[%s9601_s12] ss:$8 sps:$4 sm:$0xff]  }
 0x8c1   : > { %v8700_v23 = vadd.f32 %v7532_v22, %v2984_v18  ;;  %v2982_v24 = vpop.f32.mrb[23].mxu0  ;;  %v3048_v18 = vpack.c.bf16 %v2989_v13, %v2988_v9  ;;  %v7082_v21 = vld [vmem:[%s9601_s12 + $0x10] ss:$8 sps:$4 sm:$0xff]   ;;  %v7090_v22 = vld [vmem:[%s9601_s12 + $0x24] ss:$8 sps:$4 sm:$0xff]  }
 0x8c2   : > { %v8703_v26 = vadd.f32 %v2985_v20, %v7669_v6  ;;  %v7084_v20 = vld [vmem:[%s9601_s12 + $0x14] ss:$8 sps:$4 sm:$0xff]   ;;  %v7088_v24 = vld [vmem:[%s9601_s12 + $0x20] ss:$8 sps:$4 sm:$0xff]  }
 0x8c3   : > { %v2990_v28 = vsel %vm502_vm0, %v8700_v23, 0.0 }
 0x8c4   : > { %v2991_v29 = vrot.slane %v2990_v28, 4  ;;  %v2997_v30 = vsel %vm502_vm0, %v8703_v26, 0.0 }
 0x8c5   : > { %v2998_v31 = vrot.slane %v2997_v30, 4 }
 0x8c6   : > { %v2992_v25 = vadd.f32 %v2991_v29, %v2990_v28  ;;  %v7096_v28 = vld [vmem:[%s9601_s12 + $0x34] ss:$8 sps:$4 sm:$0xff]   ;;  %v7094_v29 = vld [vmem:[%s9601_s12 + $0x30] ss:$8 sps:$4 sm:$0xff]  }
 0x8c7   : > { %v2999_v11 = vadd.f32 %v2998_v31, %v2997_v30  ;;  %v7102_v30 = vld [vmem:[%s9601_s12 + $0x44] ss:$8 sps:$4 sm:$0xff]   ;;  %v7100_v31 = vld [vmem:[%s9601_s12 + $0x40] ss:$8 sps:$4 sm:$0xff]  }
 0x8c8   : > { %v2993_v32 = vrot.slane %v2992_v25, 2 }
 0x8c9   : > { %v3000_v27 = vrot.slane %v2999_v11, 2 }
 0x8ca   : > { %v2994_v33 = vadd.f32 %v2993_v32, %v2992_v25  ;;  %v7108_v25 = vld [vmem:[%s9601_s12 + $0x54] ss:$8 sps:$4 sm:$0xff]   ;;  %v7114_v32 = vld [vmem:[%s9601_s12 + $0x64] ss:$8 sps:$4 sm:$0xff]  }
 0x8cb   : > { %v3001_v34 = vadd.f32 %v3000_v27, %v2999_v11  ;;  %v7106_v11 = vld [vmem:[%s9601_s12 + $0x50] ss:$8 sps:$4 sm:$0xff]   ;;  %v7112_v27 = vld [vmem:[%s9601_s12 + $0x60] ss:$8 sps:$4 sm:$0xff]  }
 0x8cc   : > { %v2995_v14 = vrot.slane %v2994_v33, 1 }
 0x8cd   : > { %v3002_v50 = vrot.slane %v3001_v34, 1 }
 0x8ce   : > { %v2996_v35 = vadd.f32 %v2995_v14, %v2994_v33  ;;  %v7120_v33 = vld [vmem:[%s9601_s12 + $0x74] ss:$8 sps:$4 sm:$0xff]   ;;  %v7126_v14 = vld [vmem:[%s9601_s12 + $0x84] ss:$8 sps:$4 sm:$0xff]  }
 0x8cf   : > { %v3003_v7 = vadd.f32 %v3002_v50, %v3001_v34  ;;  %v7118_v34 = vld [vmem:[%s9601_s12 + $0x70] ss:$8 sps:$4 sm:$0xff]   ;;  %v7124_v50 = vld [vmem:[%s9601_s12 + $0x80] ss:$8 sps:$4 sm:$0xff]  }
 0x8d0   : > { %v3004_v6 = vmul.f32 0.25, %v2996_v35  ;;  %v7132_v35 = vld [vmem:[%s9601_s12 + $0x94] ss:$8 sps:$4 sm:$0xff]  }
 0x8d1   : > { %v3005_v8 = vmul.f32 0.25, %v3003_v7  ;;  %v7135_v7 = vld [vmem:[%s9601_s12 + $0x194] ss:$8 sps:$4 sm:$0xff]  }
 0x8d2   : > { %v3006_v36 = vsub.f32 %v8700_v23, %v3004_v6  ;;  %v7130_v6 = vld [vmem:[%s9601_s12 + $0x90] ss:$8 sps:$4 sm:$0xff]   ;;  %3607 = vmatprep.subr.bf16.mxu1 %v7135_v7 }
 0x8d3   : > { %v3007_v37 = vsub.f32 %v8703_v26, %v3005_v8  ;;  %v7133_v8 = vld [vmem:[%s9601_s12 + $0x190] ss:$8 sps:$4 sm:$0xff]  }
 0x8d4   : > { %v3008_v38 = vmul.f32 %v3006_v36, %v3006_v36  ;;  %3608 = vmatpush1.bf16.msra.mxu1 %v7133_v8 }
 0x8d5   : > { %v3009_v39 = vmul.f32 %v3007_v37, %v3007_v37 }
 0x8d6   : > { %v3010_v40 = vsel %vm502_vm0, %v3008_v38, 0.0  ;;  %v7136_v38 = vld [vmem:[%s9601_s12 + $0xa0] ss:$8 sps:$4 sm:$0xff]  }
 0x8d7   : > { %v3011_v41 = vrot.slane %v3010_v40, 4  ;;  %v3017_v42 = vsel %vm502_vm0, %v3009_v39, 0.0  ;;  %v7139_v39 = vld [vmem:[%s9601_s12 + $0x1a0] ss:$8 sps:$4 sm:$0xff]  }
 0x8d8   : > { %v3018_v43 = vrot.slane %v3017_v42, 4 }
 0x8d9   : > { %v3012_v57 = vadd.f32 %v3011_v41, %v3010_v40  ;;  %v7144_v40 = vld [vmem:[%s9601_s12 + $0xb4] ss:$8 sps:$4 sm:$0xff]  }
 0x8da   : > { %v3019_v61 = vadd.f32 %v3018_v43, %v3017_v42  ;;  %v7147_v41 = vld [vmem:[%s9601_s12 + $0x1b4] ss:$8 sps:$4 sm:$0xff]   ;;  %v7142_v42 = vld [vmem:[%s9601_s12 + $0xb0] ss:$8 sps:$4 sm:$0xff]  }
 0x8db   : > { %v3013_v44 = vrot.slane %v3012_v57, 2  ;;  %v7145_v43 = vld [vmem:[%s9601_s12 + $0x1b0] ss:$8 sps:$4 sm:$0xff]  }
 0x8dc   : > { %v3020_v45 = vrot.slane %v3019_v61, 2 }
 0x8dd   : > { %v3014_v46 = vadd.f32 %v3013_v44, %v3012_v57  ;;  %v7150_v57 = vld [vmem:[%s9601_s12 + $0xc4] ss:$8 sps:$4 sm:$0xff]   ;;  %v7148_v44 = vld [vmem:[%s9601_s12 + $0xc0] ss:$8 sps:$4 sm:$0xff]  }
 0x8de   : > { %v3021_v47 = vadd.f32 %v3020_v45, %v3019_v61  ;;  %v7153_v61 = vld [vmem:[%s9601_s12 + $0x1c4] ss:$8 sps:$4 sm:$0xff]   ;;  %v7151_v45 = vld [vmem:[%s9601_s12 + $0x1c0] ss:$8 sps:$4 sm:$0xff]  }
 0x8df   : > { %v3015_v48 = vrot.slane %v3014_v46, 1 }
 0x8e0   : > { %v3022_v49 = vrot.slane %v3021_v47, 1 }
 0x8e1   : > { %v3016_v51 = vadd.f32 %v3015_v48, %v3014_v46  ;;  %v7156_v46 = vld [vmem:[%s9601_s12 + $0xd4] ss:$8 sps:$4 sm:$0xff]   ;;  %v7154_v48 = vld [vmem:[%s9601_s12 + $0xd0] ss:$8 sps:$4 sm:$0xff]  }
 0x8e2   : > { %v3023_v52 = vadd.f32 %v3022_v49, %v3021_v47  ;;  %v7159_v47 = vld [vmem:[%s9601_s12 + $0x1d4] ss:$8 sps:$4 sm:$0xff]   ;;  %v7157_v49 = vld [vmem:[%s9601_s12 + $0x1d0] ss:$8 sps:$4 sm:$0xff]  }
 0x8e3   : > { %v3024_v53 = vmul.f32 0.25, %v3016_v51  ;;  %v7162_v51 = vld [vmem:[%s9601_s12 + $0xe4] ss:$8 sps:$4 sm:$0xff]  }
 0x8e4   : > { %v3025_v10 = vmul.f32 0.25, %v3023_v52  ;;  %v7165_v52 = vld [vmem:[%s9601_s12 + $0x1e4] ss:$8 sps:$4 sm:$0xff]  }
 0x8e5   : > { %v3026_v12 = vadd.f32 1e-06, %v3024_v53  ;;  %v7160_v53 = vld [vmem:[%s9601_s12 + $0xe0] ss:$8 sps:$4 sm:$0xff]  }
 0x8e6   : > { %v3027_v54 = vadd.f32 1e-06, %v3025_v10  ;;  %v7163_v10 = vld [vmem:[%s9601_s12 + $0x1e0] ss:$8 sps:$4 sm:$0xff]  }
 0x8e7   : > { %7512 = vrsqrt.f32 %v3026_v12  ;;  %v7168_v12 = vld [vmem:[%s9601_s12 + $0xf4] ss:$8 sps:$4 sm:$0xff]  }
 0x8e8   : > { %7514 = vrsqrt.f32 %v3027_v54  ;;  %v7171_v54 = vld [vmem:[%s9601_s12 + $0x1f4] ss:$8 sps:$4 sm:$0xff]  }
 0x8f1   : > { %v7513_v55 = vpop.eup %7512 }
 0x8f2   : > { %v7515_v56 = vpop.eup %7514  ;;  %v3030_v58 = vmul.f32 %v7513_v55, %v3006_v36  ;;  %v7138_v36 = vld [vmem:[%s9601_s12 + $0xa4] ss:$8 sps:$4 sm:$0xff]   ;;  %v7166_v55 = vld [vmem:[%s9601_s12 + $0xf0] ss:$8 sps:$4 sm:$0xff]  }
 0x8f3   : > { %v3031_v62 = vmul.f32 %v7515_v56, %v3007_v37  ;;  %v7141_v37 = vld [vmem:[%s9601_s12 + $0x1a4] ss:$8 sps:$4 sm:$0xff]   ;;  %v7169_v56 = vld [vmem:[%s9601_s12 + $0x1f0] ss:$8 sps:$4 sm:$0xff]  }
 0x8f4   : > { %v3038_v63 = vmul.f32 %v3036_v60, %v3030_v58  ;;  %3609 = vmatprep.subr.bf16.mxu1 %v7141_v37  ;;  %v7174_v58 = vld [vmem:[%s9601_s12 + $0x204] ss:$8 sps:$4 sm:$0xff]  }
 0x8f5   : > { %v3039_v2 = vmul.f32 %v3036_v60, %v3031_v62  ;;  %3610 = vmatpush1.bf16.msra.mxu1 %v7139_v39  ;;  %v7177_v60 = vld [vmem:[%s9601_s12 + $0x304] ss:$8 sps:$4 sm:$0xff]   ;;  %v7547_v62 = vmov 1  }
 0x8f6   : > { %v3046_v3 = vadd.f32 %v3044_v0, %v3038_v63  ;;  %3611 = vmatprep.subr.bf16.mxu1 %v7147_v41  ;;  %6629 = vset.pattern.permute.xlu0 %v7547_v62  ;;  %v8869_v63 = vld [vmem:[%s9602_s13] sm:$0xff] }
 0x8f7   : > { %v3047_v4 = vadd.f32 %v3044_v0, %v3039_v2  ;;  %6630 = vset.pattern.permute.xlu1 %v7547_v62  ;;  %3633 = vperm.xlu0 %6629, %v8869_v63   ;;  %v7548_v62 = vmov 2  }
 0x8f8   : > { %v3049_v5 = vpack.c.bf16 %v3046_v3, %v3046_v3  ;;  %3637 = vperm.xlu1 %6630, %v8634_v59  }
 0x8f9   : > { %v3050_v15 = vpack.c.bf16 %v3047_v4, %v3047_v4  ;;  %3612 = vmatpush1.bf16.msra.mxu1 %v7145_v43 }
 0x8fa   : > { %v3055_v17 = vsel %vm592_vm1, %v3049_v5, 0  ;;  %3613 = vmatprep.subr.bf16.mxu1 %v7153_v61 }
 0x8fb   : > { %6056 = vmatprep.subr.msk.bf16.mxu0 %vm592_vm1, %v3050_v15  ;;  %6632 = vset.pattern.permute.xlu0 %v7548_v62 }
 0x8fc   : > { %3061 = vmatpush1.bf16.msra.mxu0 %v3055_v17  ;;  %6631 = vset.pattern.permute.xlu1 %v7548_v62  ;;  %v7285_v62 = vld [vmem:[%s9601_s12 + $0x524] ss:$8 sps:$4 sm:$0xff]  }
 0x8fd   : > { %3335 = vmatprep.subr.bf16.mxu0 %v7078_v16  ;;  %3614 = vmatpush1.bf16.msra.mxu1 %v7151_v45  ;;  %v7175_v45 = vld [vmem:[%s9601_s12 + $0x300] ss:$8 sps:$4 sm:$0xff]  }
 0x8fe   : > { %3615 = vmatprep.subr.bf16.mxu1 %v7159_v47  ;;  %v7183_v47 = vld [vmem:[%s9601_s12 + $0x314] ss:$8 sps:$4 sm:$0xff]   ;;  %3885 = vperm.xlu1 %6631, %v8869_v63  }
 0x8ff   : > { %6057 = vmatmul.mubr.msk.bf16.vlgmr.msra.gmra.mrb[24].mxu0 %vm588_vm2, %v3048_v18  ;;  %3889 = vperm.xlu0 %6632, %v8634_v59  }
 0x900   : > { %3336 = vmatpush1.bf16.msra.mxu0 %v7076_v19 }
 0x901   : > { %3337 = vmatprep.subr.bf16.mxu0 %v7084_v20  ;;  %3616 = vmatpush1.bf16.msra.mxu1 %v7157_v49  ;;  %v7181_v49 = vld [vmem:[%s9601_s12 + $0x310] ss:$8 sps:$4 sm:$0xff]  }
 0x902   : > { %3617 = vmatprep.subr.bf16.mxu1 %v7165_v52  ;;  %v7189_v52 = vld [vmem:[%s9601_s12 + $0x324] ss:$8 sps:$4 sm:$0xff]  }
 0x904   : > { %3338 = vmatpush1.bf16.msra.mxu0 %v7082_v21 }
 0x905   : > { %3339 = vmatprep.subr.bf16.mxu0 %v7090_v22  ;;  %3618 = vmatpush1.bf16.msra.mxu1 %v7163_v10  ;;  %v7187_v10 = vld [vmem:[%s9601_s12 + $0x320] ss:$8 sps:$4 sm:$0xff]  }
 0x906   : > { %3619 = vmatprep.subr.bf16.mxu1 %v7171_v54  ;;  %v7195_v54 = vld [vmem:[%s9601_s12 + $0x334] ss:$8 sps:$4 sm:$0xff]  }
 0x908   : > { %3340 = vmatpush1.bf16.msra.mxu0 %v7088_v24 }
 0x909   : > { %3341 = vmatprep.subr.bf16.mxu0 %v7096_v28  ;;  %3620 = vmatpush1.bf16.msra.mxu1 %v7169_v56  ;;  %v7193_v56 = vld [vmem:[%s9601_s12 + $0x330] ss:$8 sps:$4 sm:$0xff]  }
 0x90a   : > { %4093 = vmatprep.subr.bf16.mxu1 %v7177_v60  ;;  %v7201_v60 = vld [vmem:[%s9601_s12 + $0x344] ss:$8 sps:$4 sm:$0xff]  }
 0x90c   : > { %3342 = vmatpush1.bf16.msra.mxu0 %v7094_v29 }
 0x90d   : > { %3343 = vmatprep.subr.bf16.mxu0 %v7102_v30 }
 0x910   : > { %3344 = vmatpush1.bf16.msra.mxu0 %v7100_v31 }
 0x911   : > { %3345 = vmatprep.subr.bf16.mxu0 %v7108_v25 }
 0x914   : > { %3346 = vmatpush1.bf16.msra.mxu0 %v7106_v11 }
 0x915   : > { %3347 = vmatprep.subr.bf16.mxu0 %v7114_v32 }
 0x918   : > { %3348 = vmatpush1.bf16.msra.mxu0 %v7112_v27 }
 0x919   : > { %3349 = vmatprep.subr.bf16.mxu0 %v7120_v33 }
 0x91c   : > { %3350 = vmatpush1.bf16.msra.mxu0 %v7118_v34 }
 0x91d   : > { %3351 = vmatprep.subr.bf16.mxu0 %v7126_v14 }
 0x920   : > { %3352 = vmatpush1.bf16.msra.mxu0 %v7124_v50 }
 0x921   : > { %3353 = vmatprep.subr.bf16.mxu0 %v7132_v35 }
 0x924   : > { %3354 = vmatpush1.bf16.msra.mxu0 %v7130_v6 }
 0x925   : > { %3355 = vmatprep.subr.bf16.mxu0 %v7138_v36 }
 0x928   : > { %3356 = vmatpush1.bf16.msra.mxu0 %v7136_v38 }
 0x929   : > { %3357 = vmatprep.subr.bf16.mxu0 %v7144_v40 }
 0x92c   : > { %3358 = vmatpush1.bf16.msra.mxu0 %v7142_v42 }
 0x92d   : > { %3359 = vmatprep.subr.bf16.mxu0 %v7150_v57 }
 0x930   : > { %3360 = vmatpush1.bf16.msra.mxu0 %v7148_v44  ;;  %v7172_v44 = vld [vmem:[%s9601_s12 + $0x200] ss:$8 sps:$4 sm:$0xff]  }
 0x931   : > { %3361 = vmatprep.subr.bf16.mxu0 %v7156_v46  ;;  %v7180_v46 = vld [vmem:[%s9601_s12 + $0x214] ss:$8 sps:$4 sm:$0xff]  }
 0x934   : > { %3362 = vmatpush1.bf16.msra.mxu0 %v7154_v48  ;;  %v7178_v48 = vld [vmem:[%s9601_s12 + $0x210] ss:$8 sps:$4 sm:$0xff]  }
 0x935   : > { %3363 = vmatprep.subr.bf16.mxu0 %v7162_v51  ;;  %v7186_v51 = vld [vmem:[%s9601_s12 + $0x224] ss:$8 sps:$4 sm:$0xff]  }
 0x938   : > { %3364 = vmatpush1.bf16.msra.mxu0 %v7160_v53  ;;  %v7184_v53 = vld [vmem:[%s9601_s12 + $0x220] ss:$8 sps:$4 sm:$0xff]  }
 0x939   : > { %3365 = vmatprep.subr.bf16.mxu0 %v7168_v12  ;;  %v7192_v12 = vld [vmem:[%s9601_s12 + $0x234] ss:$8 sps:$4 sm:$0xff]  }
 0x93c   : > { %3366 = vmatpush1.bf16.msra.mxu0 %v7166_v55  ;;  %v7190_v55 = vld [vmem:[%s9601_s12 + $0x230] ss:$8 sps:$4 sm:$0xff]  }
 0x93d   : > { %3841 = vmatprep.subr.bf16.mxu0 %v7174_v58  ;;  %v7198_v58 = vld [vmem:[%s9601_s12 + $0x244] ss:$8 sps:$4 sm:$0xff]  }
 0x9d2   : > { %v3094_v0 = vpop.f32.mrb[24].mxu0 }
 0x9d3   : > { %v3107_v2 = vmul.f32 0.044715, %v3094_v0  ;;  %v3096_v3 = vpop.f32.mrb[25].mxu0  ;;  %v3103_v6 = vmul.f32 0.5, %v3094_v0 }
 0x9d4   : > { %v3108_v4 = vmul.f32 0.044715, %v3096_v3  ;;  %v3098_v5 = vpop.f32.mrb[26].mxu0  ;;  %v3104_v37 = vmul.f32 0.5, %v3096_v3 }
 0x9d5   : > { %v3111_v9 = vmul.f32 %v3107_v2, %v3094_v0  ;;  %v3109_v13 = vmul.f32 0.044715, %v3098_v5  ;;  %v3100_v15 = vpop.f32.mrb[27].mxu0  ;;  %v3105_v8 = vmul.f32 0.5, %v3098_v5  ;;  %v7199_v2 = vld [vmem:[%s9601_s12 + $0x340] ss:$8 sps:$4 sm:$0xff]  }
 0x9d6   : > { %v3112_v16 = vmul.f32 %v3108_v4, %v3096_v3  ;;  %v3110_v17 = vmul.f32 0.044715, %v3100_v15  ;;  %v3106_v38 = vmul.f32 0.5, %v3100_v15  ;;  %v7207_v4 = vld [vmem:[%s9601_s12 + $0x354] ss:$8 sps:$4 sm:$0xff]  }
 0x9d7   : > { %v3115_v18 = vmul.f32 %v3111_v9, %v3094_v0  ;;  %v3113_v19 = vmul.f32 %v3109_v13, %v3098_v5  ;;  %v7202_v9 = vld [vmem:[%s9601_s12 + $0x250] ss:$8 sps:$4 sm:$0xff]  }
 0x9d8   : > { %v3116_v20 = vmul.f32 %v3112_v16, %v3096_v3  ;;  %v3114_v21 = vmul.f32 %v3110_v17, %v3100_v15  ;;  %v7205_v13 = vld [vmem:[%s9601_s12 + $0x350] ss:$8 sps:$4 sm:$0xff]   ;;  %v7213_v16 = vld [vmem:[%s9601_s12 + $0x364] ss:$8 sps:$4 sm:$0xff]   ;;  %v7208_v17 = vld [vmem:[%s9601_s12 + $0x260] ss:$8 sps:$4 sm:$0xff]  }
 0x9d9   : > { %v3119_v22 = vadd.f32 %v3115_v18, %v3094_v0  ;;  %v3117_v24 = vmul.f32 %v3113_v19, %v3098_v5  ;;  %v7196_v0 = vld [vmem:[%s9601_s12 + $0x240] ss:$8 sps:$4 sm:$0xff]   ;;  %v7216_v19 = vld [vmem:[%s9601_s12 + $0x274] ss:$8 sps:$4 sm:$0xff]  }
 0x9da   : > { %v3120_v28 = vadd.f32 %v3116_v20, %v3096_v3  ;;  %v3118_v29 = vmul.f32 %v3114_v21, %v3100_v15  ;;  %v7204_v3 = vld [vmem:[%s9601_s12 + $0x254] ss:$8 sps:$4 sm:$0xff]   ;;  %v7211_v18 = vld [vmem:[%s9601_s12 + $0x360] ss:$8 sps:$4 sm:$0xff]   ;;  %v7214_v21 = vld [vmem:[%s9601_s12 + $0x270] ss:$8 sps:$4 sm:$0xff]  }
 0x9db   : > { %v3123_v30 = vmul.f32 0.7978846, %v3119_v22  ;;  %v3121_v31 = vadd.f32 %v3117_v24, %v3098_v5  ;;  %v7549_v5 = vmov 3   ;;  %v7219_v20 = vld [vmem:[%s9601_s12 + $0x374] ss:$8 sps:$4 sm:$0xff]  }
 0x9dc   : > { %v3124_v25 = vmul.f32 0.7978846, %v3120_v28  ;;  %v3122_v11 = vadd.f32 %v3118_v29, %v3100_v15  ;;  %6633 = vset.pattern.permute.xlu1 %v7549_v5  ;;  %v7210_v15 = vld [vmem:[%s9601_s12 + $0x264] ss:$8 sps:$4 sm:$0xff]   ;;  %v7217_v22 = vld [vmem:[%s9601_s12 + $0x370] ss:$8 sps:$4 sm:$0xff]  }
 0x9dd   : > { %7516 = vtanh.f32 %v3123_v30  ;;  %v3125_v32 = vmul.f32 0.7978846, %v3121_v31  ;;  %4137 = vperm.xlu1 %6633, %v8869_v63   ;;  %v7222_v24 = vld [vmem:[%s9601_s12 + $0x284] ss:$8 sps:$4 sm:$0xff]   ;;  %v7220_v29 = vld [vmem:[%s9601_s12 + $0x280] ss:$8 sps:$4 sm:$0xff]  }
 0x9de   : > { %7518 = vtanh.f32 %v3124_v25  ;;  %v3126_v27 = vmul.f32 0.7978846, %v3122_v11  ;;  %v7225_v28 = vld [vmem:[%s9601_s12 + $0x384] ss:$8 sps:$4 sm:$0xff]   ;;  %v7223_v30 = vld [vmem:[%s9601_s12 + $0x380] ss:$8 sps:$4 sm:$0xff]  }
 0x9df   : > { %7520 = vtanh.f32 %v3125_v32  ;;  %v7228_v31 = vld [vmem:[%s9601_s12 + $0x294] ss:$8 sps:$4 sm:$0xff]   ;;  %v7226_v11 = vld [vmem:[%s9601_s12 + $0x290] ss:$8 sps:$4 sm:$0xff]  }
 0x9e0   : > { %7522 = vtanh.f32 %v3126_v27  ;;  %v7231_v25 = vld [vmem:[%s9601_s12 + $0x394] ss:$8 sps:$4 sm:$0xff]   ;;  %v7229_v32 = vld [vmem:[%s9601_s12 + $0x390] ss:$8 sps:$4 sm:$0xff]   ;;  %v7234_v27 = vld [vmem:[%s9601_s12 + $0x2a4] ss:$8 sps:$4 sm:$0xff]  }
 0x9e1   : > { %4141 = vperm.xlu1 %6633, %v8634_v59   ;;  %v7286_v5 = vld [vmem:[%s9601_s12 + $0x430] ss:$8 sps:$4 sm:$0xff]  }
 0x9e7   : > { %v7517_v33 = vpop.eup %7516 }
 0x9e8   : > { %v7519_v34 = vpop.eup %7518  ;;  %v3131_v14 = vadd.f32 1.0, %v7517_v33  ;;  %v7237_v33 = vld [vmem:[%s9601_s12 + $0x3a4] ss:$8 sps:$4 sm:$0xff]  }
 0x9e9   : > { %v7521_v50 = vpop.eup %7520  ;;  %v3132_v35 = vadd.f32 1.0, %v7519_v34  ;;  %v7232_v34 = vld [vmem:[%s9601_s12 + $0x2a0] ss:$8 sps:$4 sm:$0xff]  }
 0x9ea   : > { %v7523_v7 = vpop.eup %7522  ;;  %v3133_v36 = vadd.f32 1.0, %v7521_v50  ;;  %v3135_v40 = vmul.f32 %v3131_v14, %v3103_v6  ;;  %v7235_v14 = vld [vmem:[%s9601_s12 + $0x3a0] ss:$8 sps:$4 sm:$0xff]   ;;  %v7240_v50 = vld [vmem:[%s9601_s12 + $0x2b4] ss:$8 sps:$4 sm:$0xff]  }
 0x9eb   : > { %v3134_v39 = vadd.f32 1.0, %v7523_v7  ;;  %v3136_v42 = vmul.f32 %v3132_v35, %v3104_v37  ;;  %v7243_v35 = vld [vmem:[%s9601_s12 + $0x3b4] ss:$8 sps:$4 sm:$0xff]   ;;  %v7238_v7 = vld [vmem:[%s9601_s12 + $0x2b0] ss:$8 sps:$4 sm:$0xff]  }
 0x9ec   : > { %v3137_v41 = vmul.f32 %v3133_v36, %v3105_v8  ;;  %v7241_v6 = vld [vmem:[%s9601_s12 + $0x3b0] ss:$8 sps:$4 sm:$0xff]   ;;  %v7246_v8 = vld [vmem:[%s9601_s12 + $0x2c4] ss:$8 sps:$4 sm:$0xff]   ;;  %v7244_v37 = vld [vmem:[%s9601_s12 + $0x2c0] ss:$8 sps:$4 sm:$0xff]  }
 0x9ed   : > { %v3138_v43 = vmul.f32 %v3134_v39, %v3106_v38  ;;  %v7249_v36 = vld [vmem:[%s9601_s12 + $0x3c4] ss:$8 sps:$4 sm:$0xff]   ;;  %v7247_v38 = vld [vmem:[%s9601_s12 + $0x3c0] ss:$8 sps:$4 sm:$0xff]   ;;  %v7252_v39 = vld [vmem:[%s9601_s12 + $0x2d4] ss:$8 sps:$4 sm:$0xff]  }
 0x9ee   : > { %v8873_v57 = vpack.c.bf16 %v3137_v41, %v3135_v40  ;;  %v7255_v40 = vld [vmem:[%s9601_s12 + $0x3d4] ss:$8 sps:$4 sm:$0xff]   ;;  %v7250_v41 = vld [vmem:[%s9601_s12 + $0x2d0] ss:$8 sps:$4 sm:$0xff]  }
 0x9ef   : > { %v8875_v61 = vpack.c.bf16 %v3138_v43, %v3136_v42  ;;  %v7253_v42 = vld [vmem:[%s9601_s12 + $0x3d0] ss:$8 sps:$4 sm:$0xff]   ;;  %v7258_v43 = vld [vmem:[%s9601_s12 + $0x2e4] ss:$8 sps:$4 sm:$0xff]  }
 0x9f1   : > { %3367 = vmatprep.mubr.bf16.mxu0 %v8875_v61  ;;  %3621 = vmatprep.mubr.bf16.mxu1 %v8875_v61 }
 0x9f2   : > { %3368 = vmatmul.mubr.bf16.vlgmr.msra.gmra.mrb[28].mxu0 %v8873_v57  ;;  %3622 = vmatmul.mubr.bf16.vlgmr.msra.gmra.mrb[28].mxu1 %v8873_v57 }
 0x9f3   : > { %3842 = vmatpush1.bf16.msra.mxu0 %v7172_v44  ;;  %4094 = vmatpush1.bf16.msra.mxu1 %v7175_v45  ;;  %v7261_v44 = vld [vmem:[%s9601_s12 + $0x3e4] ss:$8 sps:$4 sm:$0xff]   ;;  %v7256_v45 = vld [vmem:[%s9601_s12 + $0x2e0] ss:$8 sps:$4 sm:$0xff]  }
 0x9f4   : > { %3873 = vmatprep.mubr.bf16.mxu0 %v8875_v61  ;;  %4125 = vmatprep.mubr.bf16.mxu1 %v8875_v61 }
 0x9f5   : > { %3843 = vmatprep.subr.bf16.mxu0 %v7180_v46  ;;  %4095 = vmatprep.subr.bf16.mxu1 %v7183_v47  ;;  %v7259_v46 = vld [vmem:[%s9601_s12 + $0x3e0] ss:$8 sps:$4 sm:$0xff]   ;;  %v7264_v47 = vld [vmem:[%s9601_s12 + $0x2f4] ss:$8 sps:$4 sm:$0xff]  }
 0x9f7   : > { %3844 = vmatpush1.bf16.msra.mxu0 %v7178_v48  ;;  %4096 = vmatpush1.bf16.msra.mxu1 %v7181_v49  ;;  %v7267_v48 = vld [vmem:[%s9601_s12 + $0x3f4] ss:$8 sps:$4 sm:$0xff]   ;;  %v7262_v49 = vld [vmem:[%s9601_s12 + $0x2f0] ss:$8 sps:$4 sm:$0xff]  }
 0x9f8   : > { %3845 = vmatprep.subr.bf16.mxu0 %v7186_v51  ;;  %4097 = vmatprep.subr.bf16.mxu1 %v7189_v52  ;;  %v7265_v51 = vld [vmem:[%s9601_s12 + $0x3f0] ss:$8 sps:$4 sm:$0xff]   ;;  %v7270_v52 = vld [vmem:[%s9601_s12 + $0x404] ss:$8 sps:$4 sm:$0xff]  }
 0x9fb   : > { %3846 = vmatpush1.bf16.msra.mxu0 %v7184_v53  ;;  %4098 = vmatpush1.bf16.msra.mxu1 %v7187_v10  ;;  %v7273_v53 = vld [vmem:[%s9601_s12 + $0x504] ss:$8 sps:$4 sm:$0xff]   ;;  %v7268_v10 = vld [vmem:[%s9601_s12 + $0x400] ss:$8 sps:$4 sm:$0xff]  }
 0x9fc   : > { %3847 = vmatprep.subr.bf16.mxu0 %v7192_v12  ;;  %4099 = vmatprep.subr.bf16.mxu1 %v7195_v54  ;;  %v7271_v12 = vld [vmem:[%s9601_s12 + $0x500] ss:$8 sps:$4 sm:$0xff]   ;;  %v7276_v54 = vld [vmem:[%s9601_s12 + $0x414] ss:$8 sps:$4 sm:$0xff]  }
 0x9ff   : > { %3848 = vmatpush1.bf16.msra.mxu0 %v7190_v55  ;;  %4100 = vmatpush1.bf16.msra.mxu1 %v7193_v56  ;;  %v7279_v55 = vld [vmem:[%s9601_s12 + $0x514] ss:$8 sps:$4 sm:$0xff]   ;;  %v7274_v56 = vld [vmem:[%s9601_s12 + $0x410] ss:$8 sps:$4 sm:$0xff]  }
 0xa00   : > { %3849 = vmatprep.subr.bf16.mxu0 %v7198_v58  ;;  %4101 = vmatprep.subr.bf16.mxu1 %v7201_v60  ;;  %v7277_v58 = vld [vmem:[%s9601_s12 + $0x510] ss:$8 sps:$4 sm:$0xff]   ;;  %v7282_v60 = vld [vmem:[%s9601_s12 + $0x424] ss:$8 sps:$4 sm:$0xff]  }
 0xa03   : > { %3850 = vmatpush1.bf16.msra.mxu0 %v7196_v0  ;;  %4102 = vmatpush1.bf16.msra.mxu1 %v7199_v2  ;;  %v7280_v0 = vld [vmem:[%s9601_s12 + $0x420] ss:$8 sps:$4 sm:$0xff]  }
 0xa04   : > { %3851 = vmatprep.subr.bf16.mxu0 %v7204_v3  ;;  %4103 = vmatprep.subr.bf16.mxu1 %v7207_v4  ;;  %v7283_v2 = vld [vmem:[%s9601_s12 + $0x520] ss:$8 sps:$4 sm:$0xff]   ;;  %v7288_v3 = vld [vmem:[%s9601_s12 + $0x434] ss:$8 sps:$4 sm:$0xff]  }
 0xa05   : > { %v7291_v4 = vld [vmem:[%s9601_s12 + $0x534] ss:$8 sps:$4 sm:$0xff]  }
 0xa07   : > { %3852 = vmatpush1.bf16.msra.mxu0 %v7202_v9  ;;  %4104 = vmatpush1.bf16.msra.mxu1 %v7205_v13  ;;  %v7289_v9 = vld [vmem:[%s9601_s12 + $0x530] ss:$8 sps:$4 sm:$0xff]   ;;  %v7294_v13 = vld [vmem:[%s9601_s12 + $0x444] ss:$8 sps:$4 sm:$0xff]  }
 0xa08   : > { %3853 = vmatprep.subr.bf16.mxu0 %v7210_v15  ;;  %4105 = vmatprep.subr.bf16.mxu1 %v7213_v16  ;;  %v7297_v15 = vld [vmem:[%s9601_s12 + $0x544] ss:$8 sps:$4 sm:$0xff]   ;;  %v7292_v16 = vld [vmem:[%s9601_s12 + $0x440] ss:$8 sps:$4 sm:$0xff]  }
 0xa0b   : > { %3854 = vmatpush1.bf16.msra.mxu0 %v7208_v17  ;;  %4106 = vmatpush1.bf16.msra.mxu1 %v7211_v18  ;;  %v7295_v17 = vld [vmem:[%s9601_s12 + $0x540] ss:$8 sps:$4 sm:$0xff]   ;;  %v7300_v18 = vld [vmem:[%s9601_s12 + $0x454] ss:$8 sps:$4 sm:$0xff]  }
 0xa0c   : > { %3855 = vmatprep.subr.bf16.mxu0 %v7216_v19  ;;  %4107 = vmatprep.subr.bf16.mxu1 %v7219_v20  ;;  %v7303_v19 = vld [vmem:[%s9601_s12 + $0x554] ss:$8 sps:$4 sm:$0xff]   ;;  %v7550_v20 = vmov 4  }
 0xa0d   : > { %6635 = vset.pattern.permute.xlu1 %v7550_v20  ;;  %6634 = vset.pattern.permute.xlu0 %v7550_v20  ;;  %v7387_v20 = vld [vmem:[%s9601_s12 + $0x734] ss:$8 sps:$4 sm:$0xff]  }
 0xa0e   : > { %4393 = vperm.xlu1 %6635, %v8634_v59   ;;  %4389 = vperm.xlu0 %6634, %v8869_v63  }
 0xa0f   : > { %3856 = vmatpush1.bf16.msra.mxu0 %v7214_v21  ;;  %4108 = vmatpush1.bf16.msra.mxu1 %v7217_v22  ;;  %v7298_v21 = vld [vmem:[%s9601_s12 + $0x450] ss:$8 sps:$4 sm:$0xff]  }
 0xa10   : > { %3857 = vmatprep.subr.bf16.mxu0 %v7222_v24  ;;  %4109 = vmatprep.subr.bf16.mxu1 %v7225_v28  ;;  %v7301_v22 = vld [vmem:[%s9601_s12 + $0x550] ss:$8 sps:$4 sm:$0xff]   ;;  %v7306_v24 = vld [vmem:[%s9601_s12 + $0x464] ss:$8 sps:$4 sm:$0xff]  }
 0xa11   : > { %v7309_v28 = vld [vmem:[%s9601_s12 + $0x564] ss:$8 sps:$4 sm:$0xff]  }
 0xa13   : > { %3858 = vmatpush1.bf16.msra.mxu0 %v7220_v29  ;;  %4110 = vmatpush1.bf16.msra.mxu1 %v7223_v30  ;;  %v7551_v29 = vmov 5   ;;  %v7304_v30 = vld [vmem:[%s9601_s12 + $0x460] ss:$8 sps:$4 sm:$0xff]  }
 0xa14   : > { %3859 = vmatprep.subr.bf16.mxu0 %v7228_v31  ;;  %4111 = vmatprep.subr.bf16.mxu1 %v7231_v25  ;;  %v7307_v31 = vld [vmem:[%s9601_s12 + $0x560] ss:$8 sps:$4 sm:$0xff]   ;;  %v7312_v25 = vld [vmem:[%s9601_s12 + $0x474] ss:$8 sps:$4 sm:$0xff]  }
 0xa15   : > { %6636 = vset.pattern.permute.xlu1 %v7551_v29  ;;  %6637 = vset.pattern.permute.xlu0 %v7551_v29  ;;  %v7390_v29 = vld [vmem:[%s9601_s12 + $0x644] ss:$8 sps:$4 sm:$0xff]  }
 0xa16   : > { %4641 = vperm.xlu1 %6636, %v8869_v63   ;;  %4645 = vperm.xlu0 %6637, %v8634_v59   ;;  %v7321_v59 = vld [vmem:[%s9601_s12 + $0x584] ss:$8 sps:$4 sm:$0xff]  }
 0xa17   : > { %3860 = vmatpush1.bf16.msra.mxu0 %v7226_v11  ;;  %4112 = vmatpush1.bf16.msra.mxu1 %v7229_v32  ;;  %v7315_v11 = vld [vmem:[%s9601_s12 + $0x574] ss:$8 sps:$4 sm:$0xff]   ;;  %v7310_v32 = vld [vmem:[%s9601_s12 + $0x470] ss:$8 sps:$4 sm:$0xff]  }
 0xa18   : > { %3861 = vmatprep.subr.bf16.mxu0 %v7234_v27  ;;  %4113 = vmatprep.subr.bf16.mxu1 %v7237_v33  ;;  %v7313_v27 = vld [vmem:[%s9601_s12 + $0x570] ss:$8 sps:$4 sm:$0xff]   ;;  %v7318_v33 = vld [vmem:[%s9601_s12 + $0x484] ss:$8 sps:$4 sm:$0xff]  }
 0xa1b   : > { %3862 = vmatpush1.bf16.msra.mxu0 %v7232_v34  ;;  %4114 = vmatpush1.bf16.msra.mxu1 %v7235_v14  ;;  %v7316_v34 = vld [vmem:[%s9601_s12 + $0x480] ss:$8 sps:$4 sm:$0xff]  }
 0xa1c   : > { %3863 = vmatprep.subr.bf16.mxu0 %v7240_v50  ;;  %4115 = vmatprep.subr.bf16.mxu1 %v7243_v35  ;;  %v7319_v14 = vld [vmem:[%s9601_s12 + $0x580] ss:$8 sps:$4 sm:$0xff]   ;;  %v7324_v50 = vld [vmem:[%s9601_s12 + $0x494] ss:$8 sps:$4 sm:$0xff]  }
 0xa1d   : > { %v7327_v35 = vld [vmem:[%s9601_s12 + $0x594] ss:$8 sps:$4 sm:$0xff]  }
 0xa1f   : > { %3864 = vmatpush1.bf16.msra.mxu0 %v7238_v7  ;;  %4116 = vmatpush1.bf16.msra.mxu1 %v7241_v6  ;;  %v7322_v7 = vld [vmem:[%s9601_s12 + $0x490] ss:$8 sps:$4 sm:$0xff]  }
 0xa20   : > { %3865 = vmatprep.subr.bf16.mxu0 %v7246_v8  ;;  %4117 = vmatprep.subr.bf16.mxu1 %v7249_v36  ;;  %v7325_v6 = vld [vmem:[%s9601_s12 + $0x590] ss:$8 sps:$4 sm:$0xff]   ;;  %v7330_v8 = vld [vmem:[%s9601_s12 + $0x4a4] ss:$8 sps:$4 sm:$0xff]  }
 0xa21   : > { %v7333_v36 = vld [vmem:[%s9601_s12 + $0x5a4] ss:$8 sps:$4 sm:$0xff]  }
 0xa23   : > { %3866 = vmatpush1.bf16.msra.mxu0 %v7244_v37  ;;  %4118 = vmatpush1.bf16.msra.mxu1 %v7247_v38  ;;  %v7328_v37 = vld [vmem:[%s9601_s12 + $0x4a0] ss:$8 sps:$4 sm:$0xff]  }
 0xa24   : > { %3867 = vmatprep.subr.bf16.mxu0 %v7252_v39  ;;  %4119 = vmatprep.subr.bf16.mxu1 %v7255_v40  ;;  %v7331_v38 = vld [vmem:[%s9601_s12 + $0x5a0] ss:$8 sps:$4 sm:$0xff]   ;;  %v7336_v39 = vld [vmem:[%s9601_s12 + $0x4b4] ss:$8 sps:$4 sm:$0xff]  }
 0xa25   : > { %v7339_v40 = vld [vmem:[%s9601_s12 + $0x5b4] ss:$8 sps:$4 sm:$0xff]  }
 0xa27   : > { %3868 = vmatpush1.bf16.msra.mxu0 %v7250_v41  ;;  %4120 = vmatpush1.bf16.msra.mxu1 %v7253_v42  ;;  %v7334_v41 = vld [vmem:[%s9601_s12 + $0x4b0] ss:$8 sps:$4 sm:$0xff]  }
 0xa28   : > { %3869 = vmatprep.subr.bf16.mxu0 %v7258_v43  ;;  %4121 = vmatprep.subr.bf16.mxu1 %v7261_v44  ;;  %v7337_v42 = vld [vmem:[%s9601_s12 + $0x5b0] ss:$8 sps:$4 sm:$0xff]   ;;  %v7342_v43 = vld [vmem:[%s9601_s12 + $0x4c4] ss:$8 sps:$4 sm:$0xff]  }
 0xa29   : > { %v7345_v44 = vld [vmem:[%s9601_s12 + $0x5c4] ss:$8 sps:$4 sm:$0xff]  }
 0xa2b   : > { %3870 = vmatpush1.bf16.msra.mxu0 %v7256_v45  ;;  %4122 = vmatpush1.bf16.msra.mxu1 %v7259_v46  ;;  %v7340_v45 = vld [vmem:[%s9601_s12 + $0x4c0] ss:$8 sps:$4 sm:$0xff]  }
 0xa2c   : > { %3871 = vmatprep.subr.bf16.mxu0 %v7264_v47  ;;  %4123 = vmatprep.subr.bf16.mxu1 %v7267_v48  ;;  %v7343_v46 = vld [vmem:[%s9601_s12 + $0x5c0] ss:$8 sps:$4 sm:$0xff]   ;;  %v7348_v47 = vld [vmem:[%s9601_s12 + $0x4d4] ss:$8 sps:$4 sm:$0xff]  }
 0xa2d   : > { %v7351_v48 = vld [vmem:[%s9601_s12 + $0x5d4] ss:$8 sps:$4 sm:$0xff]  }
 0xa2f   : > { %3872 = vmatpush1.bf16.msra.mxu0 %v7262_v49  ;;  %4124 = vmatpush1.bf16.msra.mxu1 %v7265_v51  ;;  %v7346_v49 = vld [vmem:[%s9601_s12 + $0x4d0] ss:$8 sps:$4 sm:$0xff]  }
 0xa30   : > { %4345 = vmatprep.subr.bf16.mxu0 %v7270_v52  ;;  %4597 = vmatprep.subr.bf16.mxu1 %v7273_v53  ;;  %v7349_v51 = vld [vmem:[%s9601_s12 + $0x5d0] ss:$8 sps:$4 sm:$0xff]   ;;  %v7354_v52 = vld [vmem:[%s9601_s12 + $0x4e4] ss:$8 sps:$4 sm:$0xff]  }
 0xa31   : > { %v7357_v53 = vld [vmem:[%s9601_s12 + $0x5e4] ss:$8 sps:$4 sm:$0xff]  }
 0xa32   : > { %3874 = vmatmul.mubr.bf16.vlgmr.msra.gmra.mrb[32].mxu0 %v8873_v57  ;;  %4126 = vmatmul.mubr.bf16.vlgmr.msra.gmra.mrb[32].mxu1 %v8873_v57 }
 0xa33   : > { %4346 = vmatpush1.bf16.msra.mxu0 %v7268_v10  ;;  %4377 = vmatprep.mubr.bf16.mxu0 %v8875_v61  ;;  %v7352_v10 = vld [vmem:[%s9601_s12 + $0x4e0] ss:$8 sps:$4 sm:$0xff]  }
 0xa34   : > { %4598 = vmatpush1.bf16.msra.mxu1 %v7271_v12  ;;  %4629 = vmatprep.mubr.bf16.mxu1 %v8875_v61  ;;  %v7355_v12 = vld [vmem:[%s9601_s12 + $0x5e0] ss:$8 sps:$4 sm:$0xff]  }
 0xa35   : > { %4347 = vmatprep.subr.bf16.mxu0 %v7276_v54  ;;  %4599 = vmatprep.subr.bf16.mxu1 %v7279_v55  ;;  %v7360_v54 = vld [vmem:[%s9601_s12 + $0x4f4] ss:$8 sps:$4 sm:$0xff]  }
 0xa36   : > { %v7363_v55 = vld [vmem:[%s9601_s12 + $0x5f4] ss:$8 sps:$4 sm:$0xff]  }
 0xa37   : > { %4348 = vmatpush1.bf16.msra.mxu0 %v7274_v56  ;;  %v7358_v56 = vld [vmem:[%s9601_s12 + $0x4f0] ss:$8 sps:$4 sm:$0xff]  }
 0xa38   : > { %4600 = vmatpush1.bf16.msra.mxu1 %v7277_v58  ;;  %4349 = vmatprep.subr.bf16.mxu0 %v7282_v60  ;;  %v7361_v58 = vld [vmem:[%s9601_s12 + $0x5f0] ss:$8 sps:$4 sm:$0xff]   ;;  %v7366_v60 = vld [vmem:[%s9601_s12 + $0x604] ss:$8 sps:$4 sm:$0xff]  }
 0xa39   : > { %4601 = vmatprep.subr.bf16.mxu1 %v7285_v62  ;;  %v7369_v62 = vld [vmem:[%s9601_s12 + $0x704] ss:$8 sps:$4 sm:$0xff]  }
 0xa3b   : > { %4350 = vmatpush1.bf16.msra.mxu0 %v7280_v0  ;;  %v7364_v0 = vld [vmem:[%s9601_s12 + $0x600] ss:$8 sps:$4 sm:$0xff]  }
 0xa3c   : > { %4602 = vmatpush1.bf16.msra.mxu1 %v7283_v2  ;;  %4351 = vmatprep.subr.bf16.mxu0 %v7288_v3  ;;  %v7367_v2 = vld [vmem:[%s9601_s12 + $0x700] ss:$8 sps:$4 sm:$0xff]   ;;  %v7372_v3 = vld [vmem:[%s9601_s12 + $0x614] ss:$8 sps:$4 sm:$0xff]  }
 0xa3d   : > { %4603 = vmatprep.subr.bf16.mxu1 %v7291_v4  ;;  %v7375_v4 = vld [vmem:[%s9601_s12 + $0x714] ss:$8 sps:$4 sm:$0xff]  }
 0xa3f   : > { %4352 = vmatpush1.bf16.msra.mxu0 %v7286_v5  ;;  %v7370_v5 = vld [vmem:[%s9601_s12 + $0x610] ss:$8 sps:$4 sm:$0xff]  }
 0xa40   : > { %4604 = vmatpush1.bf16.msra.mxu1 %v7289_v9  ;;  %4353 = vmatprep.subr.bf16.mxu0 %v7294_v13  ;;  %v7373_v9 = vld [vmem:[%s9601_s12 + $0x710] ss:$8 sps:$4 sm:$0xff]   ;;  %v7378_v13 = vld [vmem:[%s9601_s12 + $0x624] ss:$8 sps:$4 sm:$0xff]  }
 0xa41   : > { %4605 = vmatprep.subr.bf16.mxu1 %v7297_v15  ;;  %v7381_v15 = vld [vmem:[%s9601_s12 + $0x724] ss:$8 sps:$4 sm:$0xff]  }
 0xa43   : > { %4354 = vmatpush1.bf16.msra.mxu0 %v7292_v16  ;;  %v7552_v16 = vmov 6  }
 0xa44   : > { %4606 = vmatpush1.bf16.msra.mxu1 %v7295_v17  ;;  %4355 = vmatprep.subr.bf16.mxu0 %v7300_v18  ;;  %v7376_v17 = vld [vmem:[%s9601_s12 + $0x620] ss:$8 sps:$4 sm:$0xff]  }
 0xa45   : > { %4607 = vmatprep.subr.bf16.mxu1 %v7303_v19  ;;  %6638 = vset.pattern.permute.xlu1 %v7552_v16  ;;  %v7379_v18 = vld [vmem:[%s9601_s12 + $0x720] ss:$8 sps:$4 sm:$0xff]   ;;  %v7384_v19 = vld [vmem:[%s9601_s12 + $0x634] ss:$8 sps:$4 sm:$0xff]  }
 0xa46   : > { %4893 = vperm.xlu1 %6638, %v8869_v63   ;;  %v7460_v16 = vld [vmem:[%s9601_s12 + $0x800] ss:$8 sps:$4 sm:$0xff]  }
 0xa47   : > { %4356 = vmatpush1.bf16.msra.mxu0 %v7298_v21  ;;  %v7553_v21 = vmov 7  }
 0xa48   : > { %4608 = vmatpush1.bf16.msra.mxu1 %v7301_v22  ;;  %4357 = vmatprep.subr.bf16.mxu0 %v7306_v24  ;;  %v7382_v22 = vld [vmem:[%s9601_s12 + $0x630] ss:$8 sps:$4 sm:$0xff]   ;;  %v7534_v24 = vld [vmem:[%s9602_s13 + $0x8] sm:$0xff] }
 0xa49   : > { %4609 = vmatprep.subr.bf16.mxu1 %v7309_v28  ;;  %6639 = vset.pattern.permute.xlu0 %v7553_v21  ;;  %v7385_v28 = vld [vmem:[%s9601_s12 + $0x730] ss:$8 sps:$4 sm:$0xff]  }
 0xa4a   : > { %5145 = vperm.xlu0 %6639, %v8869_v63   ;;  %4897 = vperm.xlu1 %6638, %v7534_v24  }
 0xa4b   : > { %4358 = vmatpush1.bf16.msra.mxu0 %v7304_v30  ;;  %v7393_v30 = vld [vmem:[%s9601_s12 + $0x744] ss:$8 sps:$4 sm:$0xff]  }
 0xa4c   : > { %4610 = vmatpush1.bf16.msra.mxu1 %v7307_v31  ;;  %4359 = vmatprep.subr.bf16.mxu0 %v7312_v25  ;;  %v7388_v31 = vld [vmem:[%s9601_s12 + $0x640] ss:$8 sps:$4 sm:$0xff]  }
 0xa4d   : > { %4611 = vmatprep.subr.bf16.mxu1 %v7315_v11  ;;  %v7391_v25 = vld [vmem:[%s9601_s12 + $0x740] ss:$8 sps:$4 sm:$0xff]   ;;  %v7396_v11 = vld [vmem:[%s9601_s12 + $0x654] ss:$8 sps:$4 sm:$0xff]  }
 0xa4e   : > { %6640 = vset.pattern.permute.xlu1 %v7553_v21  ;;  %v7471_v21 = vld [vmem:[%s9601_s12 + $0x834] ss:$8 sps:$4 sm:$0xff]  }
 0xa4f   : > { %4360 = vmatpush1.bf16.msra.mxu0 %v7310_v32  ;;  %v7399_v32 = vld [vmem:[%s9601_s12 + $0x754] ss:$8 sps:$4 sm:$0xff]   ;;  %5149 = vperm.xlu1 %6640, %v7534_v24  }
 0xa50   : > { %4612 = vmatpush1.bf16.msra.mxu1 %v7313_v27  ;;  %4361 = vmatprep.subr.bf16.mxu0 %v7318_v33  ;;  %v7394_v27 = vld [vmem:[%s9601_s12 + $0x650] ss:$8 sps:$4 sm:$0xff]  }
 0xa51   : > { %4613 = vmatprep.subr.bf16.mxu1 %v7321_v59  ;;  %v7397_v33 = vld [vmem:[%s9601_s12 + $0x750] ss:$8 sps:$4 sm:$0xff]   ;;  %v7402_v59 = vld [vmem:[%s9601_s12 + $0x664] ss:$8 sps:$4 sm:$0xff]  }
 0xa53   : > { %4362 = vmatpush1.bf16.msra.mxu0 %v7316_v34  ;;  %v7405_v34 = vld [vmem:[%s9601_s12 + $0x764] ss:$8 sps:$4 sm:$0xff]  }
 0xa54   : > { %4614 = vmatpush1.bf16.msra.mxu1 %v7319_v14  ;;  %4363 = vmatprep.subr.bf16.mxu0 %v7324_v50  ;;  %v7400_v14 = vld [vmem:[%s9601_s12 + $0x660] ss:$8 sps:$4 sm:$0xff]  }
 0xa55   : > { %4615 = vmatprep.subr.bf16.mxu1 %v7327_v35  ;;  %v7403_v50 = vld [vmem:[%s9601_s12 + $0x760] ss:$8 sps:$4 sm:$0xff]   ;;  %v7408_v35 = vld [vmem:[%s9601_s12 + $0x674] ss:$8 sps:$4 sm:$0xff]  }
 0xa57   : > { %4364 = vmatpush1.bf16.msra.mxu0 %v7322_v7  ;;  %v7411_v7 = vld [vmem:[%s9601_s12 + $0x774] ss:$8 sps:$4 sm:$0xff]  }
 0xa58   : > { %4616 = vmatpush1.bf16.msra.mxu1 %v7325_v6  ;;  %4365 = vmatprep.subr.bf16.mxu0 %v7330_v8  ;;  %v7406_v6 = vld [vmem:[%s9601_s12 + $0x670] ss:$8 sps:$4 sm:$0xff]  }
 0xa59   : > { %4617 = vmatprep.subr.bf16.mxu1 %v7333_v36  ;;  %v7409_v8 = vld [vmem:[%s9601_s12 + $0x770] ss:$8 sps:$4 sm:$0xff]   ;;  %v7414_v36 = vld [vmem:[%s9601_s12 + $0x684] ss:$8 sps:$4 sm:$0xff]  }
 0xa5b   : > { %4366 = vmatpush1.bf16.msra.mxu0 %v7328_v37  ;;  %v7417_v37 = vld [vmem:[%s9601_s12 + $0x784] ss:$8 sps:$4 sm:$0xff]  }
 0xa5c   : > { %4618 = vmatpush1.bf16.msra.mxu1 %v7331_v38  ;;  %4367 = vmatprep.subr.bf16.mxu0 %v7336_v39  ;;  %v7554_v38 = vmov 8   ;;  %v7412_v39 = vld [vmem:[%s9601_s12 + $0x680] ss:$8 sps:$4 sm:$0xff]  }
 0xa5d   : > { %4619 = vmatprep.subr.bf16.mxu1 %v7339_v40  ;;  %6641 = vset.pattern.permute.xlu1 %v7554_v38  ;;  %v7415_v40 = vld [vmem:[%s9601_s12 + $0x780] ss:$8 sps:$4 sm:$0xff]  }
 0xa5e   : > { %6642 = vset.pattern.permute.xlu0 %v7554_v38  ;;  %5397 = vperm.xlu1 %6641, %v8869_v63   ;;  %v7418_v63 = vld [vmem:[%s9601_s12 + $0x690] ss:$8 sps:$4 sm:$0xff]  }
 0xa5f   : > { %4368 = vmatpush1.bf16.msra.mxu0 %v7334_v41  ;;  %v7420_v41 = vld [vmem:[%s9601_s12 + $0x694] ss:$8 sps:$4 sm:$0xff]   ;;  %5401 = vperm.xlu0 %6642, %v7534_v24   ;;  %v7472_v24 = vld [vmem:[%s9601_s12 + $0x840] ss:$8 sps:$4 sm:$0xff]  }
 0xa60   : > { %4620 = vmatpush1.bf16.msra.mxu1 %v7337_v42  ;;  %4369 = vmatprep.subr.bf16.mxu0 %v7342_v43  ;;  %v7423_v42 = vld [vmem:[%s9601_s12 + $0x794] ss:$8 sps:$4 sm:$0xff]   ;;  %v7421_v43 = vld [vmem:[%s9601_s12 + $0x790] ss:$8 sps:$4 sm:$0xff]  }
 0xa61   : > { %4621 = vmatprep.subr.bf16.mxu1 %v7345_v44  ;;  %v7426_v44 = vld [vmem:[%s9601_s12 + $0x6a4] ss:$8 sps:$4 sm:$0xff]  }
 0xa63   : > { %4370 = vmatpush1.bf16.msra.mxu0 %v7340_v45  ;;  %v7429_v45 = vld [vmem:[%s9601_s12 + $0x7a4] ss:$8 sps:$4 sm:$0xff]  }
 0xa64   : > { %4622 = vmatpush1.bf16.msra.mxu1 %v7343_v46  ;;  %4371 = vmatprep.subr.bf16.mxu0 %v7348_v47  ;;  %v7424_v46 = vld [vmem:[%s9601_s12 + $0x6a0] ss:$8 sps:$4 sm:$0xff]  }
 0xa65   : > { %4623 = vmatprep.subr.bf16.mxu1 %v7351_v48  ;;  %v7427_v47 = vld [vmem:[%s9601_s12 + $0x7a0] ss:$8 sps:$4 sm:$0xff]   ;;  %v7432_v48 = vld [vmem:[%s9601_s12 + $0x6b4] ss:$8 sps:$4 sm:$0xff]  }
 0xa67   : > { %4372 = vmatpush1.bf16.msra.mxu0 %v7346_v49  ;;  %v7435_v49 = vld [vmem:[%s9601_s12 + $0x7b4] ss:$8 sps:$4 sm:$0xff]  }
 0xa68   : > { %4624 = vmatpush1.bf16.msra.mxu1 %v7349_v51  ;;  %4373 = vmatprep.subr.bf16.mxu0 %v7354_v52  ;;  %v7430_v51 = vld [vmem:[%s9601_s12 + $0x6b0] ss:$8 sps:$4 sm:$0xff]  }
 0xa69   : > { %4625 = vmatprep.subr.bf16.mxu1 %v7357_v53  ;;  %v7433_v52 = vld [vmem:[%s9601_s12 + $0x7b0] ss:$8 sps:$4 sm:$0xff]   ;;  %v7438_v53 = vld [vmem:[%s9601_s12 + $0x6c4] ss:$8 sps:$4 sm:$0xff]  }
 0xa6b   : > { %4374 = vmatpush1.bf16.msra.mxu0 %v7352_v10  ;;  %v7441_v10 = vld [vmem:[%s9601_s12 + $0x7c4] ss:$8 sps:$4 sm:$0xff]  }
 0xa6c   : > { %4626 = vmatpush1.bf16.msra.mxu1 %v7355_v12  ;;  %4375 = vmatprep.subr.bf16.mxu0 %v7360_v54  ;;  %v7436_v12 = vld [vmem:[%s9601_s12 + $0x6c0] ss:$8 sps:$4 sm:$0xff]  }
 0xa6d   : > { %4627 = vmatprep.subr.bf16.mxu1 %v7363_v55  ;;  %v7439_v54 = vld [vmem:[%s9601_s12 + $0x7c0] ss:$8 sps:$4 sm:$0xff]   ;;  %v7444_v55 = vld [vmem:[%s9601_s12 + $0x6d4] ss:$8 sps:$4 sm:$0xff]  }
 0xa6f   : > { %4376 = vmatpush1.bf16.msra.mxu0 %v7358_v56  ;;  %v7447_v56 = vld [vmem:[%s9601_s12 + $0x7d4] ss:$8 sps:$4 sm:$0xff]  }
 0xa70   : > { %4628 = vmatpush1.bf16.msra.mxu1 %v7361_v58  ;;  %4849 = vmatprep.subr.bf16.mxu0 %v7366_v60  ;;  %v7442_v58 = vld [vmem:[%s9601_s12 + $0x6d0] ss:$8 sps:$4 sm:$0xff]  }
 0xa71   : > { %5101 = vmatprep.subr.bf16.mxu1 %v7369_v62  ;;  %v7445_v60 = vld [vmem:[%s9601_s12 + $0x7d0] ss:$8 sps:$4 sm:$0xff]   ;;  %v7450_v62 = vld [vmem:[%s9601_s12 + $0x6e4] ss:$8 sps:$4 sm:$0xff]  }
 0xa72   : > { %4378 = vmatmul.mubr.bf16.vlgmr.msra.gmra.mrb[36].mxu0 %v8873_v57 }
 0xa73   : > { %4630 = vmatmul.mubr.bf16.vlgmr.msra.gmra.mrb[36].mxu1 %v8873_v57  ;;  %4850 = vmatpush1.bf16.msra.mxu0 %v7364_v0  ;;  %v7453_v0 = vld [vmem:[%s9601_s12 + $0x7e4] ss:$8 sps:$4 sm:$0xff]  }
 0xa74   : > { %4881 = vmatprep.mubr.bf16.mxu0 %v8875_v61  ;;  %5102 = vmatpush1.bf16.msra.mxu1 %v7367_v2  ;;  %v7448_v2 = vld [vmem:[%s9601_s12 + $0x6e0] ss:$8 sps:$4 sm:$0xff]  }
 0xa75   : > { %5133 = vmatprep.mubr.bf16.mxu1 %v8875_v61  ;;  %4851 = vmatprep.subr.bf16.mxu0 %v7372_v3  ;;  %v7451_v3 = vld [vmem:[%s9601_s12 + $0x7e0] ss:$8 sps:$4 sm:$0xff]  }
 0xa76   : > { %5103 = vmatprep.subr.bf16.mxu1 %v7375_v4  ;;  %v7456_v4 = vld [vmem:[%s9601_s12 + $0x6f4] ss:$8 sps:$4 sm:$0xff]  }
 0xa77   : > { %4852 = vmatpush1.bf16.msra.mxu0 %v7370_v5  ;;  %v7459_v5 = vld [vmem:[%s9601_s12 + $0x7f4] ss:$8 sps:$4 sm:$0xff]  }
 0xa78   : > { %5104 = vmatpush1.bf16.msra.mxu1 %v7373_v9  ;;  %4853 = vmatprep.subr.bf16.mxu0 %v7378_v13  ;;  %v7454_v9 = vld [vmem:[%s9601_s12 + $0x6f0] ss:$8 sps:$4 sm:$0xff]  }
 0xa79   : > { %5105 = vmatprep.subr.bf16.mxu1 %v7381_v15  ;;  %v7457_v13 = vld [vmem:[%s9601_s12 + $0x7f0] ss:$8 sps:$4 sm:$0xff]   ;;  %v7462_v15 = vld [vmem:[%s9601_s12 + $0x804] ss:$8 sps:$4 sm:$0xff]  }
 0xa7b   : > { %4854 = vmatpush1.bf16.msra.mxu0 %v7376_v17  ;;  %v7465_v17 = vld [vmem:[%s9601_s12 + $0x814] ss:$8 sps:$4 sm:$0xff]  }
 0xa7c   : > { %5106 = vmatpush1.bf16.msra.mxu1 %v7379_v18  ;;  %4855 = vmatprep.subr.bf16.mxu0 %v7384_v19  ;;  %v7463_v18 = vld [vmem:[%s9601_s12 + $0x810] ss:$8 sps:$4 sm:$0xff]   ;;  %v7468_v19 = vld [vmem:[%s9601_s12 + $0x824] ss:$8 sps:$4 sm:$0xff]  }
 0xa7d   : > { %5107 = vmatprep.subr.bf16.mxu1 %v7387_v20  ;;  %v7466_v20 = vld [vmem:[%s9601_s12 + $0x820] ss:$8 sps:$4 sm:$0xff]  }
 0xa7f   : > { %4856 = vmatpush1.bf16.msra.mxu0 %v7382_v22  ;;  %v3381_v22 = vpop.permute.xlu0 %3380 }
 0xa80   : > { %5108 = vmatpush1.bf16.msra.mxu1 %v7385_v28  ;;  %4857 = vmatprep.subr.bf16.mxu0 %v7390_v29  ;;  %v3386_v28 = vpop.permute.xlu1 %3385  ;;  %v7477_v29 = vld [vmem:[%s9601_s12 + $0x854] ss:$8 sps:$4 sm:$0xff]  }
 0xa81   : > { %5109 = vmatprep.subr.bf16.mxu1 %v7393_v30 }
 0xa83   : > { %4858 = vmatpush1.bf16.msra.mxu0 %v7388_v31  ;;  %v3634_v30 = vpop.permute.xlu0 %3633  ;;  %v7475_v31 = vld [vmem:[%s9601_s12 + $0x850] ss:$8 sps:$4 sm:$0xff]  }
 0xa84   : > { %5110 = vmatpush1.bf16.msra.mxu1 %v7391_v25  ;;  %4859 = vmatprep.subr.bf16.mxu0 %v7396_v11  ;;  %v3638_v25 = vpop.permute.xlu1 %3637  ;;  %v7480_v11 = vld [vmem:[%s9601_s12 + $0x864] ss:$8 sps:$4 sm:$0xff]  }
 0xa85   : > { %5111 = vmatprep.subr.bf16.mxu1 %v7399_v32 }
 0xa87   : > { %4860 = vmatpush1.bf16.msra.mxu0 %v7394_v27 }
 0xa88   : > { %5112 = vmatpush1.bf16.msra.mxu1 %v7397_v33  ;;  %4861 = vmatprep.subr.bf16.mxu0 %v7402_v59 }
 0xa89   : > { %5113 = vmatprep.subr.bf16.mxu1 %v7405_v34 }
 0xa8b   : > { %4862 = vmatpush1.bf16.msra.mxu0 %v7400_v14 }
 0xa8c   : > { %5114 = vmatpush1.bf16.msra.mxu1 %v7403_v50  ;;  %4863 = vmatprep.subr.bf16.mxu0 %v7408_v35 }
 0xa8d   : > { %5115 = vmatprep.subr.bf16.mxu1 %v7411_v7 }
 0xa8f   : > { %4864 = vmatpush1.bf16.msra.mxu0 %v7406_v6 }
 0xa90   : > { %5116 = vmatpush1.bf16.msra.mxu1 %v7409_v8  ;;  %4865 = vmatprep.subr.bf16.mxu0 %v7414_v36  ;;  %v7478_v8 = vld [vmem:[%s9601_s12 + $0x860] ss:$8 sps:$4 sm:$0xff]  }
 0xa91   : > { %5117 = vmatprep.subr.bf16.mxu1 %v7417_v37 }
 0xa93   : > { %4866 = vmatpush1.bf16.msra.mxu0 %v7412_v39 }
 0xa94   : > { %5118 = vmatpush1.bf16.msra.mxu1 %v7415_v40  ;;  %4867 = vmatprep.subr.bf16.mxu0 %v7420_v41  ;;  %v7483_v41 = vld [vmem:[%s9601_s12 + $0x874] ss:$8 sps:$4 sm:$0xff]  }
 0xa95   : > { %5119 = vmatprep.subr.bf16.mxu1 %v7423_v42 }
 0xa97   : > { %4868 = vmatpush1.bf16.msra.mxu0 %v7418_v63 }
 0xa98   : > { %5120 = vmatpush1.bf16.msra.mxu1 %v7421_v43  ;;  %4869 = vmatprep.subr.bf16.mxu0 %v7426_v44 }
 0xa99   : > { %5121 = vmatprep.subr.bf16.mxu1 %v7429_v45 }
 0xa9b   : > { %4870 = vmatpush1.bf16.msra.mxu0 %v7424_v46  ;;  %v7481_v46 = vld [vmem:[%s9601_s12 + $0x870] ss:$8 sps:$4 sm:$0xff]  }
 0xa9c   : > { %5122 = vmatpush1.bf16.msra.mxu1 %v7427_v47  ;;  %4871 = vmatprep.subr.bf16.mxu0 %v7432_v48  ;;  %v7486_v47 = vld [vmem:[%s9601_s12 + $0x884] ss:$8 sps:$4 sm:$0xff]   ;;  %v7484_v48 = vld [vmem:[%s9601_s12 + $0x880] ss:$8 sps:$4 sm:$0xff]  }
 0xa9d   : > { %5123 = vmatprep.subr.bf16.mxu1 %v7435_v49  ;;  %v7489_v49 = vld [vmem:[%s9601_s12 + $0x894] ss:$8 sps:$4 sm:$0xff]  }
 0xa9f   : > { %4872 = vmatpush1.bf16.msra.mxu0 %v7430_v51  ;;  %v7487_v51 = vld [vmem:[%s9601_s12 + $0x890] ss:$8 sps:$4 sm:$0xff]  }
 0xaa0   : > { %5124 = vmatpush1.bf16.msra.mxu1 %v7433_v52  ;;  %4873 = vmatprep.subr.bf16.mxu0 %v7438_v53  ;;  %v7492_v52 = vld [vmem:[%s9601_s12 + $0x8a4] ss:$8 sps:$4 sm:$0xff]   ;;  %v7490_v53 = vld [vmem:[%s9601_s12 + $0x8a0] ss:$8 sps:$4 sm:$0xff]  }
 0xaa1   : > { %5125 = vmatprep.subr.bf16.mxu1 %v7441_v10  ;;  %v7495_v10 = vld [vmem:[%s9601_s12 + $0x8b4] ss:$8 sps:$4 sm:$0xff]  }
 0xaa3   : > { %4874 = vmatpush1.bf16.msra.mxu0 %v7436_v12  ;;  %v7493_v12 = vld [vmem:[%s9601_s12 + $0x8b0] ss:$8 sps:$4 sm:$0xff]  }
 0xaa4   : > { %5126 = vmatpush1.bf16.msra.mxu1 %v7439_v54  ;;  %4875 = vmatprep.subr.bf16.mxu0 %v7444_v55  ;;  %v7498_v54 = vld [vmem:[%s9601_s12 + $0x8c4] ss:$8 sps:$4 sm:$0xff]   ;;  %v7496_v55 = vld [vmem:[%s9601_s12 + $0x8c0] ss:$8 sps:$4 sm:$0xff]  }
 0xaa5   : > { %5127 = vmatprep.subr.bf16.mxu1 %v7447_v56  ;;  %v7501_v56 = vld [vmem:[%s9601_s12 + $0x8d4] ss:$8 sps:$4 sm:$0xff]  }
 0xaa7   : > { %4876 = vmatpush1.bf16.msra.mxu0 %v7442_v58  ;;  %v7499_v58 = vld [vmem:[%s9601_s12 + $0x8d0] ss:$8 sps:$4 sm:$0xff]  }
 0xaa8   : > { %5128 = vmatpush1.bf16.msra.mxu1 %v7445_v60  ;;  %4877 = vmatprep.subr.bf16.mxu0 %v7450_v62  ;;  %v7504_v60 = vld [vmem:[%s9601_s12 + $0x8e4] ss:$8 sps:$4 sm:$0xff]   ;;  %v7502_v62 = vld [vmem:[%s9601_s12 + $0x8e0] ss:$8 sps:$4 sm:$0xff]  }
 0xaa9   : > { %5129 = vmatprep.subr.bf16.mxu1 %v7453_v0  ;;  %v7507_v0 = vld [vmem:[%s9601_s12 + $0x8f4] ss:$8 sps:$4 sm:$0xff]  }
 0xaab   : > { %4878 = vmatpush1.bf16.msra.mxu0 %v7448_v2  ;;  %v7505_v2 = vld [vmem:[%s9601_s12 + $0x8f0] ss:$8 sps:$4 sm:$0xff]  }
 0xaac   : > { %5130 = vmatpush1.bf16.msra.mxu1 %v7451_v3  ;;  %4879 = vmatprep.subr.bf16.mxu0 %v7456_v4  ;;  %v3886_v3 = vpop.permute.xlu1 %3885 }
 0xaad   : > { %5131 = vmatprep.subr.bf16.mxu1 %v7459_v5 }
 0xaaf   : > { %4880 = vmatpush1.bf16.msra.mxu0 %v7454_v9  ;;  %v3890_v9 = vpop.permute.xlu0 %3889 }
 0xab0   : > { %5132 = vmatpush1.bf16.msra.mxu1 %v7457_v13  ;;  %5353 = vmatprep.subr.bf16.mxu0 %v7462_v15  ;;  %v4138_v4 = vpop.permute.xlu1 %4137 }
 0xab2   : > { %4882 = vmatmul.mubr.bf16.vlgmr.msra.gmra.mrb[40].mxu0 %v8873_v57 }
 0xab3   : > { %5134 = vmatmul.mubr.bf16.vlgmr.msra.gmra.mrb[40].mxu1 %v8873_v57  ;;  %5354 = vmatpush1.bf16.msra.mxu0 %v7460_v16 }
 0xab4   : > { %5385 = vmatprep.mubr.bf16.mxu0 %v8875_v61  ;;  %5355 = vmatprep.subr.bf16.mxu0 %v7465_v17  ;;  %v7469_v61 = vld [vmem:[%s9601_s12 + $0x830] ss:$8 sps:$4 sm:$0xff]   ;;  %v4142_v5 = vpop.permute.xlu1 %4141 }
 0xab5   : > { %5488 = vmatprep.mubr.bf16.mxu1 %v7543_v1  ;;  %v7474_v1 = vld [vmem:[%s9601_s12 + $0x844] ss:$8 sps:$4 sm:$0xff]  }
 0xab7   : > { %5356 = vmatpush1.bf16.msra.mxu0 %v7463_v18 }
 0xab8   : > { %5357 = vmatprep.subr.bf16.mxu0 %v7468_v19 }
 0xabb   : > { %5358 = vmatpush1.bf16.msra.mxu0 %v7466_v20 }
 0xabc   : > { %5359 = vmatprep.subr.bf16.mxu0 %v7471_v21 }
 0xabf   : > { %5360 = vmatpush1.bf16.msra.mxu0 %v7469_v61 }
 0xac0   : > { %5361 = vmatprep.subr.bf16.mxu0 %v7474_v1 }
 0xac3   : > { %5362 = vmatpush1.bf16.msra.mxu0 %v7472_v24 }
 0xac4   : > { %5363 = vmatprep.subr.bf16.mxu0 %v7477_v29 }
 0xac5   : > { %v3369_v32 = vpop.f32.mrb[28].mxu0  ;;  %v3623_v27 = vpop.f32.mrb[28].mxu1 }
 0xac6   : > { %v3388_v33 = vmul.f32 %v3381_v22, %v3369_v32  ;;  %v3640_v59 = vmul.f32 %v3634_v30, %v3623_v27  ;;  %v3371_v34 = vpop.f32.mrb[29].mxu0  ;;  %v3625_v14 = vpop.f32.mrb[29].mxu1 }
 0xac7   : > { %v3389_v50 = vmul.f32 %v3381_v22, %v3371_v34  ;;  %v3641_v35 = vmul.f32 %v3634_v30, %v3625_v14  ;;  %5364 = vmatpush1.bf16.msra.mxu0 %v7475_v31  ;;  %v3373_v7 = vpop.f32.mrb[30].mxu0  ;;  %v3627_v6 = vpop.f32.mrb[30].mxu1 }
 0xac8   : > { %v3644_v36 = vadd.f32 %v3640_v59, %v3388_v33  ;;  %v3390_v37 = vmul.f32 %v3386_v28, %v3373_v7  ;;  %v3642_v38 = vmul.f32 %v3638_v25, %v3627_v6  ;;  %v3375_v39 = vpop.f32.mrb[31].mxu0  ;;  %v3629_v40 = vpop.f32.mrb[31].mxu1  ;;  %5365 = vmatprep.subr.bf16.mxu0 %v7480_v11 }
 0xac9   : > { %v3645_v42 = vadd.f32 %v3641_v35, %v3389_v50  ;;  %v3391_v63 = vmul.f32 %v3386_v28, %v3375_v39  ;;  %v3643_v43 = vmul.f32 %v3638_v25, %v3629_v40  ;;  %v4394_v14 = vpop.permute.xlu1 %4393  ;;  %v4390_v50 = vpop.permute.xlu0 %4389 }
 0xaca   : > { %v3646_v44 = vadd.f32 %v3642_v38, %v3390_v37 }
 0xacb   : > { %v3647_v45 = vadd.f32 %v3643_v43, %v3391_v63  ;;  %5366 = vmatpush1.bf16.msra.mxu0 %v7478_v8 }
 0xacc   : > { %5367 = vmatprep.subr.bf16.mxu0 %v7483_v41 }
 0xacd   : > { %v4642_v35 = vpop.permute.xlu1 %4641  ;;  %v4646_v6 = vpop.permute.xlu0 %4645 }
 0xacf   : > { %5368 = vmatpush1.bf16.msra.mxu0 %v7481_v46 }
 0xad0   : > { %5369 = vmatprep.subr.bf16.mxu0 %v7486_v47 }
 0xad3   : > { %5370 = vmatpush1.bf16.msra.mxu0 %v7484_v48 }
 0xad4   : > { %5371 = vmatprep.subr.bf16.mxu0 %v7489_v49 }
 0xad7   : > { %5372 = vmatpush1.bf16.msra.mxu0 %v7487_v51 }
 0xad8   : > { %5373 = vmatprep.subr.bf16.mxu0 %v7492_v52 }
 0xadb   : > { %5374 = vmatpush1.bf16.msra.mxu0 %v7490_v53 }
 0xadc   : > { %5375 = vmatprep.subr.bf16.mxu0 %v7495_v10 }
 0xadf   : > { %5376 = vmatpush1.bf16.msra.mxu0 %v7493_v12 }
 0xae0   : > { %5377 = vmatprep.subr.bf16.mxu0 %v7498_v54 }
 0xae3   : > { %5378 = vmatpush1.bf16.msra.mxu0 %v7496_v55 }
 0xae4   : > { %5379 = vmatprep.subr.bf16.mxu0 %v7501_v56  ;;  %v4894_v56 = vpop.permute.xlu1 %4893 }
 0xae7   : > { %5380 = vmatpush1.bf16.msra.mxu0 %v7499_v58 }
 0xae8   : > { %5381 = vmatprep.subr.bf16.mxu0 %v7504_v60  ;;  %v4898_v58 = vpop.permute.xlu1 %4897  ;;  %v5146_v60 = vpop.permute.xlu0 %5145 }
 0xaeb   : > { %5382 = vmatpush1.bf16.msra.mxu0 %v7502_v62 }
 0xaec   : > { %5383 = vmatprep.subr.bf16.mxu0 %v7507_v0  ;;  %v5150_v0 = vpop.permute.xlu1 %5149 }
 0xaef   : > { %5384 = vmatpush1.bf16.msra.mxu0 %v7505_v2 }
 0xaf2   : > { %5386 = vmatmul.mubr.bf16.vlgmr.msra.gmra.mrb[44].mxu0 %v8873_v57 }
 0xb05   : > { %v3875_v13 = vpop.f32.mrb[32].mxu0  ;;  %v4127_v15 = vpop.f32.mrb[32].mxu1 }
 0xb06   : > { %v3892_v16 = vmul.f32 %v3886_v3, %v3875_v13  ;;  %v3877_v17 = vpop.f32.mrb[33].mxu0  ;;  %v4129_v18 = vpop.f32.mrb[33].mxu1  ;;  %v4144_v1 = vmul.f32 %v4138_v4, %v4127_v15 }
 0xb07   : > { %v3893_v19 = vmul.f32 %v3886_v3, %v3877_v17  ;;  %v3879_v20 = vpop.f32.mrb[34].mxu0  ;;  %v4131_v21 = vpop.f32.mrb[34].mxu1  ;;  %v4145_v30 = vmul.f32 %v4138_v4, %v4129_v18 }
 0xb08   : > { %v3896_v61 = vadd.f32 %v3892_v16, %v3644_v36  ;;  %v3894_v22 = vmul.f32 %v3890_v9, %v3879_v20  ;;  %v3881_v24 = vpop.f32.mrb[35].mxu0  ;;  %v4133_v28 = vpop.f32.mrb[35].mxu1  ;;  %v4146_v11 = vmul.f32 %v4142_v5, %v4131_v21 }
 0xb09   : > { %v3897_v29 = vadd.f32 %v3893_v19, %v3645_v42  ;;  %v3895_v57 = vmul.f32 %v3890_v9, %v3881_v24  ;;  %v4147_v33 = vmul.f32 %v4142_v5, %v4133_v28 }
 0xb0a   : > { %v4148_v31 = vadd.f32 %v4144_v1, %v3896_v61  ;;  %v3898_v25 = vadd.f32 %v3894_v22, %v3646_v44 }
 0xb0b   : > { %v4149_v32 = vadd.f32 %v4145_v30, %v3897_v29  ;;  %v3899_v27 = vadd.f32 %v3895_v57, %v3647_v45 }
 0xb0c   : > { %v4150_v59 = vadd.f32 %v4146_v11, %v3898_v25  ;;  %v5398_v11 = vpop.permute.xlu1 %5397 }
 0xb0d   : > { %v4151_v34 = vadd.f32 %v4147_v33, %v3899_v27  ;;  %v5402_v27 = vpop.permute.xlu0 %5401 }
 0xb45   : > { %v4379_v7 = vpop.f32.mrb[36].mxu0 }
 0xb46   : > { %v4396_v8 = vmul.f32 %v4390_v50, %v4379_v7  ;;  %v4631_v36 = vpop.f32.mrb[36].mxu1  ;;  %v4381_v37 = vpop.f32.mrb[37].mxu0 }
 0xb47   : > { %v4397_v38 = vmul.f32 %v4390_v50, %v4381_v37  ;;  %v4633_v39 = vpop.f32.mrb[37].mxu1  ;;  %v4383_v40 = vpop.f32.mrb[38].mxu0  ;;  %v4648_v42 = vmul.f32 %v4642_v35, %v4631_v36 }
 0xb48   : > { %v4400_v41 = vadd.f32 %v4396_v8, %v4148_v31  ;;  %v4398_v63 = vmul.f32 %v4394_v14, %v4383_v40  ;;  %v4635_v43 = vpop.f32.mrb[38].mxu1  ;;  %v4385_v44 = vpop.f32.mrb[39].mxu0  ;;  %v4649_v46 = vmul.f32 %v4642_v35, %v4633_v39 }
 0xb49   : > { %v4401_v45 = vadd.f32 %v4397_v38, %v4149_v32  ;;  %v4399_v47 = vmul.f32 %v4394_v14, %v4385_v44  ;;  %v4637_v48 = vpop.f32.mrb[39].mxu1  ;;  %v4650_v52 = vmul.f32 %v4646_v6, %v4635_v43 }
 0xb4a   : > { %v4652_v49 = vadd.f32 %v4648_v42, %v4400_v41  ;;  %v4402_v51 = vadd.f32 %v4398_v63, %v4150_v59  ;;  %v4651_v12 = vmul.f32 %v4646_v6, %v4637_v48 }
 0xb4b   : > { %v4653_v53 = vadd.f32 %v4649_v46, %v4401_v45  ;;  %v4403_v10 = vadd.f32 %v4399_v47, %v4151_v34 }
 0xb4c   : > { %v4654_v54 = vadd.f32 %v4650_v52, %v4402_v51 }
 0xb4d   : > { %v4655_v55 = vadd.f32 %v4651_v12, %v4403_v10 }
 0xb85   : > { %v4883_v62 = vpop.f32.mrb[40].mxu0 }
 0xb86   : > { %v4900_v2 = vmul.f32 %v4894_v56, %v4883_v62  ;;  %v5135_v3 = vpop.f32.mrb[40].mxu1  ;;  %v4885_v4 = vpop.f32.mrb[41].mxu0 }
 0xb87   : > { %v4901_v5 = vmul.f32 %v4894_v56, %v4885_v4  ;;  %v5137_v9 = vpop.f32.mrb[41].mxu1  ;;  %v4887_v13 = vpop.f32.mrb[42].mxu0  ;;  %v5152_v16 = vmul.f32 %v5146_v60, %v5135_v3 }
 0xb88   : > { %v4904_v15 = vadd.f32 %v4900_v2, %v4652_v49  ;;  %v4902_v17 = vmul.f32 %v4898_v58, %v4887_v13  ;;  %v5139_v18 = vpop.f32.mrb[42].mxu1  ;;  %v4889_v19 = vpop.f32.mrb[43].mxu0  ;;  %v5153_v21 = vmul.f32 %v5146_v60, %v5137_v9 }
 0xb89   : > { %v4905_v20 = vadd.f32 %v4901_v5, %v4653_v53  ;;  %v4903_v61 = vmul.f32 %v4898_v58, %v4889_v19  ;;  %v5141_v1 = vpop.f32.mrb[43].mxu1  ;;  %v5154_v28 = vmul.f32 %v5150_v0, %v5139_v18 }
 0xb8a   : > { %v5156_v22 = vadd.f32 %v5152_v16, %v4904_v15  ;;  %v4906_v24 = vadd.f32 %v4902_v17, %v4654_v54  ;;  %v5155_v57 = vmul.f32 %v5150_v0, %v5141_v1 }
 0xb8b   : > { %v5157_v29 = vadd.f32 %v5153_v21, %v4905_v20  ;;  %v4907_v30 = vadd.f32 %v4903_v61, %v4655_v55  ;;  %v5448_v21 = vld [vmem:[%s9603_s14] sm:$0xf] }
 0xb8c   : > { %v5158_v31 = vadd.f32 %v5154_v28, %v4906_v24  ;;  %v5449_v1 = vpack.c.bf16 %v5448_v21, %v5448_v21 }
 0xb8d   : > { %v5159_v25 = vadd.f32 %v5155_v57, %v4907_v30 }
 0xbc5   : > { %v5387_v32 = vpop.f32.mrb[44].mxu0 }
 0xbc6   : > { %v5404_v33 = vmul.f32 %v5398_v11, %v5387_v32  ;;  %v5389_v59 = vpop.f32.mrb[45].mxu0 }
 0xbc7   : > { %v5405_v34 = vmul.f32 %v5398_v11, %v5389_v59  ;;  %v5391_v14 = vpop.f32.mrb[46].mxu0 }
 0xbc8   : > { %v5408_v50 = vadd.f32 %v5404_v33, %v5156_v22  ;;  %v5406_v35 = vmul.f32 %v5402_v27, %v5391_v14  ;;  %v5393_v7 = vpop.f32.mrb[47].mxu0 }
 0xbc9   : > { %v5409_v6 = vadd.f32 %v5405_v34, %v5157_v29  ;;  %v5407_v8 = vmul.f32 %v5402_v27, %v5393_v7 }
 0xbca   : > { %v5416_v36 = vmul.f32 0.044715, %v5408_v50  ;;  %v5410_v37 = vadd.f32 %v5406_v35, %v5158_v31  ;;  %v5412_v3 = vmul.f32 0.5, %v5408_v50 }
 0xbcb   : > { %v5417_v38 = vmul.f32 0.044715, %v5409_v6  ;;  %v5411_v39 = vadd.f32 %v5407_v8, %v5159_v25  ;;  %v5413_v9 = vmul.f32 0.5, %v5409_v6 }
 0xbcc   : > { %v5420_v40 = vmul.f32 %v5416_v36, %v5408_v50  ;;  %v5418_v41 = vmul.f32 0.044715, %v5410_v37  ;;  %v5414_v4 = vmul.f32 0.5, %v5410_v37 }
 0xbcd   : > { %v5421_v42 = vmul.f32 %v5417_v38, %v5409_v6  ;;  %v5419_v63 = vmul.f32 0.044715, %v5411_v39  ;;  %v5415_v13 = vmul.f32 0.5, %v5411_v39 }
 0xbce   : > { %v5424_v43 = vmul.f32 %v5420_v40, %v5408_v50  ;;  %v5422_v44 = vmul.f32 %v5418_v41, %v5410_v37 }
 0xbcf   : > { %v5423_v45 = vmul.f32 %v5419_v63, %v5411_v39  ;;  %v5425_v46 = vmul.f32 %v5421_v42, %v5409_v6 }
 0xbd0   : > { %v5428_v47 = vadd.f32 %v5424_v43, %v5408_v50  ;;  %v5426_v48 = vmul.f32 %v5422_v44, %v5410_v37 }
 0xbd1   : > { %v5427_v49 = vmul.f32 %v5423_v45, %v5411_v39  ;;  %v5429_v51 = vadd.f32 %v5425_v46, %v5409_v6 }
 0xbd2   : > { %v5430_v52 = vadd.f32 %v5426_v48, %v5410_v37  ;;  %v5432_v53 = vmul.f32 0.7978846, %v5428_v47 }
 0xbd3   : > { %v5431_v10 = vadd.f32 %v5427_v49, %v5411_v39  ;;  %v5433_v12 = vmul.f32 0.7978846, %v5429_v51 }
 0xbd4   : > { %v5434_v54 = vmul.f32 0.7978846, %v5430_v52  ;;  %7524 = vtanh.f32 %v5432_v53 }
 0xbd5   : > { %v5435_v55 = vmul.f32 0.7978846, %v5431_v10  ;;  %7526 = vtanh.f32 %v5433_v12 }
 0xbd6   : > { %7528 = vtanh.f32 %v5434_v54 }
 0xbd7   : > { %7530 = vtanh.f32 %v5435_v55 }
 0xbde   : > { %v7525_v56 = vpop.eup %7524 }
 0xbdf   : > { %v7527_v58 = vpop.eup %7526  ;;  %v5440_v60 = vadd.f32 1.0, %v7525_v56 }
 0xbe0   : > { %v7529_v62 = vpop.eup %7528  ;;  %v5441_v0 = vadd.f32 1.0, %v7527_v58 }
 0xbe1   : > { %v7531_v2 = vpop.eup %7530  ;;  %v5442_v5 = vadd.f32 1.0, %v7529_v62  ;;  %v5444_v16 = vmul.f32 %v5440_v60, %v5412_v3 }
 0xbe2   : > { %v5443_v15 = vadd.f32 1.0, %v7531_v2  ;;  %v5445_v18 = vmul.f32 %v5441_v0, %v5413_v9 }
 0xbe3   : > { %v5446_v17 = vmul.f32 %v5442_v5, %v5414_v4 }
 0xbe4   : > { %v5447_v19 = vmul.f32 %v5443_v15, %v5415_v13 }
 0xbe5   : > { %v5450_v20 = vpack.c.bf16 %v5446_v17, %v5444_v16 }
 0xbe6   : > { %v5451_v61 = vpack.c.bf16 %v5447_v19, %v5445_v18 }
 0xbe8   : > { %5456 = vmatprep.subr.bf16.mxu1 %v5451_v61 }
 0xbe9   : > { %5457 = vmatpush1.bf16.msra.mxu1 %v5450_v20 }
 0xbec   : > { %6602 = vmatmul.mubr.msk.bf16.vlgmr.msra.gmra.mrb[44].mxu1 %vm5452_vm3, %v5449_v1 }
 0xcbf   : > { %v5490_v22 = vpop.f32.mrb[44].mxu1 }
 0xcc0   : > { %v5491_v24 = vadd.f32 %v5490_v22, %v8700_v23  ;;  %v5492_v28 = vpop.f32.mrb[45].mxu1 }
 0xcc1   : > { %v5493_v29 = vadd.f32 %v5492_v28, %v8703_v26  ;;  %v5494_v30 = vpop.f32.mrb[46].mxu1 }
 0xcc2   : > { %v5495_v57 = vpop.f32.mrb[47].mxu1 }
 0xcc3   : > { %v5499_v31 = vcombine.low %v5491_v24, %v5493_v29 }
 0xcc5   : > { %5501 = vst [vmem:[%s494_s16] sm:$0xff] %v5499_v31 }
 0xcc6 PF: > { %s25_s18 = sadd.s32 1, %s7541_s18  }
 0xcc7   : > { %p22_p4 = scmp.ge.s32.totalorder %s25_s18, 4  }
 0xcc9   :  { %24 = sbr.rel (!%p22_p4) target bundleno = 1 (0x1), region = 126 }

</bundles_post_ra>
